<compile_context>
chip_gen: v6e
topology: v6e:2x2x1
jax: 0.10.0
libtpu: 0.0.40
codegen_flags: <defaults>
</compile_context>

<pallas_src>
import jax
import jax.numpy as jnp
from jax import lax
from jax.experimental import pallas as pl
from jax.experimental.pallas import tpu as pltpu


# ----------------------------------------------------------------------------
# Fused Conv2d(k=5, stride=1, "same" pad) + bias + ReLU + MaxPool2d(4).
# ----------------------------------------------------------------------------
def conv_relu_pool(x_nhwc, w_oihw, b, pool=4):
    N, H, W, Cin = x_nhwc.shape
    Cout, Cin_w, KH, KW = w_oihw.shape
    assert Cin == Cin_w and H % pool == 0 and W % pool == 0
    ph, pw = KH // 2, KW // 2
    Ho, Wo = H // pool, W // pool
    Hp = H + KH - 1
    KWC = KW * Cin

    # Wrapper-side layout plumbing (cheap XLA ops, fused under jit):
    # zero-pad spatially, then expand the KW taps into the channel (lane) dim.
    xp = jnp.pad(x_nhwc, ((0, 0), (ph, ph), (pw, pw), (0, 0)))
    patches = jnp.concatenate(
        [xp[:, :, kw:kw + W, :] for kw in range(KW)], axis=-1
    ).astype(jnp.bfloat16)                                    # (N, Hp, W, KW*Cin)
    # Weight: (Cout, Cin, KH, KW) -> (KH, KW*Cin, Cout), (kw, cin) order matches.
    wk = (jnp.transpose(w_oihw, (2, 3, 1, 0))
          .reshape(KH, KWC, Cout).astype(jnp.bfloat16))
    b2 = b.reshape(1, Cout).astype(jnp.float32)

    def kernel(p_ref, w_ref, b_ref, o_ref, row_ref):
        # p_ref : (Hp, W, KW*Cin) bf16   w_ref : (KH, KW*Cin, Cout) bf16
        # b_ref : (1, Cout) f32          o_ref : (Ho, Wo, Cout) f32
        # row_ref: VMEM scratch (W, Cout) f32   (h-pooled conv row)
        def body(ho, carry):
            h0 = ho * pool
            hmax = None
            # 4 conv rows of this pool window; each is KH matmuls with
            # M = W, K = KW*Cin, f32 accumulation kept in vregs.
            for j in range(pool):
                acc = jnp.dot(p_ref[h0 + j], w_ref[0],
                              preferred_element_type=jnp.float32)
                for kh in range(1, KH):
                    acc = acc + jnp.dot(p_ref[h0 + j + kh], w_ref[kh],
                                        preferred_element_type=jnp.float32)
                z = jnp.maximum(acc + b_ref[...], 0.0)        # (W, Cout) f32
                hmax = z if j == 0 else jnp.maximum(hmax, z)  # pool over h
            # Pool over w: stride-`pool` sublane reads from the VMEM scratch.
            row_ref[...] = hmax
            wmax = row_ref[pl.ds(0, Wo, stride=pool), :]
            for i in range(1, pool):
                wmax = jnp.maximum(wmax, row_ref[pl.ds(i, Wo, stride=pool), :])
            o_ref[pl.ds(ho, 1)] = wmax.reshape(1, Wo, Cout)
            return carry

        lax.fori_loop(0, Ho, body, 0)

    return pl.pallas_call(
        kernel,
        out_shape=jax.ShapeDtypeStruct((N, Ho, Wo, Cout), jnp.float32),
        grid=(N,),
        in_specs=[
            pl.BlockSpec((None, Hp, W, KWC), lambda n: (n, 0, 0, 0)),
            pl.BlockSpec((KH, KWC, Cout), lambda n: (0, 0, 0)),
            pl.BlockSpec((1, Cout), lambda n: (0, 0)),
        ],
        out_specs=pl.BlockSpec((None, Ho, Wo, Cout), lambda n: (n, 0, 0, 0)),
        scratch_shapes=[pltpu.VMEM((W, Cout), jnp.float32)],
        compiler_params=pltpu.CompilerParams(
            dimension_semantics=("parallel",),   # v7x: batch sharded over both TCs
        ),
    )(patches, wk, b2)


# ----------------------------------------------------------------------------
# Linear: y = x @ w_km + b   (w_km already (K, M); whole problem in one block)
# ----------------------------------------------------------------------------
def linear(x, w_km, b):
    N, K = x.shape
    M = w_km.shape[1]
    xb = x.astype(jnp.bfloat16)
    wb = w_km.astype(jnp.bfloat16)
    b2 = b.reshape(1, M).astype(jnp.float32)

    def kernel(x_ref, w_ref, b_ref, o_ref):
        o_ref[...] = (jnp.dot(x_ref[...], w_ref[...],
                              preferred_element_type=jnp.float32)
                      + b_ref[...]).astype(o_ref.dtype)

    return pl.pallas_call(
        kernel,
        out_shape=jax.ShapeDtypeStruct((N, M), jnp.float32),
        grid=(1,),
        in_specs=[
            pl.BlockSpec((N, K), lambda i: (0, 0)),
            pl.BlockSpec((K, M), lambda i: (0, 0)),
            pl.BlockSpec((1, M), lambda i: (0, 0)),
        ],
        out_specs=pl.BlockSpec((N, M), lambda i: (0, 0)),
    )(xb, wb, b2)


# ----------------------------------------------------------------------------
# Full CnnNet forward.
# ----------------------------------------------------------------------------
def cnn_net_forward(x_nchw, params):
    w1, b1, w2, b2, w3, b3 = params
    x = jnp.transpose(x_nchw, (0, 2, 3, 1))        # NCHW -> NHWC
    x = conv_relu_pool(x, w1, b1)                  # (N, 24, 28, 16)
    x = conv_relu_pool(x, w2, b2)                  # (N,  6,  7, 32)
    N, Ho, Wo, C = x.shape
    xf = x.reshape(N, Ho * Wo * C)                 # NHWC flatten (h, w, c) — free
    # Fold PyTorch's NCHW flatten (c, h, w) into the Linear weight columns so the
    # activation path needs no runtime transpose.
    w3p = (w3.reshape(w3.shape[0], C, Ho, Wo)
              .transpose(0, 2, 3, 1)
              .reshape(w3.shape[0], Ho * Wo * C))
    return linear(xf, jnp.transpose(w3p), b3)      # (N, 40)


def init_params(key):
    k = jax.random.split(key, 6)
    w1 = 0.1 * jax.random.normal(k[0], (16, 3, 5, 5), jnp.float32)
    b1 = 0.1 * jax.random.normal(k[1], (16,), jnp.float32)
    w2 = 0.05 * jax.random.normal(k[2], (32, 16, 5, 5), jnp.float32)
    b2 = 0.1 * jax.random.normal(k[3], (32,), jnp.float32)
    w3 = 0.02 * jax.random.normal(k[4], (40, 32 * 6 * 7), jnp.float32)
    b3 = 0.1 * jax.random.normal(k[5], (40,), jnp.float32)
    return (w1, b1, w2, b2, w3, b3)


if __name__ == "__main__":
    key = jax.random.PRNGKey(0)
    kx, kp = jax.random.split(key)
    # Input spatial size 96x112 so that two MaxPool(4) stages give 6x7,
    # matching the Linear layer's 32*6*7 input features.
    x = jax.random.normal(kx, (2, 3, 96, 112), jnp.float32)
    params = init_params(kp)

    fwd = jax.jit(cnn_net_forward)
    out = jax.block_until_ready(fwd(x, params))
    assert out.shape == (2, 40) and out.dtype == jnp.float32
    print("KERNEL_OK")
</pallas_src>

<mosaic_0001>
module attributes {stable_mosaic.version = 11 : i64} {
  func.func @kernel(%arg0: i32, %arg1: memref<1x100x112x15xbf16, #tpu.memory_space<vmem>>, %arg2: memref<5x15x16xbf16, #tpu.memory_space<vmem>>, %arg3: memref<1x16xf32, #tpu.memory_space<vmem>>, %arg4: memref<1x24x28x16xf32, #tpu.memory_space<vmem>>, %arg5: memref<112x16xf32, #tpu.memory_space<vmem>>) attributes {dimension_semantics = [#tpu.dimension_semantics<parallel>], iteration_bounds = array<i64: 2>, scalar_prefetch = 0 : i64, scratch_operands = 1 : i64, tpu.core_type = #tpu.core_type<tc>, window_params = [{transform_indices = @transform_0, window_bounds = array<i64: 1, 100, 112, 15>}, {pipeline_mode = #tpu.pipeline_mode<synchronous>, transform_indices = @transform_1, window_bounds = array<i64: 5, 15, 16>}, {pipeline_mode = #tpu.pipeline_mode<synchronous>, transform_indices = @transform_2, window_bounds = array<i64: 1, 16>}, {transform_indices = @transform_3, window_bounds = array<i64: 1, 24, 28, 16>}]} {
    %c0_i32 = arith.constant 0 : i32
    %c24_i32 = arith.constant 24 : i32
    %0 = arith.addi %c0_i32, %c24_i32 : i32
    %c1_i32 = arith.constant 1 : i32
    scf.for %arg6 = %c0_i32 to %0 step %c1_i32  : i32 {
      %c4_i32 = arith.constant 4 : i32
      %1 = arith.muli %arg6, %c4_i32 : i32
      %c0_i32_1 = arith.constant 0 : i32
      %2 = arith.addi %1, %c0_i32_1 : i32
      %c0 = arith.constant 0 : index
      %3 = arith.index_cast %2 : i32 to index
      %c0_2 = arith.constant 0 : index
      %c0_3 = arith.constant 0 : index
      %4 = vector.load %arg1[%c0, %3, %c0_2, %c0_3] : memref<1x100x112x15xbf16, #tpu.memory_space<vmem>>, vector<1x1x112x15xbf16>
      %5 = vector.shape_cast %4 : vector<1x1x112x15xbf16> to vector<112x15xbf16>
      %c0_4 = arith.constant 0 : index
      %c0_5 = arith.constant 0 : index
      %c0_6 = arith.constant 0 : index
      %6 = vector.load %arg2[%c0_4, %c0_5, %c0_6] : memref<5x15x16xbf16, #tpu.memory_space<vmem>>, vector<1x15x16xbf16>
      %7 = vector.shape_cast %6 : vector<1x15x16xbf16> to vector<15x16xbf16>
      %cst = arith.constant dense<0.000000e+00> : vector<112x16xf32>
      %8 = tpu.matmul %5, %7, %cst {dimension_numbers = #tpu.dot_dimension_numbers<[1], [0], [0], [1], [0, 0, 1, 1], [], []>} : vector<112x15xbf16>, vector<15x16xbf16>, vector<112x16xf32> -> vector<112x16xf32>
      %c0_i32_7 = arith.constant 0 : i32
      %9 = arith.addi %1, %c0_i32_7 : i32
      %c1_i32_8 = arith.constant 1 : i32
      %10 = arith.addi %9, %c1_i32_8 : i32
      %c0_9 = arith.constant 0 : index
      %11 = arith.index_cast %10 : i32 to index
      %c0_10 = arith.constant 0 : index
      %c0_11 = arith.constant 0 : index
      %12 = vector.load %arg1[%c0_9, %11, %c0_10, %c0_11] : memref<1x100x112x15xbf16, #tpu.memory_space<vmem>>, vector<1x1x112x15xbf16>
      %13 = vector.shape_cast %12 : vector<1x1x112x15xbf16> to vector<112x15xbf16>
      %c1 = arith.constant 1 : index
      %c0_12 = arith.constant 0 : index
      %c0_13 = arith.constant 0 : index
      %14 = vector.load %arg2[%c1, %c0_12, %c0_13] : memref<5x15x16xbf16, #tpu.memory_space<vmem>>, vector<1x15x16xbf16>
      %15 = vector.shape_cast %14 : vector<1x15x16xbf16> to vector<15x16xbf16>
      %cst_14 = arith.constant dense<0.000000e+00> : vector<112x16xf32>
      %16 = tpu.matmul %13, %15, %cst_14 {dimension_numbers = #tpu.dot_dimension_numbers<[1], [0], [0], [1], [0, 0, 1, 1], [], []>} : vector<112x15xbf16>, vector<15x16xbf16>, vector<112x16xf32> -> vector<112x16xf32>
      %17 = arith.addf %8, %16 : vector<112x16xf32>
      %c0_i32_15 = arith.constant 0 : i32
      %18 = arith.addi %1, %c0_i32_15 : i32
      %c2_i32 = arith.constant 2 : i32
      %19 = arith.addi %18, %c2_i32 : i32
      %c0_16 = arith.constant 0 : index
      %20 = arith.index_cast %19 : i32 to index
      %c0_17 = arith.constant 0 : index
      %c0_18 = arith.constant 0 : index
      %21 = vector.load %arg1[%c0_16, %20, %c0_17, %c0_18] : memref<1x100x112x15xbf16, #tpu.memory_space<vmem>>, vector<1x1x112x15xbf16>
      %22 = vector.shape_cast %21 : vector<1x1x112x15xbf16> to vector<112x15xbf16>
      %c2 = arith.constant 2 : index
      %c0_19 = arith.constant 0 : index
      %c0_20 = arith.constant 0 : index
      %23 = vector.load %arg2[%c2, %c0_19, %c0_20] : memref<5x15x16xbf16, #tpu.memory_space<vmem>>, vector<1x15x16xbf16>
      %24 = vector.shape_cast %23 : vector<1x15x16xbf16> to vector<15x16xbf16>
      %cst_21 = arith.constant dense<0.000000e+00> : vector<112x16xf32>
      %25 = tpu.matmul %22, %24, %cst_21 {dimension_numbers = #tpu.dot_dimension_numbers<[1], [0], [0], [1], [0, 0, 1, 1], [], []>} : vector<112x15xbf16>, vector<15x16xbf16>, vector<112x16xf32> -> vector<112x16xf32>
      %26 = arith.addf %17, %25 : vector<112x16xf32>
      %c0_i32_22 = arith.constant 0 : i32
      %27 = arith.addi %1, %c0_i32_22 : i32
      %c3_i32 = arith.constant 3 : i32
      %28 = arith.addi %27, %c3_i32 : i32
      %c0_23 = arith.constant 0 : index
      %29 = arith.index_cast %28 : i32 to index
      %c0_24 = arith.constant 0 : index
      %c0_25 = arith.constant 0 : index
      %30 = vector.load %arg1[%c0_23, %29, %c0_24, %c0_25] : memref<1x100x112x15xbf16, #tpu.memory_space<vmem>>, vector<1x1x112x15xbf16>
      %31 = vector.shape_cast %30 : vector<1x1x112x15xbf16> to vector<112x15xbf16>
      %c3 = arith.constant 3 : index
      %c0_26 = arith.constant 0 : index
      %c0_27 = arith.constant 0 : index
      %32 = vector.load %arg2[%c3, %c0_26, %c0_27] : memref<5x15x16xbf16, #tpu.memory_space<vmem>>, vector<1x15x16xbf16>
      %33 = vector.shape_cast %32 : vector<1x15x16xbf16> to vector<15x16xbf16>
      %cst_28 = arith.constant dense<0.000000e+00> : vector<112x16xf32>
      %34 = tpu.matmul %31, %33, %cst_28 {dimension_numbers = #tpu.dot_dimension_numbers<[1], [0], [0], [1], [0, 0, 1, 1], [], []>} : vector<112x15xbf16>, vector<15x16xbf16>, vector<112x16xf32> -> vector<112x16xf32>
      %35 = arith.addf %26, %34 : vector<112x16xf32>
      %c0_i32_29 = arith.constant 0 : i32
      %36 = arith.addi %1, %c0_i32_29 : i32
      %c4_i32_30 = arith.constant 4 : i32
      %37 = arith.addi %36, %c4_i32_30 : i32
      %c0_31 = arith.constant 0 : index
      %38 = arith.index_cast %37 : i32 to index
      %c0_32 = arith.constant 0 : index
      %c0_33 = arith.constant 0 : index
      %39 = vector.load %arg1[%c0_31, %38, %c0_32, %c0_33] : memref<1x100x112x15xbf16, #tpu.memory_space<vmem>>, vector<1x1x112x15xbf16>
      %40 = vector.shape_cast %39 : vector<1x1x112x15xbf16> to vector<112x15xbf16>
      %c4 = arith.constant 4 : index
      %c0_34 = arith.constant 0 : index
      %c0_35 = arith.constant 0 : index
      %41 = vector.load %arg2[%c4, %c0_34, %c0_35] : memref<5x15x16xbf16, #tpu.memory_space<vmem>>, vector<1x15x16xbf16>
      %42 = vector.shape_cast %41 : vector<1x15x16xbf16> to vector<15x16xbf16>
      %cst_36 = arith.constant dense<0.000000e+00> : vector<112x16xf32>
      %43 = tpu.matmul %40, %42, %cst_36 {dimension_numbers = #tpu.dot_dimension_numbers<[1], [0], [0], [1], [0, 0, 1, 1], [], []>} : vector<112x15xbf16>, vector<15x16xbf16>, vector<112x16xf32> -> vector<112x16xf32>
      %44 = arith.addf %35, %43 : vector<112x16xf32>
      %c0_37 = arith.constant 0 : index
      %c0_38 = arith.constant 0 : index
      %45 = vector.load %arg3[%c0_37, %c0_38] : memref<1x16xf32, #tpu.memory_space<vmem>>, vector<1x16xf32>
      %46 = vector.broadcast %45 : vector<1x16xf32> to vector<112x16xf32>
      %47 = arith.addf %44, %46 : vector<112x16xf32>
      %cst_39 = arith.constant 0.000000e+00 : f32
      %48 = vector.broadcast %cst_39 : f32 to vector<112x16xf32>
      %49 = arith.maximumf %47, %48 : vector<112x16xf32>
      %c1_i32_40 = arith.constant 1 : i32
      %50 = arith.addi %1, %c1_i32_40 : i32
      %c0_41 = arith.constant 0 : index
      %51 = arith.index_cast %50 : i32 to index
      %c0_42 = arith.constant 0 : index
      %c0_43 = arith.constant 0 : index
      %52 = vector.load %arg1[%c0_41, %51, %c0_42, %c0_43] : memref<1x100x112x15xbf16, #tpu.memory_space<vmem>>, vector<1x1x112x15xbf16>
      %53 = vector.shape_cast %52 : vector<1x1x112x15xbf16> to vector<112x15xbf16>
      %c0_44 = arith.constant 0 : index
      %c0_45 = arith.constant 0 : index
      %c0_46 = arith.constant 0 : index
      %54 = vector.load %arg2[%c0_44, %c0_45, %c0_46] : memref<5x15x16xbf16, #tpu.memory_space<vmem>>, vector<1x15x16xbf16>
      %55 = vector.shape_cast %54 : vector<1x15x16xbf16> to vector<15x16xbf16>
      %cst_47 = arith.constant dense<0.000000e+00> : vector<112x16xf32>
      %56 = tpu.matmul %53, %55, %cst_47 {dimension_numbers = #tpu.dot_dimension_numbers<[1], [0], [0], [1], [0, 0, 1, 1], [], []>} : vector<112x15xbf16>, vector<15x16xbf16>, vector<112x16xf32> -> vector<112x16xf32>
      %c1_i32_48 = arith.constant 1 : i32
      %57 = arith.addi %1, %c1_i32_48 : i32
      %c1_i32_49 = arith.constant 1 : i32
      %58 = arith.addi %57, %c1_i32_49 : i32
      %c0_50 = arith.constant 0 : index
      %59 = arith.index_cast %58 : i32 to index
      %c0_51 = arith.constant 0 : index
      %c0_52 = arith.constant 0 : index
      %60 = vector.load %arg1[%c0_50, %59, %c0_51, %c0_52] : memref<1x100x112x15xbf16, #tpu.memory_space<vmem>>, vector<1x1x112x15xbf16>
      %61 = vector.shape_cast %60 : vector<1x1x112x15xbf16> to vector<112x15xbf16>
      %c1_53 = arith.constant 1 : index
      %c0_54 = arith.constant 0 : index
      %c0_55 = arith.constant 0 : index
      %62 = vector.load %arg2[%c1_53, %c0_54, %c0_55] : memref<5x15x16xbf16, #tpu.memory_space<vmem>>, vector<1x15x16xbf16>
      %63 = vector.shape_cast %62 : vector<1x15x16xbf16> to vector<15x16xbf16>
      %cst_56 = arith.constant dense<0.000000e+00> : vector<112x16xf32>
      %64 = tpu.matmul %61, %63, %cst_56 {dimension_numbers = #tpu.dot_dimension_numbers<[1], [0], [0], [1], [0, 0, 1, 1], [], []>} : vector<112x15xbf16>, vector<15x16xbf16>, vector<112x16xf32> -> vector<112x16xf32>
      %65 = arith.addf %56, %64 : vector<112x16xf32>
      %c1_i32_57 = arith.constant 1 : i32
      %66 = arith.addi %1, %c1_i32_57 : i32
      %c2_i32_58 = arith.constant 2 : i32
      %67 = arith.addi %66, %c2_i32_58 : i32
      %c0_59 = arith.constant 0 : index
      %68 = arith.index_cast %67 : i32 to index
      %c0_60 = arith.constant 0 : index
      %c0_61 = arith.constant 0 : index
      %69 = vector.load %arg1[%c0_59, %68, %c0_60, %c0_61] : memref<1x100x112x15xbf16, #tpu.memory_space<vmem>>, vector<1x1x112x15xbf16>
      %70 = vector.shape_cast %69 : vector<1x1x112x15xbf16> to vector<112x15xbf16>
      %c2_62 = arith.constant 2 : index
      %c0_63 = arith.constant 0 : index
      %c0_64 = arith.constant 0 : index
      %71 = vector.load %arg2[%c2_62, %c0_63, %c0_64] : memref<5x15x16xbf16, #tpu.memory_space<vmem>>, vector<1x15x16xbf16>
      %72 = vector.shape_cast %71 : vector<1x15x16xbf16> to vector<15x16xbf16>
      %cst_65 = arith.constant dense<0.000000e+00> : vector<112x16xf32>
      %73 = tpu.matmul %70, %72, %cst_65 {dimension_numbers = #tpu.dot_dimension_numbers<[1], [0], [0], [1], [0, 0, 1, 1], [], []>} : vector<112x15xbf16>, vector<15x16xbf16>, vector<112x16xf32> -> vector<112x16xf32>
      %74 = arith.addf %65, %73 : vector<112x16xf32>
      %c1_i32_66 = arith.constant 1 : i32
      %75 = arith.addi %1, %c1_i32_66 : i32
      %c3_i32_67 = arith.constant 3 : i32
      %76 = arith.addi %75, %c3_i32_67 : i32
      %c0_68 = arith.constant 0 : index
      %77 = arith.index_cast %76 : i32 to index
      %c0_69 = arith.constant 0 : index
      %c0_70 = arith.constant 0 : index
      %78 = vector.load %arg1[%c0_68, %77, %c0_69, %c0_70] : memref<1x100x112x15xbf16, #tpu.memory_space<vmem>>, vector<1x1x112x15xbf16>
      %79 = vector.shape_cast %78 : vector<1x1x112x15xbf16> to vector<112x15xbf16>
      %c3_71 = arith.constant 3 : index
      %c0_72 = arith.constant 0 : index
      %c0_73 = arith.constant 0 : index
      %80 = vector.load %arg2[%c3_71, %c0_72, %c0_73] : memref<5x15x16xbf16, #tpu.memory_space<vmem>>, vector<1x15x16xbf16>
      %81 = vector.shape_cast %80 : vector<1x15x16xbf16> to vector<15x16xbf16>
      %cst_74 = arith.constant dense<0.000000e+00> : vector<112x16xf32>
      %82 = tpu.matmul %79, %81, %cst_74 {dimension_numbers = #tpu.dot_dimension_numbers<[1], [0], [0], [1], [0, 0, 1, 1], [], []>} : vector<112x15xbf16>, vector<15x16xbf16>, vector<112x16xf32> -> vector<112x16xf32>
      %83 = arith.addf %74, %82 : vector<112x16xf32>
      %c1_i32_75 = arith.constant 1 : i32
      %84 = arith.addi %1, %c1_i32_75 : i32
      %c4_i32_76 = arith.constant 4 : i32
      %85 = arith.addi %84, %c4_i32_76 : i32
      %c0_77 = arith.constant 0 : index
      %86 = arith.index_cast %85 : i32 to index
      %c0_78 = arith.constant 0 : index
      %c0_79 = arith.constant 0 : index
      %87 = vector.load %arg1[%c0_77, %86, %c0_78, %c0_79] : memref<1x100x112x15xbf16, #tpu.memory_space<vmem>>, vector<1x1x112x15xbf16>
      %88 = vector.shape_cast %87 : vector<1x1x112x15xbf16> to vector<112x15xbf16>
      %c4_80 = arith.constant 4 : index
      %c0_81 = arith.constant 0 : index
      %c0_82 = arith.constant 0 : index
      %89 = vector.load %arg2[%c4_80, %c0_81, %c0_82] : memref<5x15x16xbf16, #tpu.memory_space<vmem>>, vector<1x15x16xbf16>
      %90 = vector.shape_cast %89 : vector<1x15x16xbf16> to vector<15x16xbf16>
      %cst_83 = arith.constant dense<0.000000e+00> : vector<112x16xf32>
      %91 = tpu.matmul %88, %90, %cst_83 {dimension_numbers = #tpu.dot_dimension_numbers<[1], [0], [0], [1], [0, 0, 1, 1], [], []>} : vector<112x15xbf16>, vector<15x16xbf16>, vector<112x16xf32> -> vector<112x16xf32>
      %92 = arith.addf %83, %91 : vector<112x16xf32>
      %c0_84 = arith.constant 0 : index
      %c0_85 = arith.constant 0 : index
      %93 = vector.load %arg3[%c0_84, %c0_85] : memref<1x16xf32, #tpu.memory_space<vmem>>, vector<1x16xf32>
      %94 = vector.broadcast %93 : vector<1x16xf32> to vector<112x16xf32>
      %95 = arith.addf %92, %94 : vector<112x16xf32>
      %cst_86 = arith.constant 0.000000e+00 : f32
      %96 = vector.broadcast %cst_86 : f32 to vector<112x16xf32>
      %97 = arith.maximumf %95, %96 : vector<112x16xf32>
      %98 = arith.maximumf %49, %97 : vector<112x16xf32>
      %c2_i32_87 = arith.constant 2 : i32
      %99 = arith.addi %1, %c2_i32_87 : i32
      %c0_88 = arith.constant 0 : index
      %100 = arith.index_cast %99 : i32 to index
      %c0_89 = arith.constant 0 : index
      %c0_90 = arith.constant 0 : index
      %101 = vector.load %arg1[%c0_88, %100, %c0_89, %c0_90] : memref<1x100x112x15xbf16, #tpu.memory_space<vmem>>, vector<1x1x112x15xbf16>
      %102 = vector.shape_cast %101 : vector<1x1x112x15xbf16> to vector<112x15xbf16>
      %c0_91 = arith.constant 0 : index
      %c0_92 = arith.constant 0 : index
      %c0_93 = arith.constant 0 : index
      %103 = vector.load %arg2[%c0_91, %c0_92, %c0_93] : memref<5x15x16xbf16, #tpu.memory_space<vmem>>, vector<1x15x16xbf16>
      %104 = vector.shape_cast %103 : vector<1x15x16xbf16> to vector<15x16xbf16>
      %cst_94 = arith.constant dense<0.000000e+00> : vector<112x16xf32>
      %105 = tpu.matmul %102, %104, %cst_94 {dimension_numbers = #tpu.dot_dimension_numbers<[1], [0], [0], [1], [0, 0, 1, 1], [], []>} : vector<112x15xbf16>, vector<15x16xbf16>, vector<112x16xf32> -> vector<112x16xf32>
      %c2_i32_95 = arith.constant 2 : i32
      %106 = arith.addi %1, %c2_i32_95 : i32
      %c1_i32_96 = arith.constant 1 : i32
      %107 = arith.addi %106, %c1_i32_96 : i32
      %c0_97 = arith.constant 0 : index
      %108 = arith.index_cast %107 : i32 to index
      %c0_98 = arith.constant 0 : index
      %c0_99 = arith.constant 0 : index
      %109 = vector.load %arg1[%c0_97, %108, %c0_98, %c0_99] : memref<1x100x112x15xbf16, #tpu.memory_space<vmem>>, vector<1x1x112x15xbf16>
      %110 = vector.shape_cast %109 : vector<1x1x112x15xbf16> to vector<112x15xbf16>
      %c1_100 = arith.constant 1 : index
      %c0_101 = arith.constant 0 : index
      %c0_102 = arith.constant 0 : index
      %111 = vector.load %arg2[%c1_100, %c0_101, %c0_102] : memref<5x15x16xbf16, #tpu.memory_space<vmem>>, vector<1x15x16xbf16>
      %112 = vector.shape_cast %111 : vector<1x15x16xbf16> to vector<15x16xbf16>
      %cst_103 = arith.constant dense<0.000000e+00> : vector<112x16xf32>
      %113 = tpu.matmul %110, %112, %cst_103 {dimension_numbers = #tpu.dot_dimension_numbers<[1], [0], [0], [1], [0, 0, 1, 1], [], []>} : vector<112x15xbf16>, vector<15x16xbf16>, vector<112x16xf32> -> vector<112x16xf32>
      %114 = arith.addf %105, %113 : vector<112x16xf32>
      %c2_i32_104 = arith.constant 2 : i32
      %115 = arith.addi %1, %c2_i32_104 : i32
      %c2_i32_105 = arith.constant 2 : i32
      %116 = arith.addi %115, %c2_i32_105 : i32
      %c0_106 = arith.constant 0 : index
      %117 = arith.index_cast %116 : i32 to index
      %c0_107 = arith.constant 0 : index
      %c0_108 = arith.constant 0 : index
      %118 = vector.load %arg1[%c0_106, %117, %c0_107, %c0_108] : memref<1x100x112x15xbf16, #tpu.memory_space<vmem>>, vector<1x1x112x15xbf16>
      %119 = vector.shape_cast %118 : vector<1x1x112x15xbf16> to vector<112x15xbf16>
      %c2_109 = arith.constant 2 : index
      %c0_110 = arith.constant 0 : index
      %c0_111 = arith.constant 0 : index
      %120 = vector.load %arg2[%c2_109, %c0_110, %c0_111] : memref<5x15x16xbf16, #tpu.memory_space<vmem>>, vector<1x15x16xbf16>
      %121 = vector.shape_cast %120 : vector<1x15x16xbf16> to vector<15x16xbf16>
      %cst_112 = arith.constant dense<0.000000e+00> : vector<112x16xf32>
      %122 = tpu.matmul %119, %121, %cst_112 {dimension_numbers = #tpu.dot_dimension_numbers<[1], [0], [0], [1], [0, 0, 1, 1], [], []>} : vector<112x15xbf16>, vector<15x16xbf16>, vector<112x16xf32> -> vector<112x16xf32>
      %123 = arith.addf %114, %122 : vector<112x16xf32>
      %c2_i32_113 = arith.constant 2 : i32
      %124 = arith.addi %1, %c2_i32_113 : i32
      %c3_i32_114 = arith.constant 3 : i32
      %125 = arith.addi %124, %c3_i32_114 : i32
      %c0_115 = arith.constant 0 : index
      %126 = arith.index_cast %125 : i32 to index
      %c0_116 = arith.constant 0 : index
      %c0_117 = arith.constant 0 : index
      %127 = vector.load %arg1[%c0_115, %126, %c0_116, %c0_117] : memref<1x100x112x15xbf16, #tpu.memory_space<vmem>>, vector<1x1x112x15xbf16>
      %128 = vector.shape_cast %127 : vector<1x1x112x15xbf16> to vector<112x15xbf16>
      %c3_118 = arith.constant 3 : index
      %c0_119 = arith.constant 0 : index
      %c0_120 = arith.constant 0 : index
      %129 = vector.load %arg2[%c3_118, %c0_119, %c0_120] : memref<5x15x16xbf16, #tpu.memory_space<vmem>>, vector<1x15x16xbf16>
      %130 = vector.shape_cast %129 : vector<1x15x16xbf16> to vector<15x16xbf16>
      %cst_121 = arith.constant dense<0.000000e+00> : vector<112x16xf32>
      %131 = tpu.matmul %128, %130, %cst_121 {dimension_numbers = #tpu.dot_dimension_numbers<[1], [0], [0], [1], [0, 0, 1, 1], [], []>} : vector<112x15xbf16>, vector<15x16xbf16>, vector<112x16xf32> -> vector<112x16xf32>
      %132 = arith.addf %123, %131 : vector<112x16xf32>
      %c2_i32_122 = arith.constant 2 : i32
      %133 = arith.addi %1, %c2_i32_122 : i32
      %c4_i32_123 = arith.constant 4 : i32
      %134 = arith.addi %133, %c4_i32_123 : i32
      %c0_124 = arith.constant 0 : index
      %135 = arith.index_cast %134 : i32 to index
      %c0_125 = arith.constant 0 : index
      %c0_126 = arith.constant 0 : index
      %136 = vector.load %arg1[%c0_124, %135, %c0_125, %c0_126] : memref<1x100x112x15xbf16, #tpu.memory_space<vmem>>, vector<1x1x112x15xbf16>
      %137 = vector.shape_cast %136 : vector<1x1x112x15xbf16> to vector<112x15xbf16>
      %c4_127 = arith.constant 4 : index
      %c0_128 = arith.constant 0 : index
      %c0_129 = arith.constant 0 : index
      %138 = vector.load %arg2[%c4_127, %c0_128, %c0_129] : memref<5x15x16xbf16, #tpu.memory_space<vmem>>, vector<1x15x16xbf16>
      %139 = vector.shape_cast %138 : vector<1x15x16xbf16> to vector<15x16xbf16>
      %cst_130 = arith.constant dense<0.000000e+00> : vector<112x16xf32>
      %140 = tpu.matmul %137, %139, %cst_130 {dimension_numbers = #tpu.dot_dimension_numbers<[1], [0], [0], [1], [0, 0, 1, 1], [], []>} : vector<112x15xbf16>, vector<15x16xbf16>, vector<112x16xf32> -> vector<112x16xf32>
      %141 = arith.addf %132, %140 : vector<112x16xf32>
      %c0_131 = arith.constant 0 : index
      %c0_132 = arith.constant 0 : index
      %142 = vector.load %arg3[%c0_131, %c0_132] : memref<1x16xf32, #tpu.memory_space<vmem>>, vector<1x16xf32>
      %143 = vector.broadcast %142 : vector<1x16xf32> to vector<112x16xf32>
      %144 = arith.addf %141, %143 : vector<112x16xf32>
      %cst_133 = arith.constant 0.000000e+00 : f32
      %145 = vector.broadcast %cst_133 : f32 to vector<112x16xf32>
      %146 = arith.maximumf %144, %145 : vector<112x16xf32>
      %147 = arith.maximumf %98, %146 : vector<112x16xf32>
      %c3_i32_134 = arith.constant 3 : i32
      %148 = arith.addi %1, %c3_i32_134 : i32
      %c0_135 = arith.constant 0 : index
      %149 = arith.index_cast %148 : i32 to index
      %c0_136 = arith.constant 0 : index
      %c0_137 = arith.constant 0 : index
      %150 = vector.load %arg1[%c0_135, %149, %c0_136, %c0_137] : memref<1x100x112x15xbf16, #tpu.memory_space<vmem>>, vector<1x1x112x15xbf16>
      %151 = vector.shape_cast %150 : vector<1x1x112x15xbf16> to vector<112x15xbf16>
      %c0_138 = arith.constant 0 : index
      %c0_139 = arith.constant 0 : index
      %c0_140 = arith.constant 0 : index
      %152 = vector.load %arg2[%c0_138, %c0_139, %c0_140] : memref<5x15x16xbf16, #tpu.memory_space<vmem>>, vector<1x15x16xbf16>
      %153 = vector.shape_cast %152 : vector<1x15x16xbf16> to vector<15x16xbf16>
      %cst_141 = arith.constant dense<0.000000e+00> : vector<112x16xf32>
      %154 = tpu.matmul %151, %153, %cst_141 {dimension_numbers = #tpu.dot_dimension_numbers<[1], [0], [0], [1], [0, 0, 1, 1], [], []>} : vector<112x15xbf16>, vector<15x16xbf16>, vector<112x16xf32> -> vector<112x16xf32>
      %c3_i32_142 = arith.constant 3 : i32
      %155 = arith.addi %1, %c3_i32_142 : i32
      %c1_i32_143 = arith.constant 1 : i32
      %156 = arith.addi %155, %c1_i32_143 : i32
      %c0_144 = arith.constant 0 : index
      %157 = arith.index_cast %156 : i32 to index
      %c0_145 = arith.constant 0 : index
      %c0_146 = arith.constant 0 : index
      %158 = vector.load %arg1[%c0_144, %157, %c0_145, %c0_146] : memref<1x100x112x15xbf16, #tpu.memory_space<vmem>>, vector<1x1x112x15xbf16>
      %159 = vector.shape_cast %158 : vector<1x1x112x15xbf16> to vector<112x15xbf16>
      %c1_147 = arith.constant 1 : index
      %c0_148 = arith.constant 0 : index
      %c0_149 = arith.constant 0 : index
      %160 = vector.load %arg2[%c1_147, %c0_148, %c0_149] : memref<5x15x16xbf16, #tpu.memory_space<vmem>>, vector<1x15x16xbf16>
      %161 = vector.shape_cast %160 : vector<1x15x16xbf16> to vector<15x16xbf16>
      %cst_150 = arith.constant dense<0.000000e+00> : vector<112x16xf32>
      %162 = tpu.matmul %159, %161, %cst_150 {dimension_numbers = #tpu.dot_dimension_numbers<[1], [0], [0], [1], [0, 0, 1, 1], [], []>} : vector<112x15xbf16>, vector<15x16xbf16>, vector<112x16xf32> -> vector<112x16xf32>
      %163 = arith.addf %154, %162 : vector<112x16xf32>
      %c3_i32_151 = arith.constant 3 : i32
      %164 = arith.addi %1, %c3_i32_151 : i32
      %c2_i32_152 = arith.constant 2 : i32
      %165 = arith.addi %164, %c2_i32_152 : i32
      %c0_153 = arith.constant 0 : index
      %166 = arith.index_cast %165 : i32 to index
      %c0_154 = arith.constant 0 : index
      %c0_155 = arith.constant 0 : index
      %167 = vector.load %arg1[%c0_153, %166, %c0_154, %c0_155] : memref<1x100x112x15xbf16, #tpu.memory_space<vmem>>, vector<1x1x112x15xbf16>
      %168 = vector.shape_cast %167 : vector<1x1x112x15xbf16> to vector<112x15xbf16>
      %c2_156 = arith.constant 2 : index
      %c0_157 = arith.constant 0 : index
      %c0_158 = arith.constant 0 : index
      %169 = vector.load %arg2[%c2_156, %c0_157, %c0_158] : memref<5x15x16xbf16, #tpu.memory_space<vmem>>, vector<1x15x16xbf16>
      %170 = vector.shape_cast %169 : vector<1x15x16xbf16> to vector<15x16xbf16>
      %cst_159 = arith.constant dense<0.000000e+00> : vector<112x16xf32>
      %171 = tpu.matmul %168, %170, %cst_159 {dimension_numbers = #tpu.dot_dimension_numbers<[1], [0], [0], [1], [0, 0, 1, 1], [], []>} : vector<112x15xbf16>, vector<15x16xbf16>, vector<112x16xf32> -> vector<112x16xf32>
      %172 = arith.addf %163, %171 : vector<112x16xf32>
      %c3_i32_160 = arith.constant 3 : i32
      %173 = arith.addi %1, %c3_i32_160 : i32
      %c3_i32_161 = arith.constant 3 : i32
      %174 = arith.addi %173, %c3_i32_161 : i32
      %c0_162 = arith.constant 0 : index
      %175 = arith.index_cast %174 : i32 to index
      %c0_163 = arith.constant 0 : index
      %c0_164 = arith.constant 0 : index
      %176 = vector.load %arg1[%c0_162, %175, %c0_163, %c0_164] : memref<1x100x112x15xbf16, #tpu.memory_space<vmem>>, vector<1x1x112x15xbf16>
      %177 = vector.shape_cast %176 : vector<1x1x112x15xbf16> to vector<112x15xbf16>
      %c3_165 = arith.constant 3 : index
      %c0_166 = arith.constant 0 : index
      %c0_167 = arith.constant 0 : index
      %178 = vector.load %arg2[%c3_165, %c0_166, %c0_167] : memref<5x15x16xbf16, #tpu.memory_space<vmem>>, vector<1x15x16xbf16>
      %179 = vector.shape_cast %178 : vector<1x15x16xbf16> to vector<15x16xbf16>
      %cst_168 = arith.constant dense<0.000000e+00> : vector<112x16xf32>
      %180 = tpu.matmul %177, %179, %cst_168 {dimension_numbers = #tpu.dot_dimension_numbers<[1], [0], [0], [1], [0, 0, 1, 1], [], []>} : vector<112x15xbf16>, vector<15x16xbf16>, vector<112x16xf32> -> vector<112x16xf32>
      %181 = arith.addf %172, %180 : vector<112x16xf32>
      %c3_i32_169 = arith.constant 3 : i32
      %182 = arith.addi %1, %c3_i32_169 : i32
      %c4_i32_170 = arith.constant 4 : i32
      %183 = arith.addi %182, %c4_i32_170 : i32
      %c0_171 = arith.constant 0 : index
      %184 = arith.index_cast %183 : i32 to index
      %c0_172 = arith.constant 0 : index
      %c0_173 = arith.constant 0 : index
      %185 = vector.load %arg1[%c0_171, %184, %c0_172, %c0_173] : memref<1x100x112x15xbf16, #tpu.memory_space<vmem>>, vector<1x1x112x15xbf16>
      %186 = vector.shape_cast %185 : vector<1x1x112x15xbf16> to vector<112x15xbf16>
      %c4_174 = arith.constant 4 : index
      %c0_175 = arith.constant 0 : index
      %c0_176 = arith.constant 0 : index
      %187 = vector.load %arg2[%c4_174, %c0_175, %c0_176] : memref<5x15x16xbf16, #tpu.memory_space<vmem>>, vector<1x15x16xbf16>
      %188 = vector.shape_cast %187 : vector<1x15x16xbf16> to vector<15x16xbf16>
      %cst_177 = arith.constant dense<0.000000e+00> : vector<112x16xf32>
      %189 = tpu.matmul %186, %188, %cst_177 {dimension_numbers = #tpu.dot_dimension_numbers<[1], [0], [0], [1], [0, 0, 1, 1], [], []>} : vector<112x15xbf16>, vector<15x16xbf16>, vector<112x16xf32> -> vector<112x16xf32>
      %190 = arith.addf %181, %189 : vector<112x16xf32>
      %c0_178 = arith.constant 0 : index
      %c0_179 = arith.constant 0 : index
      %191 = vector.load %arg3[%c0_178, %c0_179] : memref<1x16xf32, #tpu.memory_space<vmem>>, vector<1x16xf32>
      %192 = vector.broadcast %191 : vector<1x16xf32> to vector<112x16xf32>
      %193 = arith.addf %190, %192 : vector<112x16xf32>
      %cst_180 = arith.constant 0.000000e+00 : f32
      %194 = vector.broadcast %cst_180 : f32 to vector<112x16xf32>
      %195 = arith.maximumf %193, %194 : vector<112x16xf32>
      %196 = arith.maximumf %147, %195 : vector<112x16xf32>
      %c0_181 = arith.constant 0 : index
      %c0_182 = arith.constant 0 : index
      %197 = vector.load %arg5[%c0_181, %c0_182] : memref<112x16xf32, #tpu.memory_space<vmem>>, vector<112x16xf32>
      tpu.vector_store %arg5[%c0_181, %c0_182], %196 {strides = array<i32>} : memref<112x16xf32, #tpu.memory_space<vmem>>, vector<112x16xf32>,
      %c0_183 = arith.constant 0 : index
      %c0_184 = arith.constant 0 : index
      %198 = tpu.strided_load %arg5[%c0_183, %c0_184] {strides = array<i32: 4, 1>} : memref<112x16xf32, #tpu.memory_space<vmem>>, vector<28x16xf32>
      %c1_185 = arith.constant 1 : index
      %c0_186 = arith.constant 0 : index
      %199 = tpu.strided_load %arg5[%c1_185, %c0_186] {strides = array<i32: 4, 1>} : memref<112x16xf32, #tpu.memory_space<vmem>>, vector<28x16xf32>
      %200 = arith.maximumf %198, %199 : vector<28x16xf32>
      %c2_187 = arith.constant 2 : index
      %c0_188 = arith.constant 0 : index
      %201 = tpu.strided_load %arg5[%c2_187, %c0_188] {strides = array<i32: 4, 1>} : memref<112x16xf32, #tpu.memory_space<vmem>>, vector<28x16xf32>
      %202 = arith.maximumf %200, %201 : vector<28x16xf32>
      %c3_189 = arith.constant 3 : index
      %c0_190 = arith.constant 0 : index
      %203 = tpu.strided_load %arg5[%c3_189, %c0_190] {strides = array<i32: 4, 1>} : memref<112x16xf32, #tpu.memory_space<vmem>>, vector<28x16xf32>
      %204 = arith.maximumf %202, %203 : vector<28x16xf32>
      %205 = vector.shape_cast %204 : vector<28x16xf32> to vector<1x28x16xf32>
      %c0_191 = arith.constant 0 : index
      %206 = arith.index_cast %arg6 : i32 to index
      %c0_192 = arith.constant 0 : index
      %c0_193 = arith.constant 0 : index
      %207 = vector.load %arg4[%c0_191, %206, %c0_192, %c0_193] : memref<1x24x28x16xf32, #tpu.memory_space<vmem>>, vector<1x1x28x16xf32>
      %208 = vector.shape_cast %207 : vector<1x1x28x16xf32> to vector<1x28x16xf32>
      %209 = vector.shape_cast %205 : vector<1x28x16xf32> to vector<1x1x28x16xf32>
      tpu.vector_store %arg4[%c0_191, %206, %c0_192, %c0_193], %209 {strides = array<i32>} : memref<1x24x28x16xf32, #tpu.memory_space<vmem>>, vector<1x1x28x16xf32>,
    }
    %c24_i32_0 = arith.constant 24 : i32
    return
  }
  func.func @transform_0(%arg0: i32) -> (i32, i32, i32, i32) {
    %c0_i32 = arith.constant 0 : i32
    %c0_i32_0 = arith.constant 0 : i32
    %c0_i32_1 = arith.constant 0 : i32
    %c0_i32_2 = arith.constant 0 : i32
    return %arg0, %c0_i32, %c0_i32_0, %c0_i32_1 : i32, i32, i32, i32
  }
  func.func @transform_1(%arg0: i32) -> (i32, i32, i32) {
    %c0_i32 = arith.constant 0 : i32
    %c0_i32_0 = arith.constant 0 : i32
    %c0_i32_1 = arith.constant 0 : i32
    %c0_i32_2 = arith.constant 0 : i32
    return %c0_i32, %c0_i32_0, %c0_i32_1 : i32, i32, i32
  }
  func.func @transform_2(%arg0: i32) -> (i32, i32) {
    %c0_i32 = arith.constant 0 : i32
    %c0_i32_0 = arith.constant 0 : i32
    %c0_i32_1 = arith.constant 0 : i32
    return %c0_i32, %c0_i32_0 : i32, i32
  }
  func.func @transform_3(%arg0: i32) -> (i32, i32, i32, i32) {
    %c0_i32 = arith.constant 0 : i32
    %c0_i32_0 = arith.constant 0 : i32
    %c0_i32_1 = arith.constant 0 : i32
    %c0_i32_2 = arith.constant 0 : i32
    return %arg0, %c0_i32, %c0_i32_0, %c0_i32_1 : i32, i32, i32, i32
  }
}

module attributes {stable_mosaic.version = 11 : i64} {
  func.func @kernel(%arg0: i32, %arg1: memref<1x28x28x80xbf16, #tpu.memory_space<vmem>>, %arg2: memref<5x80x32xbf16, #tpu.memory_space<vmem>>, %arg3: memref<1x32xf32, #tpu.memory_space<vmem>>, %arg4: memref<1x6x7x32xf32, #tpu.memory_space<vmem>>, %arg5: memref<28x32xf32, #tpu.memory_space<vmem>>) attributes {dimension_semantics = [#tpu.dimension_semantics<parallel>], iteration_bounds = array<i64: 2>, scalar_prefetch = 0 : i64, scratch_operands = 1 : i64, tpu.core_type = #tpu.core_type<tc>, window_params = [{transform_indices = @transform_0, window_bounds = array<i64: 1, 28, 28, 80>}, {pipeline_mode = #tpu.pipeline_mode<synchronous>, transform_indices = @transform_1, window_bounds = array<i64: 5, 80, 32>}, {pipeline_mode = #tpu.pipeline_mode<synchronous>, transform_indices = @transform_2, window_bounds = array<i64: 1, 32>}, {transform_indices = @transform_3, window_bounds = array<i64: 1, 6, 7, 32>}]} {
    %c0_i32 = arith.constant 0 : i32
    %c6_i32 = arith.constant 6 : i32
    %0 = arith.addi %c0_i32, %c6_i32 : i32
    %c1_i32 = arith.constant 1 : i32
    scf.for %arg6 = %c0_i32 to %0 step %c1_i32  : i32 {
      %c4_i32 = arith.constant 4 : i32
      %1 = arith.muli %arg6, %c4_i32 : i32
      %c0_i32_1 = arith.constant 0 : i32
      %2 = arith.addi %1, %c0_i32_1 : i32
      %c0 = arith.constant 0 : index
      %3 = arith.index_cast %2 : i32 to index
      %c0_2 = arith.constant 0 : index
      %c0_3 = arith.constant 0 : index
      %4 = vector.load %arg1[%c0, %3, %c0_2, %c0_3] : memref<1x28x28x80xbf16, #tpu.memory_space<vmem>>, vector<1x1x28x80xbf16>
      %5 = vector.shape_cast %4 : vector<1x1x28x80xbf16> to vector<28x80xbf16>
      %c0_4 = arith.constant 0 : index
      %c0_5 = arith.constant 0 : index
      %c0_6 = arith.constant 0 : index
      %6 = vector.load %arg2[%c0_4, %c0_5, %c0_6] : memref<5x80x32xbf16, #tpu.memory_space<vmem>>, vector<1x80x32xbf16>
      %7 = vector.shape_cast %6 : vector<1x80x32xbf16> to vector<80x32xbf16>
      %cst = arith.constant dense<0.000000e+00> : vector<28x32xf32>
      %8 = tpu.matmul %5, %7, %cst {dimension_numbers = #tpu.dot_dimension_numbers<[1], [0], [0], [1], [0, 0, 1, 1], [], []>} : vector<28x80xbf16>, vector<80x32xbf16>, vector<28x32xf32> -> vector<28x32xf32>
      %c0_i32_7 = arith.constant 0 : i32
      %9 = arith.addi %1, %c0_i32_7 : i32
      %c1_i32_8 = arith.constant 1 : i32
      %10 = arith.addi %9, %c1_i32_8 : i32
      %c0_9 = arith.constant 0 : index
      %11 = arith.index_cast %10 : i32 to index
      %c0_10 = arith.constant 0 : index
      %c0_11 = arith.constant 0 : index
      %12 = vector.load %arg1[%c0_9, %11, %c0_10, %c0_11] : memref<1x28x28x80xbf16, #tpu.memory_space<vmem>>, vector<1x1x28x80xbf16>
      %13 = vector.shape_cast %12 : vector<1x1x28x80xbf16> to vector<28x80xbf16>
      %c1 = arith.constant 1 : index
      %c0_12 = arith.constant 0 : index
      %c0_13 = arith.constant 0 : index
      %14 = vector.load %arg2[%c1, %c0_12, %c0_13] : memref<5x80x32xbf16, #tpu.memory_space<vmem>>, vector<1x80x32xbf16>
      %15 = vector.shape_cast %14 : vector<1x80x32xbf16> to vector<80x32xbf16>
      %cst_14 = arith.constant dense<0.000000e+00> : vector<28x32xf32>
      %16 = tpu.matmul %13, %15, %cst_14 {dimension_numbers = #tpu.dot_dimension_numbers<[1], [0], [0], [1], [0, 0, 1, 1], [], []>} : vector<28x80xbf16>, vector<80x32xbf16>, vector<28x32xf32> -> vector<28x32xf32>
      %17 = arith.addf %8, %16 : vector<28x32xf32>
      %c0_i32_15 = arith.constant 0 : i32
      %18 = arith.addi %1, %c0_i32_15 : i32
      %c2_i32 = arith.constant 2 : i32
      %19 = arith.addi %18, %c2_i32 : i32
      %c0_16 = arith.constant 0 : index
      %20 = arith.index_cast %19 : i32 to index
      %c0_17 = arith.constant 0 : index
      %c0_18 = arith.constant 0 : index
      %21 = vector.load %arg1[%c0_16, %20, %c0_17, %c0_18] : memref<1x28x28x80xbf16, #tpu.memory_space<vmem>>, vector<1x1x28x80xbf16>
      %22 = vector.shape_cast %21 : vector<1x1x28x80xbf16> to vector<28x80xbf16>
      %c2 = arith.constant 2 : index
      %c0_19 = arith.constant 0 : index
      %c0_20 = arith.constant 0 : index
      %23 = vector.load %arg2[%c2, %c0_19, %c0_20] : memref<5x80x32xbf16, #tpu.memory_space<vmem>>, vector<1x80x32xbf16>
      %24 = vector.shape_cast %23 : vector<1x80x32xbf16> to vector<80x32xbf16>
      %cst_21 = arith.constant dense<0.000000e+00> : vector<28x32xf32>
      %25 = tpu.matmul %22, %24, %cst_21 {dimension_numbers = #tpu.dot_dimension_numbers<[1], [0], [0], [1], [0, 0, 1, 1], [], []>} : vector<28x80xbf16>, vector<80x32xbf16>, vector<28x32xf32> -> vector<28x32xf32>
      %26 = arith.addf %17, %25 : vector<28x32xf32>
      %c0_i32_22 = arith.constant 0 : i32
      %27 = arith.addi %1, %c0_i32_22 : i32
      %c3_i32 = arith.constant 3 : i32
      %28 = arith.addi %27, %c3_i32 : i32
      %c0_23 = arith.constant 0 : index
      %29 = arith.index_cast %28 : i32 to index
      %c0_24 = arith.constant 0 : index
      %c0_25 = arith.constant 0 : index
      %30 = vector.load %arg1[%c0_23, %29, %c0_24, %c0_25] : memref<1x28x28x80xbf16, #tpu.memory_space<vmem>>, vector<1x1x28x80xbf16>
      %31 = vector.shape_cast %30 : vector<1x1x28x80xbf16> to vector<28x80xbf16>
      %c3 = arith.constant 3 : index
      %c0_26 = arith.constant 0 : index
      %c0_27 = arith.constant 0 : index
      %32 = vector.load %arg2[%c3, %c0_26, %c0_27] : memref<5x80x32xbf16, #tpu.memory_space<vmem>>, vector<1x80x32xbf16>
      %33 = vector.shape_cast %32 : vector<1x80x32xbf16> to vector<80x32xbf16>
      %cst_28 = arith.constant dense<0.000000e+00> : vector<28x32xf32>
      %34 = tpu.matmul %31, %33, %cst_28 {dimension_numbers = #tpu.dot_dimension_numbers<[1], [0], [0], [1], [0, 0, 1, 1], [], []>} : vector<28x80xbf16>, vector<80x32xbf16>, vector<28x32xf32> -> vector<28x32xf32>
      %35 = arith.addf %26, %34 : vector<28x32xf32>
      %c0_i32_29 = arith.constant 0 : i32
      %36 = arith.addi %1, %c0_i32_29 : i32
      %c4_i32_30 = arith.constant 4 : i32
      %37 = arith.addi %36, %c4_i32_30 : i32
      %c0_31 = arith.constant 0 : index
      %38 = arith.index_cast %37 : i32 to index
      %c0_32 = arith.constant 0 : index
      %c0_33 = arith.constant 0 : index
      %39 = vector.load %arg1[%c0_31, %38, %c0_32, %c0_33] : memref<1x28x28x80xbf16, #tpu.memory_space<vmem>>, vector<1x1x28x80xbf16>
      %40 = vector.shape_cast %39 : vector<1x1x28x80xbf16> to vector<28x80xbf16>
      %c4 = arith.constant 4 : index
      %c0_34 = arith.constant 0 : index
      %c0_35 = arith.constant 0 : index
      %41 = vector.load %arg2[%c4, %c0_34, %c0_35] : memref<5x80x32xbf16, #tpu.memory_space<vmem>>, vector<1x80x32xbf16>
      %42 = vector.shape_cast %41 : vector<1x80x32xbf16> to vector<80x32xbf16>
      %cst_36 = arith.constant dense<0.000000e+00> : vector<28x32xf32>
      %43 = tpu.matmul %40, %42, %cst_36 {dimension_numbers = #tpu.dot_dimension_numbers<[1], [0], [0], [1], [0, 0, 1, 1], [], []>} : vector<28x80xbf16>, vector<80x32xbf16>, vector<28x32xf32> -> vector<28x32xf32>
      %44 = arith.addf %35, %43 : vector<28x32xf32>
      %c0_37 = arith.constant 0 : index
      %c0_38 = arith.constant 0 : index
      %45 = vector.load %arg3[%c0_37, %c0_38] : memref<1x32xf32, #tpu.memory_space<vmem>>, vector<1x32xf32>
      %46 = vector.broadcast %45 : vector<1x32xf32> to vector<28x32xf32>
      %47 = arith.addf %44, %46 : vector<28x32xf32>
      %cst_39 = arith.constant 0.000000e+00 : f32
      %48 = vector.broadcast %cst_39 : f32 to vector<28x32xf32>
      %49 = arith.maximumf %47, %48 : vector<28x32xf32>
      %c1_i32_40 = arith.constant 1 : i32
      %50 = arith.addi %1, %c1_i32_40 : i32
      %c0_41 = arith.constant 0 : index
      %51 = arith.index_cast %50 : i32 to index
      %c0_42 = arith.constant 0 : index
      %c0_43 = arith.constant 0 : index
      %52 = vector.load %arg1[%c0_41, %51, %c0_42, %c0_43] : memref<1x28x28x80xbf16, #tpu.memory_space<vmem>>, vector<1x1x28x80xbf16>
      %53 = vector.shape_cast %52 : vector<1x1x28x80xbf16> to vector<28x80xbf16>
      %c0_44 = arith.constant 0 : index
      %c0_45 = arith.constant 0 : index
      %c0_46 = arith.constant 0 : index
      %54 = vector.load %arg2[%c0_44, %c0_45, %c0_46] : memref<5x80x32xbf16, #tpu.memory_space<vmem>>, vector<1x80x32xbf16>
      %55 = vector.shape_cast %54 : vector<1x80x32xbf16> to vector<80x32xbf16>
      %cst_47 = arith.constant dense<0.000000e+00> : vector<28x32xf32>
      %56 = tpu.matmul %53, %55, %cst_47 {dimension_numbers = #tpu.dot_dimension_numbers<[1], [0], [0], [1], [0, 0, 1, 1], [], []>} : vector<28x80xbf16>, vector<80x32xbf16>, vector<28x32xf32> -> vector<28x32xf32>
      %c1_i32_48 = arith.constant 1 : i32
      %57 = arith.addi %1, %c1_i32_48 : i32
      %c1_i32_49 = arith.constant 1 : i32
      %58 = arith.addi %57, %c1_i32_49 : i32
      %c0_50 = arith.constant 0 : index
      %59 = arith.index_cast %58 : i32 to index
      %c0_51 = arith.constant 0 : index
      %c0_52 = arith.constant 0 : index
      %60 = vector.load %arg1[%c0_50, %59, %c0_51, %c0_52] : memref<1x28x28x80xbf16, #tpu.memory_space<vmem>>, vector<1x1x28x80xbf16>
      %61 = vector.shape_cast %60 : vector<1x1x28x80xbf16> to vector<28x80xbf16>
      %c1_53 = arith.constant 1 : index
      %c0_54 = arith.constant 0 : index
      %c0_55 = arith.constant 0 : index
      %62 = vector.load %arg2[%c1_53, %c0_54, %c0_55] : memref<5x80x32xbf16, #tpu.memory_space<vmem>>, vector<1x80x32xbf16>
      %63 = vector.shape_cast %62 : vector<1x80x32xbf16> to vector<80x32xbf16>
      %cst_56 = arith.constant dense<0.000000e+00> : vector<28x32xf32>
      %64 = tpu.matmul %61, %63, %cst_56 {dimension_numbers = #tpu.dot_dimension_numbers<[1], [0], [0], [1], [0, 0, 1, 1], [], []>} : vector<28x80xbf16>, vector<80x32xbf16>, vector<28x32xf32> -> vector<28x32xf32>
      %65 = arith.addf %56, %64 : vector<28x32xf32>
      %c1_i32_57 = arith.constant 1 : i32
      %66 = arith.addi %1, %c1_i32_57 : i32
      %c2_i32_58 = arith.constant 2 : i32
      %67 = arith.addi %66, %c2_i32_58 : i32
      %c0_59 = arith.constant 0 : index
      %68 = arith.index_cast %67 : i32 to index
      %c0_60 = arith.constant 0 : index
      %c0_61 = arith.constant 0 : index
      %69 = vector.load %arg1[%c0_59, %68, %c0_60, %c0_61] : memref<1x28x28x80xbf16, #tpu.memory_space<vmem>>, vector<1x1x28x80xbf16>
      %70 = vector.shape_cast %69 : vector<1x1x28x80xbf16> to vector<28x80xbf16>
      %c2_62 = arith.constant 2 : index
      %c0_63 = arith.constant 0 : index
      %c0_64 = arith.constant 0 : index
      %71 = vector.load %arg2[%c2_62, %c0_63, %c0_64] : memref<5x80x32xbf16, #tpu.memory_space<vmem>>, vector<1x80x32xbf16>
      %72 = vector.shape_cast %71 : vector<1x80x32xbf16> to vector<80x32xbf16>
      %cst_65 = arith.constant dense<0.000000e+00> : vector<28x32xf32>
      %73 = tpu.matmul %70, %72, %cst_65 {dimension_numbers = #tpu.dot_dimension_numbers<[1], [0], [0], [1], [0, 0, 1, 1], [], []>} : vector<28x80xbf16>, vector<80x32xbf16>, vector<28x32xf32> -> vector<28x32xf32>
      %74 = arith.addf %65, %73 : vector<28x32xf32>
      %c1_i32_66 = arith.constant 1 : i32
      %75 = arith.addi %1, %c1_i32_66 : i32
      %c3_i32_67 = arith.constant 3 : i32
      %76 = arith.addi %75, %c3_i32_67 : i32
      %c0_68 = arith.constant 0 : index
      %77 = arith.index_cast %76 : i32 to index
      %c0_69 = arith.constant 0 : index
      %c0_70 = arith.constant 0 : index
      %78 = vector.load %arg1[%c0_68, %77, %c0_69, %c0_70] : memref<1x28x28x80xbf16, #tpu.memory_space<vmem>>, vector<1x1x28x80xbf16>
      %79 = vector.shape_cast %78 : vector<1x1x28x80xbf16> to vector<28x80xbf16>
      %c3_71 = arith.constant 3 : index
      %c0_72 = arith.constant 0 : index
      %c0_73 = arith.constant 0 : index
      %80 = vector.load %arg2[%c3_71, %c0_72, %c0_73] : memref<5x80x32xbf16, #tpu.memory_space<vmem>>, vector<1x80x32xbf16>
      %81 = vector.shape_cast %80 : vector<1x80x32xbf16> to vector<80x32xbf16>
      %cst_74 = arith.constant dense<0.000000e+00> : vector<28x32xf32>
      %82 = tpu.matmul %79, %81, %cst_74 {dimension_numbers = #tpu.dot_dimension_numbers<[1], [0], [0], [1], [0, 0, 1, 1], [], []>} : vector<28x80xbf16>, vector<80x32xbf16>, vector<28x32xf32> -> vector<28x32xf32>
      %83 = arith.addf %74, %82 : vector<28x32xf32>
      %c1_i32_75 = arith.constant 1 : i32
      %84 = arith.addi %1, %c1_i32_75 : i32
      %c4_i32_76 = arith.constant 4 : i32
      %85 = arith.addi %84, %c4_i32_76 : i32
      %c0_77 = arith.constant 0 : index
      %86 = arith.index_cast %85 : i32 to index
      %c0_78 = arith.constant 0 : index
      %c0_79 = arith.constant 0 : index
      %87 = vector.load %arg1[%c0_77, %86, %c0_78, %c0_79] : memref<1x28x28x80xbf16, #tpu.memory_space<vmem>>, vector<1x1x28x80xbf16>
      %88 = vector.shape_cast %87 : vector<1x1x28x80xbf16> to vector<28x80xbf16>
      %c4_80 = arith.constant 4 : index
      %c0_81 = arith.constant 0 : index
      %c0_82 = arith.constant 0 : index
      %89 = vector.load %arg2[%c4_80, %c0_81, %c0_82] : memref<5x80x32xbf16, #tpu.memory_space<vmem>>, vector<1x80x32xbf16>
      %90 = vector.shape_cast %89 : vector<1x80x32xbf16> to vector<80x32xbf16>
      %cst_83 = arith.constant dense<0.000000e+00> : vector<28x32xf32>
      %91 = tpu.matmul %88, %90, %cst_83 {dimension_numbers = #tpu.dot_dimension_numbers<[1], [0], [0], [1], [0, 0, 1, 1], [], []>} : vector<28x80xbf16>, vector<80x32xbf16>, vector<28x32xf32> -> vector<28x32xf32>
      %92 = arith.addf %83, %91 : vector<28x32xf32>
      %c0_84 = arith.constant 0 : index
      %c0_85 = arith.constant 0 : index
      %93 = vector.load %arg3[%c0_84, %c0_85] : memref<1x32xf32, #tpu.memory_space<vmem>>, vector<1x32xf32>
      %94 = vector.broadcast %93 : vector<1x32xf32> to vector<28x32xf32>
      %95 = arith.addf %92, %94 : vector<28x32xf32>
      %cst_86 = arith.constant 0.000000e+00 : f32
      %96 = vector.broadcast %cst_86 : f32 to vector<28x32xf32>
      %97 = arith.maximumf %95, %96 : vector<28x32xf32>
      %98 = arith.maximumf %49, %97 : vector<28x32xf32>
      %c2_i32_87 = arith.constant 2 : i32
      %99 = arith.addi %1, %c2_i32_87 : i32
      %c0_88 = arith.constant 0 : index
      %100 = arith.index_cast %99 : i32 to index
      %c0_89 = arith.constant 0 : index
      %c0_90 = arith.constant 0 : index
      %101 = vector.load %arg1[%c0_88, %100, %c0_89, %c0_90] : memref<1x28x28x80xbf16, #tpu.memory_space<vmem>>, vector<1x1x28x80xbf16>
      %102 = vector.shape_cast %101 : vector<1x1x28x80xbf16> to vector<28x80xbf16>
      %c0_91 = arith.constant 0 : index
      %c0_92 = arith.constant 0 : index
      %c0_93 = arith.constant 0 : index
      %103 = vector.load %arg2[%c0_91, %c0_92, %c0_93] : memref<5x80x32xbf16, #tpu.memory_space<vmem>>, vector<1x80x32xbf16>
      %104 = vector.shape_cast %103 : vector<1x80x32xbf16> to vector<80x32xbf16>
      %cst_94 = arith.constant dense<0.000000e+00> : vector<28x32xf32>
      %105 = tpu.matmul %102, %104, %cst_94 {dimension_numbers = #tpu.dot_dimension_numbers<[1], [0], [0], [1], [0, 0, 1, 1], [], []>} : vector<28x80xbf16>, vector<80x32xbf16>, vector<28x32xf32> -> vector<28x32xf32>
      %c2_i32_95 = arith.constant 2 : i32
      %106 = arith.addi %1, %c2_i32_95 : i32
      %c1_i32_96 = arith.constant 1 : i32
      %107 = arith.addi %106, %c1_i32_96 : i32
      %c0_97 = arith.constant 0 : index
      %108 = arith.index_cast %107 : i32 to index
      %c0_98 = arith.constant 0 : index
      %c0_99 = arith.constant 0 : index
      %109 = vector.load %arg1[%c0_97, %108, %c0_98, %c0_99] : memref<1x28x28x80xbf16, #tpu.memory_space<vmem>>, vector<1x1x28x80xbf16>
      %110 = vector.shape_cast %109 : vector<1x1x28x80xbf16> to vector<28x80xbf16>
      %c1_100 = arith.constant 1 : index
      %c0_101 = arith.constant 0 : index
      %c0_102 = arith.constant 0 : index
      %111 = vector.load %arg2[%c1_100, %c0_101, %c0_102] : memref<5x80x32xbf16, #tpu.memory_space<vmem>>, vector<1x80x32xbf16>
      %112 = vector.shape_cast %111 : vector<1x80x32xbf16> to vector<80x32xbf16>
      %cst_103 = arith.constant dense<0.000000e+00> : vector<28x32xf32>
      %113 = tpu.matmul %110, %112, %cst_103 {dimension_numbers = #tpu.dot_dimension_numbers<[1], [0], [0], [1], [0, 0, 1, 1], [], []>} : vector<28x80xbf16>, vector<80x32xbf16>, vector<28x32xf32> -> vector<28x32xf32>
      %114 = arith.addf %105, %113 : vector<28x32xf32>
      %c2_i32_104 = arith.constant 2 : i32
      %115 = arith.addi %1, %c2_i32_104 : i32
      %c2_i32_105 = arith.constant 2 : i32
      %116 = arith.addi %115, %c2_i32_105 : i32
      %c0_106 = arith.constant 0 : index
      %117 = arith.index_cast %116 : i32 to index
      %c0_107 = arith.constant 0 : index
      %c0_108 = arith.constant 0 : index
      %118 = vector.load %arg1[%c0_106, %117, %c0_107, %c0_108] : memref<1x28x28x80xbf16, #tpu.memory_space<vmem>>, vector<1x1x28x80xbf16>
      %119 = vector.shape_cast %118 : vector<1x1x28x80xbf16> to vector<28x80xbf16>
      %c2_109 = arith.constant 2 : index
      %c0_110 = arith.constant 0 : index
      %c0_111 = arith.constant 0 : index
      %120 = vector.load %arg2[%c2_109, %c0_110, %c0_111] : memref<5x80x32xbf16, #tpu.memory_space<vmem>>, vector<1x80x32xbf16>
      %121 = vector.shape_cast %120 : vector<1x80x32xbf16> to vector<80x32xbf16>
      %cst_112 = arith.constant dense<0.000000e+00> : vector<28x32xf32>
      %122 = tpu.matmul %119, %121, %cst_112 {dimension_numbers = #tpu.dot_dimension_numbers<[1], [0], [0], [1], [0, 0, 1, 1], [], []>} : vector<28x80xbf16>, vector<80x32xbf16>, vector<28x32xf32> -> vector<28x32xf32>
      %123 = arith.addf %114, %122 : vector<28x32xf32>
      %c2_i32_113 = arith.constant 2 : i32
      %124 = arith.addi %1, %c2_i32_113 : i32
      %c3_i32_114 = arith.constant 3 : i32
      %125 = arith.addi %124, %c3_i32_114 : i32
      %c0_115 = arith.constant 0 : index
      %126 = arith.index_cast %125 : i32 to index
      %c0_116 = arith.constant 0 : index
      %c0_117 = arith.constant 0 : index
      %127 = vector.load %arg1[%c0_115, %126, %c0_116, %c0_117] : memref<1x28x28x80xbf16, #tpu.memory_space<vmem>>, vector<1x1x28x80xbf16>
      %128 = vector.shape_cast %127 : vector<1x1x28x80xbf16> to vector<28x80xbf16>
      %c3_118 = arith.constant 3 : index
      %c0_119 = arith.constant 0 : index
      %c0_120 = arith.constant 0 : index
      %129 = vector.load %arg2[%c3_118, %c0_119, %c0_120] : memref<5x80x32xbf16, #tpu.memory_space<vmem>>, vector<1x80x32xbf16>
      %130 = vector.shape_cast %129 : vector<1x80x32xbf16> to vector<80x32xbf16>
      %cst_121 = arith.constant dense<0.000000e+00> : vector<28x32xf32>
      %131 = tpu.matmul %128, %130, %cst_121 {dimension_numbers = #tpu.dot_dimension_numbers<[1], [0], [0], [1], [0, 0, 1, 1], [], []>} : vector<28x80xbf16>, vector<80x32xbf16>, vector<28x32xf32> -> vector<28x32xf32>
      %132 = arith.addf %123, %131 : vector<28x32xf32>
      %c2_i32_122 = arith.constant 2 : i32
      %133 = arith.addi %1, %c2_i32_122 : i32
      %c4_i32_123 = arith.constant 4 : i32
      %134 = arith.addi %133, %c4_i32_123 : i32
      %c0_124 = arith.constant 0 : index
      %135 = arith.index_cast %134 : i32 to index
      %c0_125 = arith.constant 0 : index
      %c0_126 = arith.constant 0 : index
      %136 = vector.load %arg1[%c0_124, %135, %c0_125, %c0_126] : memref<1x28x28x80xbf16, #tpu.memory_space<vmem>>, vector<1x1x28x80xbf16>
      %137 = vector.shape_cast %136 : vector<1x1x28x80xbf16> to vector<28x80xbf16>
      %c4_127 = arith.constant 4 : index
      %c0_128 = arith.constant 0 : index
      %c0_129 = arith.constant 0 : index
      %138 = vector.load %arg2[%c4_127, %c0_128, %c0_129] : memref<5x80x32xbf16, #tpu.memory_space<vmem>>, vector<1x80x32xbf16>
      %139 = vector.shape_cast %138 : vector<1x80x32xbf16> to vector<80x32xbf16>
      %cst_130 = arith.constant dense<0.000000e+00> : vector<28x32xf32>
      %140 = tpu.matmul %137, %139, %cst_130 {dimension_numbers = #tpu.dot_dimension_numbers<[1], [0], [0], [1], [0, 0, 1, 1], [], []>} : vector<28x80xbf16>, vector<80x32xbf16>, vector<28x32xf32> -> vector<28x32xf32>
      %141 = arith.addf %132, %140 : vector<28x32xf32>
      %c0_131 = arith.constant 0 : index
      %c0_132 = arith.constant 0 : index
      %142 = vector.load %arg3[%c0_131, %c0_132] : memref<1x32xf32, #tpu.memory_space<vmem>>, vector<1x32xf32>
      %143 = vector.broadcast %142 : vector<1x32xf32> to vector<28x32xf32>
      %144 = arith.addf %141, %143 : vector<28x32xf32>
      %cst_133 = arith.constant 0.000000e+00 : f32
      %145 = vector.broadcast %cst_133 : f32 to vector<28x32xf32>
      %146 = arith.maximumf %144, %145 : vector<28x32xf32>
      %147 = arith.maximumf %98, %146 : vector<28x32xf32>
      %c3_i32_134 = arith.constant 3 : i32
      %148 = arith.addi %1, %c3_i32_134 : i32
      %c0_135 = arith.constant 0 : index
      %149 = arith.index_cast %148 : i32 to index
      %c0_136 = arith.constant 0 : index
      %c0_137 = arith.constant 0 : index
      %150 = vector.load %arg1[%c0_135, %149, %c0_136, %c0_137] : memref<1x28x28x80xbf16, #tpu.memory_space<vmem>>, vector<1x1x28x80xbf16>
      %151 = vector.shape_cast %150 : vector<1x1x28x80xbf16> to vector<28x80xbf16>
      %c0_138 = arith.constant 0 : index
      %c0_139 = arith.constant 0 : index
      %c0_140 = arith.constant 0 : index
      %152 = vector.load %arg2[%c0_138, %c0_139, %c0_140] : memref<5x80x32xbf16, #tpu.memory_space<vmem>>, vector<1x80x32xbf16>
      %153 = vector.shape_cast %152 : vector<1x80x32xbf16> to vector<80x32xbf16>
      %cst_141 = arith.constant dense<0.000000e+00> : vector<28x32xf32>
      %154 = tpu.matmul %151, %153, %cst_141 {dimension_numbers = #tpu.dot_dimension_numbers<[1], [0], [0], [1], [0, 0, 1, 1], [], []>} : vector<28x80xbf16>, vector<80x32xbf16>, vector<28x32xf32> -> vector<28x32xf32>
      %c3_i32_142 = arith.constant 3 : i32
      %155 = arith.addi %1, %c3_i32_142 : i32
      %c1_i32_143 = arith.constant 1 : i32
      %156 = arith.addi %155, %c1_i32_143 : i32
      %c0_144 = arith.constant 0 : index
      %157 = arith.index_cast %156 : i32 to index
      %c0_145 = arith.constant 0 : index
      %c0_146 = arith.constant 0 : index
      %158 = vector.load %arg1[%c0_144, %157, %c0_145, %c0_146] : memref<1x28x28x80xbf16, #tpu.memory_space<vmem>>, vector<1x1x28x80xbf16>
      %159 = vector.shape_cast %158 : vector<1x1x28x80xbf16> to vector<28x80xbf16>
      %c1_147 = arith.constant 1 : index
      %c0_148 = arith.constant 0 : index
      %c0_149 = arith.constant 0 : index
      %160 = vector.load %arg2[%c1_147, %c0_148, %c0_149] : memref<5x80x32xbf16, #tpu.memory_space<vmem>>, vector<1x80x32xbf16>
      %161 = vector.shape_cast %160 : vector<1x80x32xbf16> to vector<80x32xbf16>
      %cst_150 = arith.constant dense<0.000000e+00> : vector<28x32xf32>
      %162 = tpu.matmul %159, %161, %cst_150 {dimension_numbers = #tpu.dot_dimension_numbers<[1], [0], [0], [1], [0, 0, 1, 1], [], []>} : vector<28x80xbf16>, vector<80x32xbf16>, vector<28x32xf32> -> vector<28x32xf32>
      %163 = arith.addf %154, %162 : vector<28x32xf32>
      %c3_i32_151 = arith.constant 3 : i32
      %164 = arith.addi %1, %c3_i32_151 : i32
      %c2_i32_152 = arith.constant 2 : i32
      %165 = arith.addi %164, %c2_i32_152 : i32
      %c0_153 = arith.constant 0 : index
      %166 = arith.index_cast %165 : i32 to index
      %c0_154 = arith.constant 0 : index
      %c0_155 = arith.constant 0 : index
      %167 = vector.load %arg1[%c0_153, %166, %c0_154, %c0_155] : memref<1x28x28x80xbf16, #tpu.memory_space<vmem>>, vector<1x1x28x80xbf16>
      %168 = vector.shape_cast %167 : vector<1x1x28x80xbf16> to vector<28x80xbf16>
      %c2_156 = arith.constant 2 : index
      %c0_157 = arith.constant 0 : index
      %c0_158 = arith.constant 0 : index
      %169 = vector.load %arg2[%c2_156, %c0_157, %c0_158] : memref<5x80x32xbf16, #tpu.memory_space<vmem>>, vector<1x80x32xbf16>
      %170 = vector.shape_cast %169 : vector<1x80x32xbf16> to vector<80x32xbf16>
      %cst_159 = arith.constant dense<0.000000e+00> : vector<28x32xf32>
      %171 = tpu.matmul %168, %170, %cst_159 {dimension_numbers = #tpu.dot_dimension_numbers<[1], [0], [0], [1], [0, 0, 1, 1], [], []>} : vector<28x80xbf16>, vector<80x32xbf16>, vector<28x32xf32> -> vector<28x32xf32>
      %172 = arith.addf %163, %171 : vector<28x32xf32>
      %c3_i32_160 = arith.constant 3 : i32
      %173 = arith.addi %1, %c3_i32_160 : i32
      %c3_i32_161 = arith.constant 3 : i32
      %174 = arith.addi %173, %c3_i32_161 : i32
      %c0_162 = arith.constant 0 : index
      %175 = arith.index_cast %174 : i32 to index
      %c0_163 = arith.constant 0 : index
      %c0_164 = arith.constant 0 : index
      %176 = vector.load %arg1[%c0_162, %175, %c0_163, %c0_164] : memref<1x28x28x80xbf16, #tpu.memory_space<vmem>>, vector<1x1x28x80xbf16>
      %177 = vector.shape_cast %176 : vector<1x1x28x80xbf16> to vector<28x80xbf16>
      %c3_165 = arith.constant 3 : index
      %c0_166 = arith.constant 0 : index
      %c0_167 = arith.constant 0 : index
      %178 = vector.load %arg2[%c3_165, %c0_166, %c0_167] : memref<5x80x32xbf16, #tpu.memory_space<vmem>>, vector<1x80x32xbf16>
      %179 = vector.shape_cast %178 : vector<1x80x32xbf16> to vector<80x32xbf16>
      %cst_168 = arith.constant dense<0.000000e+00> : vector<28x32xf32>
      %180 = tpu.matmul %177, %179, %cst_168 {dimension_numbers = #tpu.dot_dimension_numbers<[1], [0], [0], [1], [0, 0, 1, 1], [], []>} : vector<28x80xbf16>, vector<80x32xbf16>, vector<28x32xf32> -> vector<28x32xf32>
      %181 = arith.addf %172, %180 : vector<28x32xf32>
      %c3_i32_169 = arith.constant 3 : i32
      %182 = arith.addi %1, %c3_i32_169 : i32
      %c4_i32_170 = arith.constant 4 : i32
      %183 = arith.addi %182, %c4_i32_170 : i32
      %c0_171 = arith.constant 0 : index
      %184 = arith.index_cast %183 : i32 to index
      %c0_172 = arith.constant 0 : index
      %c0_173 = arith.constant 0 : index
      %185 = vector.load %arg1[%c0_171, %184, %c0_172, %c0_173] : memref<1x28x28x80xbf16, #tpu.memory_space<vmem>>, vector<1x1x28x80xbf16>
      %186 = vector.shape_cast %185 : vector<1x1x28x80xbf16> to vector<28x80xbf16>
      %c4_174 = arith.constant 4 : index
      %c0_175 = arith.constant 0 : index
      %c0_176 = arith.constant 0 : index
      %187 = vector.load %arg2[%c4_174, %c0_175, %c0_176] : memref<5x80x32xbf16, #tpu.memory_space<vmem>>, vector<1x80x32xbf16>
      %188 = vector.shape_cast %187 : vector<1x80x32xbf16> to vector<80x32xbf16>
      %cst_177 = arith.constant dense<0.000000e+00> : vector<28x32xf32>
      %189 = tpu.matmul %186, %188, %cst_177 {dimension_numbers = #tpu.dot_dimension_numbers<[1], [0], [0], [1], [0, 0, 1, 1], [], []>} : vector<28x80xbf16>, vector<80x32xbf16>, vector<28x32xf32> -> vector<28x32xf32>
      %190 = arith.addf %181, %189 : vector<28x32xf32>
      %c0_178 = arith.constant 0 : index
      %c0_179 = arith.constant 0 : index
      %191 = vector.load %arg3[%c0_178, %c0_179] : memref<1x32xf32, #tpu.memory_space<vmem>>, vector<1x32xf32>
      %192 = vector.broadcast %191 : vector<1x32xf32> to vector<28x32xf32>
      %193 = arith.addf %190, %192 : vector<28x32xf32>
      %cst_180 = arith.constant 0.000000e+00 : f32
      %194 = vector.broadcast %cst_180 : f32 to vector<28x32xf32>
      %195 = arith.maximumf %193, %194 : vector<28x32xf32>
      %196 = arith.maximumf %147, %195 : vector<28x32xf32>
      %c0_181 = arith.constant 0 : index
      %c0_182 = arith.constant 0 : index
      %197 = vector.load %arg5[%c0_181, %c0_182] : memref<28x32xf32, #tpu.memory_space<vmem>>, vector<28x32xf32>
      tpu.vector_store %arg5[%c0_181, %c0_182], %196 {strides = array<i32>} : memref<28x32xf32, #tpu.memory_space<vmem>>, vector<28x32xf32>,
      %c0_183 = arith.constant 0 : index
      %c0_184 = arith.constant 0 : index
      %198 = tpu.strided_load %arg5[%c0_183, %c0_184] {strides = array<i32: 4, 1>} : memref<28x32xf32, #tpu.memory_space<vmem>>, vector<7x32xf32>
      %c1_185 = arith.constant 1 : index
      %c0_186 = arith.constant 0 : index
      %199 = tpu.strided_load %arg5[%c1_185, %c0_186] {strides = array<i32: 4, 1>} : memref<28x32xf32, #tpu.memory_space<vmem>>, vector<7x32xf32>
      %200 = arith.maximumf %198, %199 : vector<7x32xf32>
      %c2_187 = arith.constant 2 : index
      %c0_188 = arith.constant 0 : index
      %201 = tpu.strided_load %arg5[%c2_187, %c0_188] {strides = array<i32: 4, 1>} : memref<28x32xf32, #tpu.memory_space<vmem>>, vector<7x32xf32>
      %202 = arith.maximumf %200, %201 : vector<7x32xf32>
      %c3_189 = arith.constant 3 : index
      %c0_190 = arith.constant 0 : index
      %203 = tpu.strided_load %arg5[%c3_189, %c0_190] {strides = array<i32: 4, 1>} : memref<28x32xf32, #tpu.memory_space<vmem>>, vector<7x32xf32>
      %204 = arith.maximumf %202, %203 : vector<7x32xf32>
      %205 = vector.shape_cast %204 : vector<7x32xf32> to vector<1x7x32xf32>
      %c0_191 = arith.constant 0 : index
      %206 = arith.index_cast %arg6 : i32 to index
      %c0_192 = arith.constant 0 : index
      %c0_193 = arith.constant 0 : index
      %207 = vector.load %arg4[%c0_191, %206, %c0_192, %c0_193] : memref<1x6x7x32xf32, #tpu.memory_space<vmem>>, vector<1x1x7x32xf32>
      %208 = vector.shape_cast %207 : vector<1x1x7x32xf32> to vector<1x7x32xf32>
      %209 = vector.shape_cast %205 : vector<1x7x32xf32> to vector<1x1x7x32xf32>
      tpu.vector_store %arg4[%c0_191, %206, %c0_192, %c0_193], %209 {strides = array<i32>} : memref<1x6x7x32xf32, #tpu.memory_space<vmem>>, vector<1x1x7x32xf32>,
    }
    %c6_i32_0 = arith.constant 6 : i32
    return
  }
  func.func @transform_0(%arg0: i32) -> (i32, i32, i32, i32) {
    %c0_i32 = arith.constant 0 : i32
    %c0_i32_0 = arith.constant 0 : i32
    %c0_i32_1 = arith.constant 0 : i32
    %c0_i32_2 = arith.constant 0 : i32
    return %arg0, %c0_i32, %c0_i32_0, %c0_i32_1 : i32, i32, i32, i32
  }
  func.func @transform_1(%arg0: i32) -> (i32, i32, i32) {
    %c0_i32 = arith.constant 0 : i32
    %c0_i32_0 = arith.constant 0 : i32
    %c0_i32_1 = arith.constant 0 : i32
    %c0_i32_2 = arith.constant 0 : i32
    return %c0_i32, %c0_i32_0, %c0_i32_1 : i32, i32, i32
  }
  func.func @transform_2(%arg0: i32) -> (i32, i32) {
    %c0_i32 = arith.constant 0 : i32
    %c0_i32_0 = arith.constant 0 : i32
    %c0_i32_1 = arith.constant 0 : i32
    return %c0_i32, %c0_i32_0 : i32, i32
  }
  func.func @transform_3(%arg0: i32) -> (i32, i32, i32, i32) {
    %c0_i32 = arith.constant 0 : i32
    %c0_i32_0 = arith.constant 0 : i32
    %c0_i32_1 = arith.constant 0 : i32
    %c0_i32_2 = arith.constant 0 : i32
    return %arg0, %c0_i32, %c0_i32_0, %c0_i32_1 : i32, i32, i32, i32
  }
}

module attributes {stable_mosaic.version = 11 : i64} {
  func.func @kernel(%arg0: i32, %arg1: memref<2x1344xbf16, #tpu.memory_space<vmem>>, %arg2: memref<1344x40xbf16, #tpu.memory_space<vmem>>, %arg3: memref<1x40xf32, #tpu.memory_space<vmem>>, %arg4: memref<2x40xf32, #tpu.memory_space<vmem>>) attributes {dimension_semantics = [#tpu.dimension_semantics<arbitrary>], iteration_bounds = array<i64: 1>, scalar_prefetch = 0 : i64, scratch_operands = 0 : i64, tpu.core_type = #tpu.core_type<tc>, window_params = [{pipeline_mode = #tpu.pipeline_mode<synchronous>, transform_indices = @transform_0, window_bounds = array<i64: 2, 1344>}, {pipeline_mode = #tpu.pipeline_mode<synchronous>, transform_indices = @transform_1, window_bounds = array<i64: 1344, 40>}, {pipeline_mode = #tpu.pipeline_mode<synchronous>, transform_indices = @transform_2, window_bounds = array<i64: 1, 40>}, {pipeline_mode = #tpu.pipeline_mode<synchronous>, transform_indices = @transform_3, window_bounds = array<i64: 2, 40>}]} {
    %c0 = arith.constant 0 : index
    %c0_0 = arith.constant 0 : index
    %0 = vector.load %arg1[%c0, %c0_0] : memref<2x1344xbf16, #tpu.memory_space<vmem>>, vector<2x1344xbf16>
    %c0_1 = arith.constant 0 : index
    %c0_2 = arith.constant 0 : index
    %1 = vector.load %arg2[%c0_1, %c0_2] : memref<1344x40xbf16, #tpu.memory_space<vmem>>, vector<1344x40xbf16>
    %cst = arith.constant dense<0.000000e+00> : vector<2x40xf32>
    %2 = tpu.matmul %0, %1, %cst {dimension_numbers = #tpu.dot_dimension_numbers<[1], [0], [0], [1], [0, 0, 1, 1], [], []>} : vector<2x1344xbf16>, vector<1344x40xbf16>, vector<2x40xf32> -> vector<2x40xf32>
    %c0_3 = arith.constant 0 : index
    %c0_4 = arith.constant 0 : index
    %3 = vector.load %arg3[%c0_3, %c0_4] : memref<1x40xf32, #tpu.memory_space<vmem>>, vector<1x40xf32>
    %4 = vector.broadcast %3 : vector<1x40xf32> to vector<2x40xf32>
    %5 = arith.addf %2, %4 : vector<2x40xf32>
    %c0_5 = arith.constant 0 : index
    %c0_6 = arith.constant 0 : index
    %6 = vector.load %arg4[%c0_5, %c0_6] : memref<2x40xf32, #tpu.memory_space<vmem>>, vector<2x40xf32>
    tpu.vector_store %arg4[%c0_5, %c0_6], %5 {strides = array<i32>} : memref<2x40xf32, #tpu.memory_space<vmem>>, vector<2x40xf32>,
    return
  }
  func.func @transform_0(%arg0: i32) -> (i32, i32) {
    %c0_i32 = arith.constant 0 : i32
    %c0_i32_0 = arith.constant 0 : i32
    %c0_i32_1 = arith.constant 0 : i32
    return %c0_i32, %c0_i32_0 : i32, i32
  }
  func.func @transform_1(%arg0: i32) -> (i32, i32) {
    %c0_i32 = arith.constant 0 : i32
    %c0_i32_0 = arith.constant 0 : i32
    %c0_i32_1 = arith.constant 0 : i32
    return %c0_i32, %c0_i32_0 : i32, i32
  }
  func.func @transform_2(%arg0: i32) -> (i32, i32) {
    %c0_i32 = arith.constant 0 : i32
    %c0_i32_0 = arith.constant 0 : i32
    %c0_i32_1 = arith.constant 0 : i32
    return %c0_i32, %c0_i32_0 : i32, i32
  }
  func.func @transform_3(%arg0: i32) -> (i32, i32) {
    %c0_i32 = arith.constant 0 : i32
    %c0_i32_0 = arith.constant 0 : i32
    %c0_i32_1 = arith.constant 0 : i32
    return %c0_i32, %c0_i32_0 : i32, i32
  }
}

</mosaic_0001>

<bundles_post_ra>
// kernel: cnn_net_forward.4
= control target key start
LH: loop header
LB: loop body
LE: loop exit
PB: predicated region body
PF: predicated region fallthrough
CT: control target
= control target key end

     0   :  { %s2467_s12 = smov 0   ;;  %s3043_s0 = inlined_call_operand.vmem [shape: bf16[2,28,28,80], index: 0, kind: input, shape index: {}]   ;;  %s3044_s1 = inlined_call_operand.vmem [shape: bf16[5,80,32], index: 1, kind: input, shape index: {}]   ;;  %s3045_s2 = inlined_call_operand.vmem [shape: f32[1,32], index: 2, kind: input, shape index: {}]   ;;  %s3046_s3 = inlined_call_operand.vmem [shape: f32[2,6,7,32], index: 3, kind: output, shape index: {}]  }
   0x1 LB: > { %s1766_s13 = sadd.s32 4294967295, %s2441_s12   ;;  %p1770_p0 = scmp.ge.s32.totalorder %s2441_s12, 1  ;;  %s2441_s12 = sphi %s2467_s12, %s13_s12  }
   0x2   : > { %p137_p1 = scmp.lt.s32.totalorder %s2441_s12, 3 }
   0x4   : > { %p138_p2 = pnand %p1770_p0, %p137_p1 }
   0x5   : > { %p161_p3 = scmp.lt.s32.totalorder (!%p138_p2), %s1766_s13, 1  ;;  %s2485_s22 = smov (!%p138_p2), 0  }
   0x6   : > { %141 = sbr.rel (%p138_p2) target bundleno = 441 (0x1b9), region = 32 }
   0xb   : > { %s3066_s13 = smov (!%p161_p3, %s1766_s13), 1 }
   0xc   : > { %s2372_s14 = smul.u32 448, %s3066_s13 }
   0xd   : > { %s2373_s15 = smul.u32 48, %s3066_s13 }
   0xe   : > { %s2478_s18 = scalar_lea.vmem %s3043_s0, %s2372_s14 }
   0xf   : > { %s2483_s21 = scalar_lea.vmem %s3046_s3, %s2373_s15 }
  0x10 LB: >> { %v2493_v0 = vld [vmem:[%s3044_s1 + $0x48] sm:$0xff]   ;;  %v2498_v1 = vld [vmem:[%s3044_s1 + $0x20] sm:$0xff]   ;;  %v2511_v3 = vld [vmem:[%s3044_s1 + $0x18] sm:$0xff]   ;;  %s1944_s6 = sshll.u32 %s2445_s22, 6  ;;  %vm255_vm0 = vcmask 654336   ;;  %vm1654_vm1 = vcmask 261120   ;;  %s2445_s22 = sphi %s2485_s22, %s177_s22  }
  0x11   : >> { %2092 = vmatprep.subr.bf16.mxu0 %v2493_v0  ;;  %v2504_v2 = vld [vmem:[%s3044_s1 + $0x40] sm:$0xff]   ;;  %2106 = vmatprep.subr.bf16.mxu1 %v2498_v1  ;;  %v2518_v4 = vld [vmem:[%s3044_s1 + $0x38] sm:$0xff]   ;;  %v2525_v5 = vld [vmem:[%s3044_s1 + $0x10] sm:$0xff]   ;;  %s2529_s9 = scalar_lea.vmem %s2478_s18, %s1944_s6  ;;  %vm1658_vm2 = vcmask 257024   ;;  %s1940_s4 = sshll.u32 %s2445_s22, 3  ;;  %vm1672_vm3 = vcmask 260096  }
  0x12   : >> { %2093 = vmatpush3.bf16.msra.mxu0 %v2493_v0  ;;  %2107 = vmatpush3.bf16.msra.mxu1 %v2498_v1  ;;  %v2536_v6 = vld [vmem:[%s3044_s1 + $0x30] sm:$0xff]   ;;  %v2542_v7 = vld [vmem:[%s3044_s1 + $0x8] sm:$0xff]   ;;  %v2401_v9 = vld [vmem:[%s2529_s9] sm:$0xff]   ;;  %s1671_s5 = scalar_lea.vmem %s2483_s21, %s1940_s4  ;;  %s177_s22 = sadd.s32 1, %s2445_s22  }
  0x13   : >> { %2094 = vmatprep.subr.bf16.mxu0 %v2504_v2  ;;  %2108 = vmatprep.subr.bf16.mxu1 %v2511_v3  ;;  %v2545_v8 = vld [vmem:[%s2529_s9 + $0x10] sm:$0xff]   ;;  %v2554_v10 = vld [vmem:[%s3044_s1 + $0x28] sm:$0xff]   ;;  %v2560_v11 = vld [vmem:[%s3044_s1] sm:$0xff]   ;;  %p174_p4 = scmp.ge.s32.totalorder %s177_s22, 6  }
  0x14   : >> { %2102 = vmatprep.mubr.msk.bf16.mxu0 %vm255_vm0, %v2545_v8  ;;  %2116 = vmatprep.mubr.msk.bf16.mxu1 %vm255_vm0, %v2401_v9  ;;  %v2571_v12 = vld [vmem:[%s3044_s1 + $0x70] sm:$0xff]   ;;  %v2577_v13 = vld [vmem:[%s3044_s1 + $0x98] sm:$0xff]   ;;  %v2403_v15 = vld [vmem:[%s2529_s9 + $0x8] sm:$0x3f]  }
  0x15   : >> { %v2580_v14 = vld [vmem:[%s2529_s9 + $0x18] sm:$0x3f]   ;;  %v2589_v16 = vld [vmem:[%s3044_s1 + $0x68] sm:$0xff]   ;;  %v2595_v17 = vld [vmem:[%s3044_s1 + $0x90] sm:$0xff]  }
  0x16   : >> { %2095 = vmatpush3.bf16.msra.mxu0 %v2504_v2  ;;  %2109 = vmatpush3.bf16.msra.mxu1 %v2511_v3  ;;  %v2602_v18 = vld [vmem:[%s3044_s1 + $0x60] sm:$0xff]   ;;  %v2609_v19 = vld [vmem:[%s3044_s1 + $0x88] sm:$0xff]   ;;  %v2618_v21 = vld [vmem:[%s2529_s9 + $0x30] sm:$0xff]  }
  0x17   : >> { %2096 = vmatprep.subr.bf16.mxu0 %v2518_v4  ;;  %2110 = vmatprep.subr.bf16.mxu1 %v2525_v5  ;;  %v2614_v20 = vld [vmem:[%s2529_s9 + $0x20] sm:$0xff]   ;;  %v2630_v22 = vld [vmem:[%s3044_s1 + $0x58] sm:$0xff]   ;;  %v2644_v24 = vld [vmem:[%s3044_s1 + $0x50] sm:$0xff]  }
  0x18   : >> { %v2636_v23 = vld [vmem:[%s3044_s1 + $0x80] sm:$0xff]   ;;  %v2650_v25 = vld [vmem:[%s3044_s1 + $0x78] sm:$0xff]   ;;  %v2662_v27 = vld [vmem:[%s2529_s9 + $0x28] sm:$0x3f]  }
  0x19   : >> { %v2658_v26 = vld [vmem:[%s3044_s1 + $0xc0] sm:$0xff]   ;;  %v2665_v28 = vld [vmem:[%s2529_s9 + $0x38] sm:$0x3f]   ;;  %v2689_v31 = vld [vmem:[%s3044_s1 + $0xb0] sm:$0xff]  }
  0x1a   : >> { %2097 = vmatpush3.bf16.msra.mxu0 %v2518_v4  ;;  %2111 = vmatpush3.bf16.msra.mxu1 %v2525_v5  ;;  %v2673_v29 = vld [vmem:[%s3044_s1 + $0xb8] sm:$0xff]   ;;  %v2677_v30 = vld [vmem:[%s2529_s9 + $0x40] sm:$0xff]   ;;  %v2702_v32 = vld [vmem:[%s3044_s1 + $0xa8] sm:$0xff]  }
  0x1b   : >> { %2098 = vmatprep.subr.bf16.mxu0 %v2536_v6  ;;  %2112 = vmatprep.subr.bf16.mxu1 %v2542_v7  ;;  %v2711_v33 = vld [vmem:[%s3044_s1 + $0xa0] sm:$0xff]   ;;  %v2719_v34 = vld [vmem:[%s2529_s9 + $0x48] sm:$0x3f]   ;;  %v2756_v35 = vld [vmem:[%s2529_s9 + $0x50] sm:$0xff]  }
  0x1c   : >> { %v2782_v36 = vld [vmem:[%s2529_s9 + $0x58] sm:$0x3f]   ;;  %v2427_v37 = vld [vmem:[%s2529_s9 + $0x60] sm:$0xff]   ;;  %v2428_v38 = vld [vmem:[%s2529_s9 + $0x68] sm:$0x3f]  }
  0x1d   : >> { %v2429_v39 = vld [vmem:[%s2529_s9 + $0x70] sm:$0xff]   ;;  %v2430_v40 = vld [vmem:[%s2529_s9 + $0x78] sm:$0x3f]  }
  0x1e   : >> { %2099 = vmatpush3.bf16.msra.mxu0 %v2536_v6  ;;  %2113 = vmatpush3.bf16.msra.mxu1 %v2542_v7 }
  0x1f   : >> { %2100 = vmatprep.subr.bf16.mxu0 %v2554_v10  ;;  %2114 = vmatprep.subr.bf16.mxu1 %v2560_v11 }
  0x22   : >> { %2101 = vmatpush3.bf16.msra.mxu0 %v2554_v10  ;;  %2115 = vmatpush3.bf16.msra.mxu1 %v2560_v11 }
  0x23   : >> { %2120 = vmatprep.subr.bf16.mxu0 %v2571_v12  ;;  %2134 = vmatprep.subr.bf16.mxu1 %v2577_v13 }
  0x25   : >> { %2103 = vmatmul.mubr.msk.bf16.vlgmr.msra.gmra.mxu0 %vm255_vm0, %v2580_v14  ;;  %2117 = vmatmul.mubr.msk.bf16.vlgmr.msra.gmra.mxu1 %vm255_vm0, %v2403_v15 }
  0x26   : >> { %2121 = vmatpush3.bf16.msra.mxu0 %v2571_v12  ;;  %2135 = vmatpush3.bf16.msra.mxu1 %v2577_v13 }
  0x27   : >> { %2122 = vmatprep.subr.bf16.mxu0 %v2589_v16  ;;  %2136 = vmatprep.subr.bf16.mxu1 %v2595_v17 }
  0x28   : >> { %2130 = vmatprep.mubr.msk.bf16.mxu0 %vm255_vm0, %v2614_v20  ;;  %2144 = vmatprep.mubr.msk.bf16.mxu1 %vm255_vm0, %v2618_v21 }
  0x2a   : >> { %2123 = vmatpush3.bf16.msra.mxu0 %v2589_v16  ;;  %2137 = vmatpush3.bf16.msra.mxu1 %v2595_v17 }
  0x2b   : >> { %2124 = vmatprep.subr.bf16.mxu0 %v2602_v18  ;;  %2138 = vmatprep.subr.bf16.mxu1 %v2609_v19 }
  0x2e   : >> { %2125 = vmatpush3.bf16.msra.mxu0 %v2602_v18  ;;  %2139 = vmatpush3.bf16.msra.mxu1 %v2609_v19 }
  0x2f   : >> { %2126 = vmatprep.subr.bf16.mxu0 %v2630_v22  ;;  %2140 = vmatprep.subr.bf16.mxu1 %v2636_v23 }
  0x32   : >> { %2127 = vmatpush3.bf16.msra.mxu0 %v2630_v22  ;;  %2141 = vmatpush3.bf16.msra.mxu1 %v2636_v23 }
  0x33   : >> { %2128 = vmatprep.subr.bf16.mxu0 %v2644_v24  ;;  %2142 = vmatprep.subr.bf16.mxu1 %v2650_v25 }
  0x36   : >> { %2129 = vmatpush3.bf16.msra.mxu0 %v2644_v24  ;;  %2143 = vmatpush3.bf16.msra.mxu1 %v2650_v25 }
  0x37   : >> { %2148 = vmatprep.subr.bf16.mxu0 %v2658_v26  ;;  %2162 = vmatprep.subr.bf16.mxu1 %v2493_v0 }
  0x39   : >> { %2131 = vmatmul.mubr.msk.bf16.vlgmr.msra.gmra.mxu0 %vm255_vm0, %v2662_v27  ;;  %2145 = vmatmul.mubr.msk.bf16.vlgmr.msra.gmra.mxu1 %vm255_vm0, %v2665_v28 }
  0x3a   : >> { %2149 = vmatpush3.bf16.msra.mxu0 %v2658_v26  ;;  %2163 = vmatpush3.bf16.msra.mxu1 %v2493_v0 }
  0x3b   : >> { %2150 = vmatprep.subr.bf16.mxu0 %v2673_v29  ;;  %2164 = vmatprep.subr.bf16.mxu1 %v2504_v2 }
  0x3c   : >> { %2158 = vmatprep.mubr.msk.bf16.mxu0 %vm255_vm0, %v2677_v30  ;;  %2172 = vmatprep.mubr.msk.bf16.mxu1 %vm255_vm0, %v2614_v20 }
  0x3e   : >> { %2151 = vmatpush3.bf16.msra.mxu0 %v2673_v29  ;;  %2165 = vmatpush3.bf16.msra.mxu1 %v2504_v2 }
  0x3f   : >> { %2152 = vmatprep.subr.bf16.mxu0 %v2689_v31  ;;  %2166 = vmatprep.subr.bf16.mxu1 %v2518_v4 }
  0x42   : >> { %2153 = vmatpush3.bf16.msra.mxu0 %v2689_v31  ;;  %2167 = vmatpush3.bf16.msra.mxu1 %v2518_v4 }
  0x43   : >> { %2154 = vmatprep.subr.bf16.mxu0 %v2702_v32  ;;  %2168 = vmatprep.subr.bf16.mxu1 %v2536_v6 }
  0x46   : >> { %2155 = vmatpush3.bf16.msra.mxu0 %v2702_v32  ;;  %2169 = vmatpush3.bf16.msra.mxu1 %v2536_v6 }
  0x47   : >> { %2156 = vmatprep.subr.bf16.mxu0 %v2711_v33  ;;  %2170 = vmatprep.subr.bf16.mxu1 %v2554_v10 }
  0x4a   : >> { %2157 = vmatpush3.bf16.msra.mxu0 %v2711_v33  ;;  %2171 = vmatpush3.bf16.msra.mxu1 %v2554_v10 }
  0x4b   : >> { %2176 = vmatprep.subr.bf16.mxu0 %v2498_v1  ;;  %2190 = vmatprep.subr.bf16.mxu1 %v2571_v12 }
  0x4d   : >> { %2159 = vmatmul.mubr.msk.bf16.vlgmr.msra.gmra.mxu0 %vm255_vm0, %v2719_v34  ;;  %2173 = vmatmul.mubr.msk.bf16.vlgmr.msra.gmra.mxu1 %vm255_vm0, %v2662_v27 }
  0x4e   : >> { %2177 = vmatpush3.bf16.msra.mxu0 %v2498_v1  ;;  %2191 = vmatpush3.bf16.msra.mxu1 %v2571_v12 }
  0x4f   : >> { %2178 = vmatprep.subr.bf16.mxu0 %v2511_v3  ;;  %2192 = vmatprep.subr.bf16.mxu1 %v2589_v16 }
  0x50   : >> { %2186 = vmatprep.mubr.msk.bf16.mxu0 %vm255_vm0, %v2545_v8  ;;  %2200 = vmatprep.mubr.msk.bf16.mxu1 %vm255_vm0, %v2618_v21 }
  0x52   : >> { %2179 = vmatpush3.bf16.msra.mxu0 %v2511_v3  ;;  %2193 = vmatpush3.bf16.msra.mxu1 %v2589_v16 }
  0x53   : >> { %2180 = vmatprep.subr.bf16.mxu0 %v2525_v5  ;;  %2194 = vmatprep.subr.bf16.mxu1 %v2602_v18 }
  0x56   : >> { %2181 = vmatpush3.bf16.msra.mxu0 %v2525_v5  ;;  %2195 = vmatpush3.bf16.msra.mxu1 %v2602_v18 }
  0x57   : >> { %2182 = vmatprep.subr.bf16.mxu0 %v2542_v7  ;;  %2196 = vmatprep.subr.bf16.mxu1 %v2630_v22 }
  0x5a   : >> { %2183 = vmatpush3.bf16.msra.mxu0 %v2542_v7  ;;  %2197 = vmatpush3.bf16.msra.mxu1 %v2630_v22 }
  0x5b   : >> { %2184 = vmatprep.subr.bf16.mxu0 %v2560_v11  ;;  %2198 = vmatprep.subr.bf16.mxu1 %v2644_v24 }
  0x5e   : >> { %2185 = vmatpush3.bf16.msra.mxu0 %v2560_v11  ;;  %2199 = vmatpush3.bf16.msra.mxu1 %v2644_v24 }
  0x5f   : >> { %2204 = vmatprep.subr.bf16.mxu0 %v2577_v13  ;;  %2218 = vmatprep.subr.bf16.mxu1 %v2658_v26 }
  0x61   : >> { %2187 = vmatmul.mubr.msk.bf16.vlgmr.msra.gmra.mxu0 %vm255_vm0, %v2580_v14  ;;  %2201 = vmatmul.mubr.msk.bf16.vlgmr.msra.gmra.mxu1 %vm255_vm0, %v2665_v28 }
  0x62   : >> { %2205 = vmatpush3.bf16.msra.mxu0 %v2577_v13  ;;  %2219 = vmatpush3.bf16.msra.mxu1 %v2658_v26 }
  0x63   : >> { %2206 = vmatprep.subr.bf16.mxu0 %v2595_v17  ;;  %2220 = vmatprep.subr.bf16.mxu1 %v2673_v29 }
  0x64   : >> { %2214 = vmatprep.mubr.msk.bf16.mxu0 %vm255_vm0, %v2677_v30  ;;  %2228 = vmatprep.mubr.msk.bf16.mxu1 %vm255_vm0, %v2756_v35 }
  0x66   : >> { %2207 = vmatpush3.bf16.msra.mxu0 %v2595_v17  ;;  %2221 = vmatpush3.bf16.msra.mxu1 %v2673_v29 }
  0x67   : >> { %2208 = vmatprep.subr.bf16.mxu0 %v2609_v19  ;;  %2222 = vmatprep.subr.bf16.mxu1 %v2689_v31 }
  0x6a   : >> { %2209 = vmatpush3.bf16.msra.mxu0 %v2609_v19  ;;  %2223 = vmatpush3.bf16.msra.mxu1 %v2689_v31 }
  0x6b   : >> { %2210 = vmatprep.subr.bf16.mxu0 %v2636_v23  ;;  %2224 = vmatprep.subr.bf16.mxu1 %v2702_v32 }
  0x6e   : >> { %2211 = vmatpush3.bf16.msra.mxu0 %v2636_v23  ;;  %2225 = vmatpush3.bf16.msra.mxu1 %v2702_v32 }
  0x6f   : >> { %2212 = vmatprep.subr.bf16.mxu0 %v2650_v25  ;;  %2226 = vmatprep.subr.bf16.mxu1 %v2711_v33 }
  0x72   : >> { %2213 = vmatpush3.bf16.msra.mxu0 %v2650_v25  ;;  %2227 = vmatpush3.bf16.msra.mxu1 %v2711_v33 }
  0x73   : >> { %2232 = vmatprep.subr.bf16.mxu0 %v2493_v0  ;;  %2246 = vmatprep.subr.bf16.mxu1 %v2498_v1 }
  0x75   : >> { %2215 = vmatmul.mubr.msk.bf16.vlgmr.msra.gmra.mxu0 %vm255_vm0, %v2719_v34  ;;  %2229 = vmatmul.mubr.msk.bf16.vlgmr.msra.gmra.mxu1 %vm255_vm0, %v2782_v36 }
  0x76   : >> { %2233 = vmatpush3.bf16.msra.mxu0 %v2493_v0  ;;  %2247 = vmatpush3.bf16.msra.mxu1 %v2498_v1 }
  0x77   : >> { %2234 = vmatprep.subr.bf16.mxu0 %v2504_v2  ;;  %2248 = vmatprep.subr.bf16.mxu1 %v2511_v3 }
  0x78   : >> { %2242 = vmatprep.mubr.msk.bf16.mxu0 %vm255_vm0, %v2618_v21  ;;  %2256 = vmatprep.mubr.msk.bf16.mxu1 %vm255_vm0, %v2614_v20 }
  0x7a   : >> { %2235 = vmatpush3.bf16.msra.mxu0 %v2504_v2  ;;  %2249 = vmatpush3.bf16.msra.mxu1 %v2511_v3 }
  0x7b   : >> { %2236 = vmatprep.subr.bf16.mxu0 %v2518_v4  ;;  %2250 = vmatprep.subr.bf16.mxu1 %v2525_v5 }
  0x7e   : >> { %2237 = vmatpush3.bf16.msra.mxu0 %v2518_v4  ;;  %2251 = vmatpush3.bf16.msra.mxu1 %v2525_v5 }
  0x7f   : >> { %2238 = vmatprep.subr.bf16.mxu0 %v2536_v6  ;;  %2252 = vmatprep.subr.bf16.mxu1 %v2542_v7 }
  0x82   : >> { %2239 = vmatpush3.bf16.msra.mxu0 %v2536_v6  ;;  %2253 = vmatpush3.bf16.msra.mxu1 %v2542_v7 }
  0x83   : >> { %2240 = vmatprep.subr.bf16.mxu0 %v2554_v10  ;;  %2254 = vmatprep.subr.bf16.mxu1 %v2560_v11 }
  0x86   : >> { %2241 = vmatpush3.bf16.msra.mxu0 %v2554_v10  ;;  %2255 = vmatpush3.bf16.msra.mxu1 %v2560_v11 }
  0x87   : >> { %2260 = vmatprep.subr.bf16.mxu0 %v2571_v12  ;;  %2274 = vmatprep.subr.bf16.mxu1 %v2577_v13 }
  0x89   : >> { %2243 = vmatmul.mubr.msk.bf16.vlgmr.msra.gmra.mxu0 %vm255_vm0, %v2665_v28  ;;  %2257 = vmatmul.mubr.msk.bf16.vlgmr.msra.gmra.mxu1 %vm255_vm0, %v2662_v27 }
  0x8a   : >> { %2261 = vmatpush3.bf16.msra.mxu0 %v2571_v12  ;;  %2275 = vmatpush3.bf16.msra.mxu1 %v2577_v13 }
  0x8b   : >> { %2262 = vmatprep.subr.bf16.mxu0 %v2589_v16  ;;  %2276 = vmatprep.subr.bf16.mxu1 %v2595_v17 }
  0x8c   : >> { %2270 = vmatprep.mubr.msk.bf16.mxu0 %vm255_vm0, %v2677_v30  ;;  %2284 = vmatprep.mubr.msk.bf16.mxu1 %vm255_vm0, %v2756_v35 }
  0x8e   : >> { %2263 = vmatpush3.bf16.msra.mxu0 %v2589_v16  ;;  %2277 = vmatpush3.bf16.msra.mxu1 %v2595_v17 }
  0x8f   : >> { %2264 = vmatprep.subr.bf16.mxu0 %v2602_v18  ;;  %2278 = vmatprep.subr.bf16.mxu1 %v2609_v19 }
  0x92   : >> { %2265 = vmatpush3.bf16.msra.mxu0 %v2602_v18  ;;  %2279 = vmatpush3.bf16.msra.mxu1 %v2609_v19 }
  0x93   : >> { %2266 = vmatprep.subr.bf16.mxu0 %v2630_v22  ;;  %2280 = vmatprep.subr.bf16.mxu1 %v2636_v23 }
  0x96   : >> { %2267 = vmatpush3.bf16.msra.mxu0 %v2630_v22  ;;  %2281 = vmatpush3.bf16.msra.mxu1 %v2636_v23 }
  0x97   : >> { %2268 = vmatprep.subr.bf16.mxu0 %v2644_v24  ;;  %2282 = vmatprep.subr.bf16.mxu1 %v2650_v25 }
  0x9a   : >> { %2269 = vmatpush3.bf16.msra.mxu0 %v2644_v24  ;;  %2283 = vmatpush3.bf16.msra.mxu1 %v2650_v25 }
  0x9b   : >> { %2288 = vmatprep.subr.bf16.mxu0 %v2658_v26  ;;  %2302 = vmatprep.subr.bf16.mxu1 %v2493_v0 }
  0x9d   : >> { %2271 = vmatmul.mubr.msk.bf16.vlgmr.msra.gmra.mxu0 %vm255_vm0, %v2719_v34  ;;  %2285 = vmatmul.mubr.msk.bf16.vlgmr.msra.gmra.mxu1 %vm255_vm0, %v2782_v36 }
  0x9e   : >> { %2289 = vmatpush3.bf16.msra.mxu0 %v2658_v26  ;;  %2303 = vmatpush3.bf16.msra.mxu1 %v2493_v0 }
  0x9f   : >> { %2290 = vmatprep.subr.bf16.mxu0 %v2673_v29  ;;  %2304 = vmatprep.subr.bf16.mxu1 %v2504_v2 }
  0xa0   : >> { %2298 = vmatprep.mubr.msk.bf16.mxu0 %vm255_vm0, %v2427_v37  ;;  %2312 = vmatprep.mubr.msk.bf16.mxu1 %vm255_vm0, %v2677_v30 }
  0xa2   : >> { %2291 = vmatpush3.bf16.msra.mxu0 %v2673_v29  ;;  %2305 = vmatpush3.bf16.msra.mxu1 %v2504_v2 }
  0xa3   : >> { %2292 = vmatprep.subr.bf16.mxu0 %v2689_v31  ;;  %2306 = vmatprep.subr.bf16.mxu1 %v2518_v4 }
  0xa6   : >> { %2293 = vmatpush3.bf16.msra.mxu0 %v2689_v31  ;;  %2307 = vmatpush3.bf16.msra.mxu1 %v2518_v4 }
  0xa7   : >> { %2294 = vmatprep.subr.bf16.mxu0 %v2702_v32  ;;  %2308 = vmatprep.subr.bf16.mxu1 %v2536_v6 }
  0xaa   : >> { %2295 = vmatpush3.bf16.msra.mxu0 %v2702_v32  ;;  %2309 = vmatpush3.bf16.msra.mxu1 %v2536_v6 }
  0xab   : >> { %2296 = vmatprep.subr.bf16.mxu0 %v2711_v33  ;;  %2310 = vmatprep.subr.bf16.mxu1 %v2554_v10 }
  0xae   : >> { %2297 = vmatpush3.bf16.msra.mxu0 %v2711_v33  ;;  %2311 = vmatpush3.bf16.msra.mxu1 %v2554_v10 }
  0xaf   : >> { %2316 = vmatprep.subr.bf16.mxu0 %v2498_v1  ;;  %2330 = vmatprep.subr.bf16.mxu1 %v2571_v12 }
  0xb1   : >> { %2299 = vmatmul.mubr.msk.bf16.vlgmr.msra.gmra.mxu0 %vm255_vm0, %v2428_v38  ;;  %2313 = vmatmul.mubr.msk.bf16.vlgmr.msra.gmra.mxu1 %vm255_vm0, %v2719_v34 }
  0xb2   : >> { %2317 = vmatpush3.bf16.msra.mxu0 %v2498_v1  ;;  %2331 = vmatpush3.bf16.msra.mxu1 %v2571_v12 }
  0xb3   : >> { %2318 = vmatprep.subr.bf16.mxu0 %v2511_v3  ;;  %2332 = vmatprep.subr.bf16.mxu1 %v2589_v16 }
  0xb4   : >> { %2326 = vmatprep.mubr.msk.bf16.mxu0 %vm255_vm0, %v2618_v21  ;;  %2340 = vmatprep.mubr.msk.bf16.mxu1 %vm255_vm0, %v2756_v35 }
  0xb6   : >> { %2319 = vmatpush3.bf16.msra.mxu0 %v2511_v3  ;;  %2333 = vmatpush3.bf16.msra.mxu1 %v2589_v16 }
  0xb7   : >> { %2320 = vmatprep.subr.bf16.mxu0 %v2525_v5  ;;  %2334 = vmatprep.subr.bf16.mxu1 %v2602_v18 }
  0xba   : >> { %2321 = vmatpush3.bf16.msra.mxu0 %v2525_v5  ;;  %2335 = vmatpush3.bf16.msra.mxu1 %v2602_v18 }
  0xbb   : >> { %2322 = vmatprep.subr.bf16.mxu0 %v2542_v7  ;;  %2336 = vmatprep.subr.bf16.mxu1 %v2630_v22 }
  0xbe   : >> { %2323 = vmatpush3.bf16.msra.mxu0 %v2542_v7  ;;  %2337 = vmatpush3.bf16.msra.mxu1 %v2630_v22 }
  0xbf   : >> { %2324 = vmatprep.subr.bf16.mxu0 %v2560_v11  ;;  %2338 = vmatprep.subr.bf16.mxu1 %v2644_v24 }
  0xc2   : >> { %2325 = vmatpush3.bf16.msra.mxu0 %v2560_v11  ;;  %2339 = vmatpush3.bf16.msra.mxu1 %v2644_v24 }
  0xc3   : >> { %2344 = vmatprep.subr.bf16.mxu0 %v2577_v13  ;;  %2358 = vmatprep.subr.bf16.mxu1 %v2658_v26 }
  0xc5   : >> { %2327 = vmatmul.mubr.msk.bf16.vlgmr.msra.gmra.mxu0 %vm255_vm0, %v2665_v28  ;;  %2341 = vmatmul.mubr.msk.bf16.vlgmr.msra.gmra.mxu1 %vm255_vm0, %v2782_v36 }
  0xc6   : >> { %2345 = vmatpush3.bf16.msra.mxu0 %v2577_v13  ;;  %2359 = vmatpush3.bf16.msra.mxu1 %v2658_v26 }
  0xc7   : >> { %2346 = vmatprep.subr.bf16.mxu0 %v2595_v17  ;;  %2360 = vmatprep.subr.bf16.mxu1 %v2673_v29 }
  0xc8   : >> { %2354 = vmatprep.mubr.msk.bf16.mxu0 %vm255_vm0, %v2427_v37  ;;  %2368 = vmatprep.mubr.msk.bf16.mxu1 %vm255_vm0, %v2429_v39 }
  0xca   : >> { %2347 = vmatpush3.bf16.msra.mxu0 %v2595_v17  ;;  %2361 = vmatpush3.bf16.msra.mxu1 %v2673_v29 }
  0xcb   : >> { %2348 = vmatprep.subr.bf16.mxu0 %v2609_v19  ;;  %2362 = vmatprep.subr.bf16.mxu1 %v2689_v31 }
  0xce   : >> { %2349 = vmatpush3.bf16.msra.mxu0 %v2609_v19  ;;  %2363 = vmatpush3.bf16.msra.mxu1 %v2689_v31 }
  0xcf   : >> { %2350 = vmatprep.subr.bf16.mxu0 %v2636_v23  ;;  %2364 = vmatprep.subr.bf16.mxu1 %v2702_v32 }
  0xd2   : >> { %2351 = vmatpush3.bf16.msra.mxu0 %v2636_v23  ;;  %2365 = vmatpush3.bf16.msra.mxu1 %v2702_v32 }
  0xd3   : >> { %2352 = vmatprep.subr.bf16.mxu0 %v2650_v25  ;;  %2366 = vmatprep.subr.bf16.mxu1 %v2711_v33 }
  0xd6   : >> { %2353 = vmatpush3.bf16.msra.mxu0 %v2650_v25  ;;  %2367 = vmatpush3.bf16.msra.mxu1 %v2711_v33 }
  0xd9   : >> { %2355 = vmatmul.mubr.msk.bf16.vlgmr.msra.gmra.mxu0 %vm255_vm0, %v2428_v38  ;;  %2369 = vmatmul.mubr.msk.bf16.vlgmr.msra.gmra.mxu1 %vm255_vm0, %v2430_v40 }
  0xe5   : >> { %v2104_v41 = vpop.f32.mrf.mxu0  ;;  %v2118_v42 = vpop.f32.mrf.mxu1 }
  0xe6   : >> { %v400_v37 = vadd.f32 %v2118_v42, %v2104_v41 }
  0xe7   : >> { %v2927_v43 = vpop.f32.mrf.mxu0  ;;  %v391_v44 = vpop.f32.mrf.mxu1 }
  0xe9   : >> { %v2929_v45 = vpop.f32.mrf.mxu0  ;;  %v2931_v46 = vpop.f32.mrf.mxu1 }
  0xeb   : >> { %v2933_v47 = vpop.f32.mrf.mxu0  ;;  %v2935_v48 = vpop.f32.mrf.mxu1 }
  0xec   : >> { %v395_v41 = vadd.f32 %v2935_v48, %v2933_v47  ;;  %v2996_v48 = vld [vmem:[%s3045_s2] ss:$0 sm:$0xff] }
  0xf9   : >> { %v2132_v49 = vpop.f32.mrf.mxu0  ;;  %v2937_v50 = vpop.f32.mrf.mxu1 }
  0xfb   : >> { %v505_v51 = vpop.f32.mrf.mxu0  ;;  %v2939_v52 = vpop.f32.mrf.mxu1 }
  0xfd   : >> { %v2941_v53 = vpop.f32.mrf.mxu0  ;;  %v2943_v54 = vpop.f32.mrf.mxu1 }
  0xff   : >> { %v2945_v55 = vpop.f32.mrf.mxu0  ;;  %v2947_v56 = vpop.f32.mrf.mxu1 }
 0x10d   : >> { %v2949_v57 = vpop.f32.mrf.mxu0  ;;  %v2174_v58 = vpop.f32.mrf.mxu1 }
 0x10f   : >> { %v2951_v59 = vpop.f32.mrf.mxu0  ;;  %v809_v60 = vpop.f32.mrf.mxu1 }
 0x111   : >> { %v2953_v61 = vpop.f32.mrf.mxu0  ;;  %v2175_v62 = vpop.f32.mrf.mxu1 }
 0x112   : >> { %3047 = vst [vmem:[#allocation3_spill] sm:$0xff] %v2953_v61 }
 0x113   : >> { %v2955_v63 = vpop.f32.mrf.mxu0  ;;  %v812_v0 = vpop.f32.mrf.mxu1 }
 0x114   : >> { %3048 = vst [vmem:[#allocation4_spill] sm:$0xff] %v2955_v63 }
 0x121   : >> { %v2188_v1 = vpop.f32.mrf.mxu0  ;;  %v2202_v2 = vpop.f32.mrf.mxu1 }
 0x122   : >> { %v867_v39 = vadd.f32 %v2188_v1, %v2174_v58 }
 0x123   : >> { %v858_v3 = vpop.f32.mrf.mxu0  ;;  %v907_v4 = vpop.f32.mrf.mxu1 }
 0x124   : >> { %v859_v63 = vadd.f32 %v858_v3, %v809_v60 }
 0x125   : >> { %v2189_v5 = vpop.f32.mrf.mxu0  ;;  %v2203_v6 = vpop.f32.mrf.mxu1 }
 0x126   : >> { %v870_v58 = vadd.f32 %v2189_v5, %v2175_v62 }
 0x127   : >> { %v861_v7 = vpop.f32.mrf.mxu0  ;;  %v2957_v8 = vpop.f32.mrf.mxu1 }
 0x128   : >> { %v862_v60 = vadd.f32 %v861_v7, %v812_v0 }
 0x135   : >> { %v2216_v9 = vpop.f32.mrf.mxu0  ;;  %v2959_v10 = vpop.f32.mrf.mxu1 }
 0x137   : >> { %v960_v11 = vpop.f32.mrf.mxu0  ;;  %v2961_v12 = vpop.f32.mrf.mxu1 }
 0x138   : >> { %3049 = vst [vmem:[#allocation5_spill] sm:$0xff] %v2961_v12  ;;  %v924_v12 = vadd.f32 %v2202_v2, %v867_v39 }
 0x139   : >> { %v2217_v13 = vpop.f32.mrf.mxu0  ;;  %v2963_v14 = vpop.f32.mrf.mxu1 }
 0x13a   : >> { %3050 = vst [vmem:[#allocation6_spill] sm:$0xff] %v2963_v14  ;;  %v392_v14 = vadd.f32 %v391_v44, %v2927_v43  ;;  %v922_v44 = vadd.f32 %v907_v4, %v859_v63  ;;  %v977_v3 = vadd.f32 %v2216_v9, %v924_v12 }
 0x13b   : >> { %v2965_v15 = vpop.f32.mrf.mxu0  ;;  %v2967_v16 = vpop.f32.mrf.mxu1 }
 0x13c   : >> { %3051 = vst [vmem:[#allocation7_spill] sm:$0xff] %v2965_v15  ;;  %3052 = vst [vmem:[#allocation8_spill] sm:$0xff] %v2967_v16  ;;  %v522_v16 = vadd.f32 %v2132_v49, %v400_v37  ;;  %v975_v47 = vadd.f32 %v960_v11, %v922_v44 }
 0x13e   : >> { %v640_v42 = vadd.f32 %v2937_v50, %v522_v16  ;;  %v925_v50 = vadd.f32 %v2203_v6, %v870_v58 }
 0x13f   : >> { %v3057_v16 = vld [vmem:[#allocation5_spill] sm:$0xff] }
 0x140   : >> { %v758_v2 = vadd.f32 %v2949_v57, %v640_v42  ;;  %v978_v57 = vadd.f32 %v2217_v13, %v925_v50  ;;  %v3059_v13 = vld [vmem:[#allocation4_spill] sm:$0xff] }
 0x142   : >> { %v769_v6 = vadd.f32 %v2996_v48, %v758_v2 }
 0x149   : >> { %v2244_v17 = vpop.f32.mrf.mxu0  ;;  %v2258_v18 = vpop.f32.mrf.mxu1 }
 0x14a   : >> { %v1160_v1 = vadd.f32 %v2258_v18, %v2244_v17  ;;  %v1052_v17 = vadd.f32 %v3057_v16, %v975_v47 }
 0x14b   : >> { %v1102_v19 = vpop.f32.mrf.mxu0  ;;  %v1151_v20 = vpop.f32.mrf.mxu1 }
 0x14d   : >> { %v2245_v21 = vpop.f32.mrf.mxu0  ;;  %v2259_v22 = vpop.f32.mrf.mxu1 }
 0x14f   : >> { %v1105_v23 = vpop.f32.mrf.mxu0  ;;  %v1154_v24 = vpop.f32.mrf.mxu1 }
 0x150   : >> { %v1155_v7 = vadd.f32 %v1154_v24, %v1105_v23  ;;  %v3060_v24 = vld [vmem:[#allocation6_spill] sm:$0xff] }
 0x15d   : >> { %v2272_v25 = vpop.f32.mrf.mxu0  ;;  %v2286_v26 = vpop.f32.mrf.mxu1 }
 0x15f   : >> { %v1200_v27 = vpop.f32.mrf.mxu0  ;;  %v1253_v28 = vpop.f32.mrf.mxu1 }
 0x161   : >> { %v2273_v29 = vpop.f32.mrf.mxu0  ;;  %v2969_v30 = vpop.f32.mrf.mxu1 }
 0x162   : >> { %3053 = vst [vmem:[#allocation9_spill] sm:$0xff] %v2969_v30  ;;  %v520_v30 = vadd.f32 %v505_v51, %v392_v14  ;;  %v521_v51 = vadd.f32 %v2945_v55, %v395_v41  ;;  %v1054_v55 = vadd.f32 %v2959_v10, %v977_v3  ;;  %v3056_v14 = vld [vmem:[#allocation3_spill] sm:$0xff] }
 0x163   : >> { %v1203_v31 = vpop.f32.mrf.mxu0  ;;  %v2971_v32 = vpop.f32.mrf.mxu1 }
 0x164   : >> { %3054 = vst [vmem:[#allocation10_spill] sm:$0xff] %v2971_v32  ;;  %v403_v32 = vadd.f32 %v2931_v46, %v2929_v45  ;;  %v1217_v45 = vadd.f32 %v2272_v25, %v1160_v1  ;;  %v638_v46 = vadd.f32 %v2939_v52, %v520_v30  ;;  %v923_v52 = vadd.f32 %v2957_v8, %v862_v60 }
 0x165   : >> { %v639_v12 = vadd.f32 %v2947_v56, %v521_v51  ;;  %v1058_v56 = vadd.f32 %v2996_v48, %v1054_v55  ;;  %v1055_v25 = vadd.f32 %v3060_v24, %v978_v57  ;;  %v773_v30 = vmax.f32 %v769_v6, 0.0 }
 0x166   : >> { %v523_v43 = vadd.f32 %v2941_v53, %v403_v32  ;;  %v1163_v53 = vadd.f32 %v2259_v22, %v2245_v21  ;;  %v756_v4 = vadd.f32 %v2951_v59, %v638_v46  ;;  %v1270_v9 = vadd.f32 %v2286_v26, %v1217_v45 }
 0x167   : >> { %v757_v21 = vadd.f32 %v3059_v13, %v639_v12  ;;  %v1062_v3 = vmax.f32 %v1058_v56, 0.0  ;;  %v1059_v45 = vadd.f32 %v2996_v48, %v1055_v25 }
 0x168   : >> { %v641_v0 = vadd.f32 %v2943_v54, %v523_v43  ;;  %v1218_v11 = vadd.f32 %v2273_v29, %v1163_v53  ;;  %v3058_v54 = vld [vmem:[#allocation7_spill] sm:$0xff]  ;;  %v767_v10 = vadd.f32 %v2996_v48, %v756_v4 }
 0x169   : >> { %v976_v18 = vadd.f32 %v3058_v54, %v923_v52  ;;  %v3061_v26 = vld [vmem:[#allocation9_spill] sm:$0xff]  ;;  %v768_v43 = vadd.f32 %v2996_v48, %v757_v21  ;;  %v1063_v12 = vmax.f32 %v1059_v45, 0.0 }
 0x16b   : >> { %v3063_v41 = vld [vmem:[#allocation10_spill] sm:$0xff]  ;;  %v772_v52 = vmax.f32 %v768_v43, 0.0 }
 0x171   : >> { %v2300_v33 = vpop.f32.mrf.mxu0  ;;  %v2314_v34 = vpop.f32.mrf.mxu1 }
 0x172   : >> { %v1347_v8 = vadd.f32 %v2300_v33, %v1270_v9  ;;  %v3062_v33 = vld [vmem:[#allocation8_spill] sm:$0xff] }
 0x173   : >> { %v1330_v35 = vpop.f32.mrf.mxu0  ;;  %v2973_v36 = vpop.f32.mrf.mxu1  ;;  %v1053_v39 = vadd.f32 %v3062_v33, %v976_v18 }
 0x175   : >> { %v2975_v38 = vpop.f32.mrf.mxu0  ;;  %v2977_v40 = vpop.f32.mrf.mxu1 }
 0x177   : >> { %v2980_v15 = vpop.f32.mrf.mxu0  ;;  %v2984_v61 = vpop.f32.mrf.mxu1 }
 0x178   : >> { %3055 = vst [vmem:[#allocation11_spill] sm:$0xff] %v2980_v15  ;;  %v1152_v15 = vadd.f32 %v1151_v20, %v1102_v19  ;;  %v1216_v19 = vadd.f32 %v1203_v31, %v1155_v7 }
 0x17a   : >> { %v1215_v62 = vadd.f32 %v1200_v27, %v1152_v15  ;;  %v759_v15 = vadd.f32 %v3056_v14, %v641_v0  ;;  %v1271_v27 = vadd.f32 %v3061_v26, %v1218_v11  ;;  %v1269_v42 = vadd.f32 %v3063_v41, %v1216_v19 }
 0x17b   : >> { %v1066_v11 = vmax.f32 %v773_v30, %v1062_v3 }
 0x17c   : >> { %v1268_v59 = vadd.f32 %v1253_v28, %v1215_v62  ;;  %v770_v32 = vadd.f32 %v2996_v48, %v759_v15  ;;  %v1056_v28 = vadd.f32 %v2996_v48, %v1052_v17  ;;  %v1348_v58 = vadd.f32 %v2975_v38, %v1271_v27 }
 0x17e   : >> { %v1345_v29 = vadd.f32 %v1330_v35, %v1268_v59  ;;  %v774_v47 = vmax.f32 %v770_v32, 0.0 }
 0x17f   : >> { %v3064_v46 = vld [vmem:[#allocation11_spill] sm:$0xff] }
 0x180   : >> { %v1346_v51 = vadd.f32 %v3064_v46, %v1269_v42 }
 0x185   : >> { %v2328_v49 = vpop.f32.mrf.mxu0  ;;  %v2342_v37 = vpop.f32.mrf.mxu1 }
 0x186   : >> { %v1453_v22 = vadd.f32 %v2328_v49, %v2314_v34  ;;  %v1351_v34 = vadd.f32 %v2996_v48, %v1347_v8  ;;  %v771_v49 = vmax.f32 %v767_v10, 0.0 }
 0x187   : >> { %v1444_v63 = vpop.f32.mrf.mxu0  ;;  %v1493_v5 = vpop.f32.mrf.mxu1 }
 0x188   : >> { %v1445_v31 = vadd.f32 %v1444_v63, %v2973_v36  ;;  %v1510_v35 = vadd.f32 %v2342_v37, %v1453_v22  ;;  %v1349_v36 = vadd.f32 %v2996_v48, %v1345_v29  ;;  %v1060_v63 = vmax.f32 %v1056_v28, 0.0 }
 0x189   : >> { %v2329_v20 = vpop.f32.mrf.mxu0  ;;  %v2343_v23 = vpop.f32.mrf.mxu1  ;;  %v1057_v37 = vadd.f32 %v2996_v48, %v1053_v39  ;;  %v1355_v0 = vmax.f32 %v1351_v34, 0.0 }
 0x18a   : >> { %v1456_v44 = vadd.f32 %v2329_v20, %v2977_v40  ;;  %v1508_v50 = vadd.f32 %v1493_v5, %v1445_v31  ;;  %v1352_v40 = vadd.f32 %v2996_v48, %v1348_v58  ;;  %v1353_v6 = vmax.f32 %v1349_v36, 0.0 }
 0x18b   : >> { %v1447_v1 = vpop.f32.mrf.mxu0  ;;  %v1496_v60 = vpop.f32.mrf.mxu1  ;;  %v1350_v5 = vadd.f32 %v2996_v48, %v1346_v51  ;;  %v1064_v18 = vmax.f32 %v771_v49, %v1060_v63  ;;  %v1061_v59 = vmax.f32 %v1057_v37, 0.0  ;;  %v1359_v19 = vmax.f32 %v1066_v11, %v1355_v0 }
 0x18c   : >> { %v1448_v38 = vadd.f32 %v1447_v1, %v2984_v61  ;;  %v1511_v55 = vadd.f32 %v2343_v23, %v1456_v44  ;;  %v1356_v8 = vmax.f32 %v1352_v40, 0.0  ;;  %v1067_v23 = vmax.f32 %v774_v47, %v1063_v12 }
 0x18d   : >> { %v1357_v56 = vmax.f32 %v1064_v18, %v1353_v6  ;;  %v1354_v24 = vmax.f32 %v1350_v5, 0.0  ;;  %v1065_v32 = vmax.f32 %v772_v52, %v1061_v59 }
 0x18e   : >> { %v1509_v14 = vadd.f32 %v1496_v60, %v1448_v38  ;;  %v1360_v28 = vmax.f32 %v1067_v23, %v1356_v8 }
 0x18f   : >> { %v1358_v41 = vmax.f32 %v1065_v32, %v1354_v24 }
 0x199   : >> { %v2356_v2 = vpop.f32.mrf.mxu0  ;;  %v2370_v62 = vpop.f32.mrf.mxu1 }
 0x19a   : >> { %v1563_v53 = vadd.f32 %v2356_v2, %v1510_v35 }
 0x19b   : >> { %v1546_v4 = vpop.f32.mrf.mxu0  ;;  %v1623_v9 = vpop.f32.mrf.mxu1 }
 0x19c   : >> { %v1640_v57 = vadd.f32 %v2370_v62, %v1563_v53  ;;  %v1561_v7 = vadd.f32 %v1546_v4, %v1508_v50 }
 0x19d   : >> { %v2357_v61 = vpop.f32.mrf.mxu0  ;;  %v2371_v54 = vpop.f32.mrf.mxu1 }
 0x19e   : >> { %v1644_v15 = vadd.f32 %v2996_v48, %v1640_v57  ;;  %v1638_v16 = vadd.f32 %v1623_v9, %v1561_v7  ;;  %v1564_v17 = vadd.f32 %v2357_v61, %v1511_v55 }
 0x19f   : >> { %v1549_v20 = vpop.f32.mrf.mxu0  ;;  %v1626_v25 = vpop.f32.mrf.mxu1 }
 0x1a0   : >> { %v1648_v10 = vmax.f32 %v1644_v15, 0.0  ;;  %v1642_v13 = vadd.f32 %v2996_v48, %v1638_v16  ;;  %v1641_v21 = vadd.f32 %v2371_v54, %v1564_v17  ;;  %v1562_v22 = vadd.f32 %v1549_v20, %v1509_v14 }
 0x1a2   : >> { %v1652_v26 = vmax.f32 %v1359_v19, %v1648_v10  ;;  %v1646_v27 = vmax.f32 %v1642_v13, 0.0  ;;  %v1645_v29 = vadd.f32 %v2996_v48, %v1641_v21  ;;  %v1639_v30 = vadd.f32 %v1626_v25, %v1562_v22 }
 0x1a4   : >> { %1657 = vst.msk [vmem:[#allocation2 + $0x10] sm:$0xff] %vm1654_vm1, %v1652_v26  ;;  %v1650_v31 = vmax.f32 %v1357_v56, %v1646_v27  ;;  %v1649_v33 = vmax.f32 %v1645_v29, 0.0  ;;  %v1643_v39 = vadd.f32 %v2996_v48, %v1639_v30 }
 0x1a6   : >> { %1655 = vst.msk [vmem:[#allocation2] sm:$0xff] %vm1654_vm1, %v1650_v31  ;;  %v1653_v42 = vmax.f32 %v1360_v28, %v1649_v33  ;;  %v1647_v34 = vmax.f32 %v1643_v39, 0.0 }
 0x1a8   : >> { %1659 = vst.msk [vmem:[#allocation2 + $0x18] sm:$0xf] %vm1658_vm2, %v1653_v42  ;;  %v1651_v58 = vmax.f32 %v1358_v41, %v1647_v34 }
 0x1aa   : >> { %1656 = vst.msk [vmem:[#allocation2 + $0x8] sm:$0xff] %vm1654_vm1, %v1651_v58 }
 0x1b1   : >> { %v1660_v1 = vld [vmem:[#allocation2] ss:$4 sm:$0x7f]  ;;  %v1662_v49 = vld [vmem:[#allocation2 + $0x1] ss:$4 sm:$0x7f] }
 0x1b2   : >> { %v1663_v43 = vmax.f32 %v1660_v1, %v1662_v49  ;;  %v1665_v35 = vld [vmem:[#allocation2 + $0x2] ss:$4 sm:$0x7f]  ;;  %v1668_v60 = vld [vmem:[#allocation2 + $0x3] ss:$4 sm:$0x7f] }
 0x1b4   : >> { %v1666_v44 = vmax.f32 %v1663_v43, %v1665_v35  ;;  %176 = sbr.rel (!%p174_p4) target bundleno = 16 (0x10), region = 85 }
 0x1b6   : >> { %v1669_v48 = vmax.f32 %v1666_v44, %v1668_v60 }
 0x1b8   : >> { %1673 = vst.msk [vmem:[%s1671_s5] sm:$0x7f] %vm1672_vm3, %v1669_v48 }
 0x1b9 PF: > { %s13_s12 = sadd.s32 1, %s2441_s12  }
 0x1ba   : > { %p10_p5 = scmp.ge.s32.totalorder %s13_s12, 4  }
 0x1bc   :  { %12 = sbr.rel (!%p10_p5) target bundleno = 1 (0x1), region = 96 }

// kernel: cnn_net_forward.3
= control target key start
LH: loop header
LB: loop body
LE: loop exit
PB: predicated region body
PF: predicated region fallthrough
CT: control target
= control target key end

     0   :  { %s4327_s12 = smov 0   ;;  %s5698_s0 = inlined_call_operand.vmem [shape: bf16[2,100,112,15], index: 0, kind: input, shape index: {}]   ;;  %s5699_s1 = inlined_call_operand.vmem [shape: bf16[5,15,16], index: 1, kind: input, shape index: {}]   ;;  %s5700_s2 = inlined_call_operand.vmem [shape: f32[1,16], index: 2, kind: input, shape index: {}]   ;;  %s5701_s3 = inlined_call_operand.vmem [shape: f32[2,24,28,16], index: 3, kind: output, shape index: {}]  }
   0x1 LB: > { %s3095_s13 = sadd.s32 4294967295, %s4298_s12   ;;  %p3099_p0 = scmp.ge.s32.totalorder %s4298_s12, 1  ;;  %s4298_s12 = sphi %s4327_s12, %s13_s12  }
   0x2   : > { %p137_p1 = scmp.lt.s32.totalorder %s4298_s12, 3 }
   0x4   : > { %p138_p2 = pnand %p3099_p0, %p137_p1 }
   0x5   : > { %p161_p3 = scmp.lt.s32.totalorder (!%p138_p2), %s3095_s13, 1  ;;  %s4345_s22 = smov (!%p138_p2), 0  }
   0x6   : > { %141 = sbr.rel (%p138_p2) target bundleno = 798 (0x31e), region = 32 }
   0xb   : > { %s5715_s13 = smov (!%p161_p3, %s3095_s13), 1 }
   0xc   : > { %s4191_s14 = smul.u32 5600, %s5715_s13 }
   0xd   : > { %s4192_s15 = smul.u32 768, %s5715_s13 }
   0xe   : > { %s4338_s18 = scalar_lea.vmem %s5698_s0, %s4191_s14 }
   0xf   : > { %s4343_s21 = scalar_lea.vmem %s5701_s3, %s4192_s15 }
  0x10 LB: >> { %v4212_v0 = vld [vmem:[%s5699_s1 + $0x8] sm:$0xff]   ;;  %v4304_v1 = vmov 0.0   ;;  %vm281_vm0 = vcmask 1046528   ;;  %vm282_vm1 = vcmask 1047552   ;;  %v4213_v2 = vld [vmem:[%s5699_s1] sm:$0xff]   ;;  %v4305_v3 = vmov 65535   ;;  %s4302_s22 = sphi %s4345_s22, %s177_s22  }
  0x11   : >> { %3591 = vmatprep.subr.bf16.mxu0 %v4304_v1  ;;  %3621 = vmatprep.subr.bf16.mxu1 %v4304_v1  ;;  %v283_v4 = vsel %vm281_vm0, 4294967295, %v4305_v3  ;;  %s3430_s27 = smul.u32 224, %s4302_s22  ;;  %vm4306_vm2 = vmmov 0   ;;  %v4216_v6 = vld [vmem:[%s5699_s1 + $0x10] sm:$0xff]   ;;  %v4217_v9 = vld [vmem:[%s5699_s1 + $0x18] sm:$0xff]   ;;  %vm259_vm3 = vcmask 121856  }
  0x12   : >> { %v4359_v5 = vsel %vm282_vm1, %v283_v4, 0  ;;  %3593 = vmatprep.mubr.msk.bf16.mxu0 %vm4306_vm2, %v4304_v1  ;;  %3623 = vmatprep.mubr.msk.bf16.mxu1 %vm4306_vm2, %v4304_v1  ;;  %v4232_v26 = vld [vmem:[%s5699_s1 + $0x20] sm:$0xff]   ;;  %vm2938_vm4 = vcmask 130048   ;;  %s3427_s13 = sshll.u32 %s4302_s22, 5  ;;  %vm3001_vm5 = vcmask 125952   ;;  %s177_s22 = sadd.s32 1, %s4302_s22  }
  0x13   : >> { %v4369_v7 = vand.u32 %v4212_v0, %v4359_v5  ;;  %v4372_v8 = vand.u32 %v4213_v2, %v4359_v5  ;;  %s4375_s30 = scalar_lea.vmem %s4338_s18, %s3430_s27  ;;  %v4387_v12 = vand.u32 %v4216_v6, %v4359_v5  ;;  %v4390_v13 = vand.u32 %v4217_v9, %v4359_v5  ;;  %s5650_s14 = scalar_lea.vmem %s4343_s21, %s3427_s13 }
  0x14   : >> { %v4381_v10 = vld [vmem:[%s4375_s30 + $0x38] sm:$0xff]   ;;  %v4215_v11 = vld [vmem:[%s4375_s30] sm:$0xff]   ;;  %v4219_v15 = vld [vmem:[%s4375_s30 + $0x8] sm:$0xff]   ;;  %v4481_v29 = vand.u32 %v4232_v26, %v4359_v5  ;;  %p174_p4 = scmp.ge.s32.totalorder %s177_s22, 24  }
  0x15   : >> { %3592 = vmatpush3.bf16.msra.mxu0 %v4369_v7  ;;  %3622 = vmatpush3.bf16.msra.mxu1 %v4372_v8  ;;  %v4404_v14 = vld [vmem:[%s4375_s30 + $0x40] sm:$0xff]   ;;  %v4417_v16 = vld [vmem:[%s4375_s30 + $0x48] sm:$0xff]   ;;  %v4221_v17 = vld [vmem:[%s4375_s30 + $0x10] sm:$0xff]  }
  0x16   : >> { %3651 = vmatprep.subr.bf16.mxu0 %v4304_v1  ;;  %3681 = vmatprep.subr.bf16.mxu1 %v4304_v1  ;;  %v4428_v18 = vld [vmem:[%s4375_s30 + $0x50] sm:$0xff]   ;;  %v4223_v19 = vld [vmem:[%s4375_s30 + $0x18] sm:$0xff]   ;;  %v4225_v21 = vld [vmem:[%s4375_s30 + $0x20] sm:$0xff]  }
  0x17   : >> { %v4439_v20 = vld [vmem:[%s4375_s30 + $0x58] sm:$0xff]   ;;  %v4450_v22 = vld [vmem:[%s4375_s30 + $0x60] sm:$0xff]   ;;  %v4227_v23 = vld [vmem:[%s4375_s30 + $0x28] sm:$0xff]  }
  0x18   : >> { %3594 = vmatmul.mubr.msk.bf16.vlgmr.msra.gmra.mxu0 %vm259_vm3, %v4381_v10  ;;  %3624 = vmatmul.mubr.msk.bf16.vlgmr.msra.gmra.mxu1 %vm259_vm3, %v4215_v11  ;;  %v4461_v24 = vld [vmem:[%s4375_s30 + $0x68] sm:$0xff]   ;;  %v4229_v25 = vld [vmem:[%s4375_s30 + $0x30] sm:$0xff]   ;;  %v4496_v30 = vld [vmem:[%s4375_s30 + $0x78] sm:$0xff]  }
  0x19   : >> { %3652 = vmatpush3.bf16.msra.mxu0 %v4387_v12  ;;  %3682 = vmatpush3.bf16.msra.mxu1 %v4390_v13  ;;  %v4475_v27 = vld [vmem:[%s4375_s30 + $0x70] sm:$0xff]   ;;  %v4478_v28 = vld [vmem:[%s4375_s30 + $0xa8] sm:$0xff]   ;;  %v4510_v32 = vld [vmem:[%s4375_s30 + $0x80] sm:$0xff]  }
  0x1a   : >> { %3597 = vmatprep.mubr.msk.bf16.mxu0 %vm4306_vm2, %v4304_v1  ;;  %3627 = vmatprep.mubr.msk.bf16.mxu1 %vm4306_vm2, %v4304_v1  ;;  %v4499_v31 = vld [vmem:[%s4375_s30 + $0xb0] sm:$0xff]   ;;  %v4513_v33 = vld [vmem:[%s4375_s30 + $0xb8] sm:$0xff]   ;;  %v4524_v34 = vld [vmem:[%s4375_s30 + $0x88] sm:$0xff]  }
  0x1b   : >> { %3711 = vmatprep.subr.bf16.mxu0 %v4304_v1  ;;  %3741 = vmatprep.subr.bf16.mxu1 %v4304_v1  ;;  %v4527_v35 = vld [vmem:[%s4375_s30 + $0xc0] sm:$0xff]   ;;  %v4538_v36 = vld [vmem:[%s4375_s30 + $0x90] sm:$0xff]   ;;  %v4541_v37 = vld [vmem:[%s4375_s30 + $0xc8] sm:$0xff]  }
  0x1c   : >> { %v4552_v38 = vld [vmem:[%s4375_s30 + $0x98] sm:$0xff]   ;;  %v4555_v39 = vld [vmem:[%s4375_s30 + $0xd0] sm:$0xff]   ;;  %v4566_v40 = vld [vmem:[%s4375_s30 + $0xa0] sm:$0xff]  }
  0x1d   : >> { %v4569_v41 = vld [vmem:[%s4375_s30 + $0xd8] sm:$0xff]   ;;  %v4580_v42 = vld [vmem:[%s4375_s30 + $0xe0] sm:$0xff]   ;;  %v4595_v43 = vld [vmem:[%s4375_s30 + $0xe8] sm:$0xff]  }
  0x1e   : >> { %v4606_v44 = vld [vmem:[%s4375_s30 + $0xf0] sm:$0xff]   ;;  %v4617_v45 = vld [vmem:[%s4375_s30 + $0xf8] sm:$0xff]   ;;  %v4628_v46 = vld [vmem:[%s4375_s30 + $0x100] sm:$0xff]  }
  0x1f   : >> { %v4639_v47 = vld [vmem:[%s4375_s30 + $0x108] sm:$0xff]   ;;  %v4650_v48 = vld [vmem:[%s4375_s30 + $0x110] sm:$0xff]  }
  0x20   : >> { %3598 = vmatmul.mubr.msk.bf16.gmra.mxu0 %vm259_vm3, %v4404_v14  ;;  %3628 = vmatmul.mubr.msk.bf16.gmra.mxu1 %vm259_vm3, %v4219_v15 }
  0x21   : >> { %3601 = vmatprep.mubr.msk.bf16.mxu0 %vm4306_vm2, %v4304_v1  ;;  %3631 = vmatprep.mubr.msk.bf16.mxu1 %vm4306_vm2, %v4304_v1 }
  0x28   : >> { %3602 = vmatmul.mubr.msk.bf16.gmra.mxu0 %vm259_vm3, %v4417_v16  ;;  %3632 = vmatmul.mubr.msk.bf16.gmra.mxu1 %vm259_vm3, %v4221_v17 }
  0x29   : >> { %3605 = vmatprep.mubr.msk.bf16.mxu0 %vm4306_vm2, %v4304_v1  ;;  %3635 = vmatprep.mubr.msk.bf16.mxu1 %vm4306_vm2, %v4304_v1 }
  0x30   : >> { %3606 = vmatmul.mubr.msk.bf16.gmra.mxu0 %vm259_vm3, %v4428_v18  ;;  %3636 = vmatmul.mubr.msk.bf16.gmra.mxu1 %vm259_vm3, %v4223_v19 }
  0x31   : >> { %3609 = vmatprep.mubr.msk.bf16.mxu0 %vm4306_vm2, %v4304_v1  ;;  %3639 = vmatprep.mubr.msk.bf16.mxu1 %vm4306_vm2, %v4304_v1 }
  0x38   : >> { %3610 = vmatmul.mubr.msk.bf16.gmra.mxu0 %vm259_vm3, %v4439_v20  ;;  %3640 = vmatmul.mubr.msk.bf16.gmra.mxu1 %vm259_vm3, %v4225_v21 }
  0x39   : >> { %3613 = vmatprep.mubr.msk.bf16.mxu0 %vm4306_vm2, %v4304_v1  ;;  %3643 = vmatprep.mubr.msk.bf16.mxu1 %vm4306_vm2, %v4304_v1 }
  0x40   : >> { %3614 = vmatmul.mubr.msk.bf16.gmra.mxu0 %vm259_vm3, %v4450_v22  ;;  %3644 = vmatmul.mubr.msk.bf16.gmra.mxu1 %vm259_vm3, %v4227_v23 }
  0x41   : >> { %3617 = vmatprep.mubr.msk.bf16.mxu0 %vm4306_vm2, %v4304_v1  ;;  %3647 = vmatprep.mubr.msk.bf16.mxu1 %vm4306_vm2, %v4304_v1 }
  0x48   : >> { %3618 = vmatmul.mubr.msk.bf16.gmra.mxu0 %vm259_vm3, %v4461_v24  ;;  %3648 = vmatmul.mubr.msk.bf16.gmra.mxu1 %vm259_vm3, %v4229_v25 }
  0x49   : >> { %3653 = vmatprep.mubr.msk.bf16.mxu0 %vm4306_vm2, %v4304_v1  ;;  %3683 = vmatprep.mubr.msk.bf16.mxu1 %vm4306_vm2, %v4304_v1 }
  0x50   : >> { %3654 = vmatmul.mubr.msk.bf16.vlgmr.msra.gmra.mxu0 %vm259_vm3, %v4475_v27  ;;  %3684 = vmatmul.mubr.msk.bf16.vlgmr.msra.gmra.mxu1 %vm259_vm3, %v4478_v28 }
  0x51   : >> { %3712 = vmatpush3.bf16.msra.mxu0 %v4481_v29  ;;  %3742 = vmatpush3.bf16.msra.mxu1 %v4369_v7 }
  0x52   : >> { %3657 = vmatprep.mubr.msk.bf16.mxu0 %vm4306_vm2, %v4304_v1  ;;  %3687 = vmatprep.mubr.msk.bf16.mxu1 %vm4306_vm2, %v4304_v1 }
  0x53   : >> { %3771 = vmatprep.subr.bf16.mxu0 %v4304_v1  ;;  %3801 = vmatprep.subr.bf16.mxu1 %v4304_v1 }
  0x58   : >> { %3658 = vmatmul.mubr.msk.bf16.gmra.mxu0 %vm259_vm3, %v4496_v30  ;;  %3688 = vmatmul.mubr.msk.bf16.gmra.mxu1 %vm259_vm3, %v4499_v31 }
  0x59   : >> { %3661 = vmatprep.mubr.msk.bf16.mxu0 %vm4306_vm2, %v4304_v1  ;;  %3691 = vmatprep.mubr.msk.bf16.mxu1 %vm4306_vm2, %v4304_v1 }
  0x60   : >> { %3662 = vmatmul.mubr.msk.bf16.gmra.mxu0 %vm259_vm3, %v4510_v32  ;;  %3692 = vmatmul.mubr.msk.bf16.gmra.mxu1 %vm259_vm3, %v4513_v33 }
  0x61   : >> { %3665 = vmatprep.mubr.msk.bf16.mxu0 %vm4306_vm2, %v4304_v1  ;;  %3695 = vmatprep.mubr.msk.bf16.mxu1 %vm4306_vm2, %v4304_v1 }
  0x68   : >> { %3666 = vmatmul.mubr.msk.bf16.gmra.mxu0 %vm259_vm3, %v4524_v34  ;;  %3696 = vmatmul.mubr.msk.bf16.gmra.mxu1 %vm259_vm3, %v4527_v35 }
  0x69   : >> { %3669 = vmatprep.mubr.msk.bf16.mxu0 %vm4306_vm2, %v4304_v1  ;;  %3699 = vmatprep.mubr.msk.bf16.mxu1 %vm4306_vm2, %v4304_v1 }
  0x70   : >> { %3670 = vmatmul.mubr.msk.bf16.gmra.mxu0 %vm259_vm3, %v4538_v36  ;;  %3700 = vmatmul.mubr.msk.bf16.gmra.mxu1 %vm259_vm3, %v4541_v37 }
  0x71   : >> { %3673 = vmatprep.mubr.msk.bf16.mxu0 %vm4306_vm2, %v4304_v1  ;;  %3703 = vmatprep.mubr.msk.bf16.mxu1 %vm4306_vm2, %v4304_v1 }
  0x78   : >> { %3674 = vmatmul.mubr.msk.bf16.gmra.mxu0 %vm259_vm3, %v4552_v38  ;;  %3704 = vmatmul.mubr.msk.bf16.gmra.mxu1 %vm259_vm3, %v4555_v39 }
  0x79   : >> { %3677 = vmatprep.mubr.msk.bf16.mxu0 %vm4306_vm2, %v4304_v1  ;;  %3707 = vmatprep.mubr.msk.bf16.mxu1 %vm4306_vm2, %v4304_v1 }
  0x80   : >> { %3678 = vmatmul.mubr.msk.bf16.gmra.mxu0 %vm259_vm3, %v4566_v40  ;;  %3708 = vmatmul.mubr.msk.bf16.gmra.mxu1 %vm259_vm3, %v4569_v41 }
  0x81   : >> { %3713 = vmatprep.mubr.msk.bf16.mxu0 %vm4306_vm2, %v4304_v1  ;;  %3743 = vmatprep.mubr.msk.bf16.mxu1 %vm4306_vm2, %v4304_v1 }
  0x88   : >> { %3714 = vmatmul.mubr.msk.bf16.vlgmr.msra.gmra.mxu0 %vm259_vm3, %v4580_v42  ;;  %3744 = vmatmul.mubr.msk.bf16.vlgmr.msra.gmra.mxu1 %vm259_vm3, %v4475_v27 }
  0x89   : >> { %3772 = vmatpush3.bf16.msra.mxu0 %v4372_v8  ;;  %3802 = vmatpush3.bf16.msra.mxu1 %v4387_v12 }
  0x8a   : >> { %3717 = vmatprep.mubr.msk.bf16.mxu0 %vm4306_vm2, %v4304_v1  ;;  %3747 = vmatprep.mubr.msk.bf16.mxu1 %vm4306_vm2, %v4304_v1 }
  0x8b   : >> { %3831 = vmatprep.subr.bf16.mxu0 %v4304_v1  ;;  %3861 = vmatprep.subr.bf16.mxu1 %v4304_v1 }
  0x90   : >> { %3718 = vmatmul.mubr.msk.bf16.gmra.mxu0 %vm259_vm3, %v4595_v43  ;;  %3748 = vmatmul.mubr.msk.bf16.gmra.mxu1 %vm259_vm3, %v4496_v30 }
  0x91   : >> { %3721 = vmatprep.mubr.msk.bf16.mxu0 %vm4306_vm2, %v4304_v1  ;;  %3751 = vmatprep.mubr.msk.bf16.mxu1 %vm4306_vm2, %v4304_v1 }
  0x98   : >> { %3722 = vmatmul.mubr.msk.bf16.gmra.mxu0 %vm259_vm3, %v4606_v44  ;;  %3752 = vmatmul.mubr.msk.bf16.gmra.mxu1 %vm259_vm3, %v4510_v32 }
  0x99   : >> { %3725 = vmatprep.mubr.msk.bf16.mxu0 %vm4306_vm2, %v4304_v1  ;;  %3755 = vmatprep.mubr.msk.bf16.mxu1 %vm4306_vm2, %v4304_v1 }
  0xa0   : >> { %3726 = vmatmul.mubr.msk.bf16.gmra.mxu0 %vm259_vm3, %v4617_v45  ;;  %3756 = vmatmul.mubr.msk.bf16.gmra.mxu1 %vm259_vm3, %v4524_v34 }
  0xa1   : >> { %3729 = vmatprep.mubr.msk.bf16.mxu0 %vm4306_vm2, %v4304_v1  ;;  %3759 = vmatprep.mubr.msk.bf16.mxu1 %vm4306_vm2, %v4304_v1 }
  0xa8   : >> { %3730 = vmatmul.mubr.msk.bf16.gmra.mxu0 %vm259_vm3, %v4628_v46  ;;  %3760 = vmatmul.mubr.msk.bf16.gmra.mxu1 %vm259_vm3, %v4538_v36 }
  0xa9   : >> { %3733 = vmatprep.mubr.msk.bf16.mxu0 %vm4306_vm2, %v4304_v1  ;;  %3763 = vmatprep.mubr.msk.bf16.mxu1 %vm4306_vm2, %v4304_v1 }
  0xb0   : >> { %3734 = vmatmul.mubr.msk.bf16.gmra.mxu0 %vm259_vm3, %v4639_v47  ;;  %3764 = vmatmul.mubr.msk.bf16.gmra.mxu1 %vm259_vm3, %v4552_v38 }
  0xb1   : >> { %3737 = vmatprep.mubr.msk.bf16.mxu0 %vm4306_vm2, %v4304_v1  ;;  %3767 = vmatprep.mubr.msk.bf16.mxu1 %vm4306_vm2, %v4304_v1 }
  0xb8   : >> { %3738 = vmatmul.mubr.msk.bf16.gmra.mxu0 %vm259_vm3, %v4650_v48  ;;  %3768 = vmatmul.mubr.msk.bf16.gmra.mxu1 %vm259_vm3, %v4566_v40 }
  0xb9   : >> { %3773 = vmatprep.mubr.msk.bf16.mxu0 %vm4306_vm2, %v4304_v1  ;;  %3803 = vmatprep.mubr.msk.bf16.mxu1 %vm4306_vm2, %v4304_v1 }
  0xc0   : >> { %3774 = vmatmul.mubr.msk.bf16.vlgmr.msra.gmra.mxu0 %vm259_vm3, %v4381_v10  ;;  %3804 = vmatmul.mubr.msk.bf16.vlgmr.msra.gmra.mxu1 %vm259_vm3, %v4478_v28 }
  0xc1   : >> { %3832 = vmatpush3.bf16.msra.mxu0 %v4390_v13  ;;  %3862 = vmatpush3.bf16.msra.mxu1 %v4481_v29 }
  0xc2   : >> { %3777 = vmatprep.mubr.msk.bf16.mxu0 %vm4306_vm2, %v4304_v1  ;;  %3807 = vmatprep.mubr.msk.bf16.mxu1 %vm4306_vm2, %v4304_v1 }
  0xc3   : >> { %3891 = vmatprep.subr.bf16.mxu0 %v4304_v1  ;;  %3921 = vmatprep.subr.bf16.mxu1 %v4304_v1 }
  0xc8   : >> { %3778 = vmatmul.mubr.msk.bf16.gmra.mxu0 %vm259_vm3, %v4404_v14  ;;  %3808 = vmatmul.mubr.msk.bf16.gmra.mxu1 %vm259_vm3, %v4499_v31 }
  0xc9   : >> { %3781 = vmatprep.mubr.msk.bf16.mxu0 %vm4306_vm2, %v4304_v1  ;;  %3811 = vmatprep.mubr.msk.bf16.mxu1 %vm4306_vm2, %v4304_v1 }
  0xd0   : >> { %3782 = vmatmul.mubr.msk.bf16.gmra.mxu0 %vm259_vm3, %v4417_v16  ;;  %3812 = vmatmul.mubr.msk.bf16.gmra.mxu1 %vm259_vm3, %v4513_v33 }
  0xd1   : >> { %3785 = vmatprep.mubr.msk.bf16.mxu0 %vm4306_vm2, %v4304_v1  ;;  %3815 = vmatprep.mubr.msk.bf16.mxu1 %vm4306_vm2, %v4304_v1 }
  0xd8   : >> { %v322_v49 = vpop.f32.mrf.mxu0  ;;  %v475_v50 = vpop.f32.mrf.mxu1  ;;  %3786 = vmatmul.mubr.msk.bf16.gmra.mxu0 %vm259_vm3, %v4428_v18  ;;  %3816 = vmatmul.mubr.msk.bf16.gmra.mxu1 %vm259_vm3, %v4527_v35 }
  0xd9   : >> { %v4692_v51 = vadd.f32 %v475_v50, %v322_v49  ;;  %3789 = vmatprep.mubr.msk.bf16.mxu0 %vm4306_vm2, %v4304_v1  ;;  %3819 = vmatprep.mubr.msk.bf16.mxu1 %vm4306_vm2, %v4304_v1  ;;  %v4735_v50 = vld [vmem:[%s4375_s30 + $0x118] sm:$0xff]  }
  0xda   : >> { %v3595_v52 = vpop.f32.mrf.mxu0  ;;  %v3625_v53 = vpop.f32.mrf.mxu1 }
  0xdc   : >> { %v325_v54 = vpop.f32.mrf.mxu0  ;;  %v478_v55 = vpop.f32.mrf.mxu1 }
  0xdd   : >> { %v4698_v56 = vadd.f32 %v478_v55, %v325_v54 }
  0xde   : >> { %v3596_v57 = vpop.f32.mrf.mxu0  ;;  %v3626_v58 = vpop.f32.mrf.mxu1 }
  0xe0   : >> { %v330_v59 = vpop.f32.mrf.mxu0  ;;  %v483_v60 = vpop.f32.mrf.mxu1  ;;  %3790 = vmatmul.mubr.msk.bf16.gmra.mxu0 %vm259_vm3, %v4439_v20  ;;  %3820 = vmatmul.mubr.msk.bf16.gmra.mxu1 %vm259_vm3, %v4541_v37 }
  0xe1   : >> { %v4704_v61 = vadd.f32 %v483_v60, %v330_v59  ;;  %3793 = vmatprep.mubr.msk.bf16.mxu0 %vm4306_vm2, %v4304_v1  ;;  %3823 = vmatprep.mubr.msk.bf16.mxu1 %vm4306_vm2, %v4304_v1 }
  0xe2   : >> { %v3599_v62 = vpop.f32.mrf.mxu0  ;;  %v3629_v63 = vpop.f32.mrf.mxu1 }
  0xe3   : >> { %v4754_v63 = vld [vmem:[%s4375_s30 + $0x120] sm:$0xff]  }
  0xe4   : >> { %v333_v0 = vpop.f32.mrf.mxu0  ;;  %v486_v2 = vpop.f32.mrf.mxu1 }
  0xe5   : >> { %v4710_v3 = vadd.f32 %v486_v2, %v333_v0 }
  0xe6   : >> { %v3600_v4 = vpop.f32.mrf.mxu0  ;;  %v3630_v5 = vpop.f32.mrf.mxu1 }
  0xe8   : >> { %v338_v6 = vpop.f32.mrf.mxu0  ;;  %v491_v9 = vpop.f32.mrf.mxu1  ;;  %3794 = vmatmul.mubr.msk.bf16.gmra.mxu0 %vm259_vm3, %v4450_v22  ;;  %3824 = vmatmul.mubr.msk.bf16.gmra.mxu1 %vm259_vm3, %v4555_v39 }
  0xe9   : >> { %v4716_v10 = vadd.f32 %v491_v9, %v338_v6  ;;  %3797 = vmatprep.mubr.msk.bf16.mxu0 %vm4306_vm2, %v4304_v1  ;;  %3827 = vmatprep.mubr.msk.bf16.mxu1 %vm4306_vm2, %v4304_v1 }
  0xea   : >> { %v3603_v11 = vpop.f32.mrf.mxu0  ;;  %v3633_v14 = vpop.f32.mrf.mxu1 }
  0xec   : >> { %v341_v15 = vpop.f32.mrf.mxu0  ;;  %v494_v16 = vpop.f32.mrf.mxu1 }
  0xed   : >> { %v4722_v17 = vadd.f32 %v494_v16, %v341_v15 }
  0xee   : >> { %v3604_v18 = vpop.f32.mrf.mxu0  ;;  %v3634_v19 = vpop.f32.mrf.mxu1 }
  0xef   : >> { %v4769_v18 = vld [vmem:[%s4375_s30 + $0x128] sm:$0xff]  }
  0xf0   : >> { %v346_v20 = vpop.f32.mrf.mxu0  ;;  %v499_v21 = vpop.f32.mrf.mxu1  ;;  %3798 = vmatmul.mubr.msk.bf16.gmra.mxu0 %vm259_vm3, %v4461_v24  ;;  %3828 = vmatmul.mubr.msk.bf16.gmra.mxu1 %vm259_vm3, %v4569_v41 }
  0xf1   : >> { %v4728_v22 = vadd.f32 %v499_v21, %v346_v20  ;;  %3833 = vmatprep.mubr.msk.bf16.mxu0 %vm4306_vm2, %v4304_v1  ;;  %3863 = vmatprep.mubr.msk.bf16.mxu1 %vm4306_vm2, %v4304_v1 }
  0xf2   : >> { %v3607_v23 = vpop.f32.mrf.mxu0  ;;  %v3637_v25 = vpop.f32.mrf.mxu1 }
  0xf4   : >> { %v349_v26 = vpop.f32.mrf.mxu0  ;;  %v502_v49 = vpop.f32.mrf.mxu1 }
  0xf5   : >> { %v4737_v52 = vadd.f32 %v502_v49, %v349_v26 }
  0xf6   : >> { %v3608_v24 = vpop.f32.mrf.mxu0  ;;  %v3638_v53 = vpop.f32.mrf.mxu1 }
  0xf8   : >> { %v354_v54 = vpop.f32.mrf.mxu0  ;;  %v507_v55 = vpop.f32.mrf.mxu1  ;;  %3834 = vmatmul.mubr.msk.bf16.vlgmr.msra.gmra.mxu0 %vm259_vm3, %v4580_v42  ;;  %3864 = vmatmul.mubr.msk.bf16.vlgmr.msra.gmra.mxu1 %vm259_vm3, %v4735_v50 }
  0xf9   : >> { %v4743_v57 = vadd.f32 %v507_v55, %v354_v54  ;;  %3892 = vmatpush3.bf16.msra.mxu0 %v4369_v7  ;;  %3922 = vmatpush3.bf16.msra.mxu1 %v4372_v8  ;;  %v4784_v55 = vld [vmem:[%s4375_s30 + $0x130] sm:$0xff]  }
  0xfa   : >> { %v3611_v58 = vpop.f32.mrf.mxu0  ;;  %v3641_v59 = vpop.f32.mrf.mxu1  ;;  %3837 = vmatprep.mubr.msk.bf16.mxu0 %vm4306_vm2, %v4304_v1  ;;  %3867 = vmatprep.mubr.msk.bf16.mxu1 %vm4306_vm2, %v4304_v1 }
  0xfb   : >> { %3951 = vmatprep.subr.bf16.mxu0 %v4304_v1  ;;  %3981 = vmatprep.subr.bf16.mxu1 %v4304_v1 }
  0xfc   : >> { %v357_v60 = vpop.f32.mrf.mxu0  ;;  %v510_v62 = vpop.f32.mrf.mxu1 }
  0xfd   : >> { %v4756_v0 = vadd.f32 %v510_v62, %v357_v60 }
  0xfe   : >> { %v3612_v2 = vpop.f32.mrf.mxu0  ;;  %v3642_v4 = vpop.f32.mrf.mxu1 }
 0x100   : >> { %v362_v5 = vpop.f32.mrf.mxu0  ;;  %v515_v6 = vpop.f32.mrf.mxu1  ;;  %3838 = vmatmul.mubr.msk.bf16.gmra.mxu0 %vm259_vm3, %v4595_v43  ;;  %3868 = vmatmul.mubr.msk.bf16.gmra.mxu1 %vm259_vm3, %v4754_v63 }
 0x101   : >> { %v4762_v9 = vadd.f32 %v515_v6, %v362_v5  ;;  %3841 = vmatprep.mubr.msk.bf16.mxu0 %vm4306_vm2, %v4304_v1  ;;  %3871 = vmatprep.mubr.msk.bf16.mxu1 %vm4306_vm2, %v4304_v1 }
 0x102   : >> { %v3615_v11 = vpop.f32.mrf.mxu0  ;;  %v3645_v14 = vpop.f32.mrf.mxu1 }
 0x104   : >> { %v365_v15 = vpop.f32.mrf.mxu0  ;;  %v518_v16 = vpop.f32.mrf.mxu1 }
 0x105   : >> { %v4771_v19 = vadd.f32 %v518_v16, %v365_v15  ;;  %v4800_v16 = vld [vmem:[%s4375_s30 + $0x138] sm:$0xff]  }
 0x106   : >> { %v3616_v20 = vpop.f32.mrf.mxu0  ;;  %v3646_v21 = vpop.f32.mrf.mxu1 }
 0x108   : >> { %v370_v23 = vpop.f32.mrf.mxu0  ;;  %v523_v25 = vpop.f32.mrf.mxu1  ;;  %3842 = vmatmul.mubr.msk.bf16.gmra.mxu0 %vm259_vm3, %v4606_v44  ;;  %3872 = vmatmul.mubr.msk.bf16.gmra.mxu1 %vm259_vm3, %v4769_v18 }
 0x109   : >> { %v4777_v26 = vadd.f32 %v523_v25, %v370_v23  ;;  %3845 = vmatprep.mubr.msk.bf16.mxu0 %vm4306_vm2, %v4304_v1  ;;  %3875 = vmatprep.mubr.msk.bf16.mxu1 %vm4306_vm2, %v4304_v1 }
 0x10a   : >> { %v3619_v49 = vpop.f32.mrf.mxu0  ;;  %v3649_v24 = vpop.f32.mrf.mxu1 }
 0x10c   : >> { %v373_v53 = vpop.f32.mrf.mxu0  ;;  %v526_v54 = vpop.f32.mrf.mxu1 }
 0x10d   : >> { %v4786_v58 = vadd.f32 %v526_v54, %v373_v53 }
 0x10e   : >> { %v3620_v59 = vpop.f32.mrf.mxu0  ;;  %v3650_v60 = vpop.f32.mrf.mxu1 }
 0x110   : >> { %v649_v62 = vpop.f32.mrf.mxu0  ;;  %v837_v2 = vpop.f32.mrf.mxu1  ;;  %3846 = vmatmul.mubr.msk.bf16.gmra.mxu0 %vm259_vm3, %v4617_v45  ;;  %3876 = vmatmul.mubr.msk.bf16.gmra.mxu1 %vm259_vm3, %v4784_v55 }
 0x111   : >> { %v704_v4 = vadd.f32 %v649_v62, %v4692_v51  ;;  %3849 = vmatprep.mubr.msk.bf16.mxu0 %vm4306_vm2, %v4304_v1  ;;  %3879 = vmatprep.mubr.msk.bf16.mxu1 %vm4306_vm2, %v4304_v1  ;;  %v4817_v62 = vld [vmem:[%s4375_s30 + $0x140] sm:$0xff]  }
 0x112   : >> { %v3655_v5 = vpop.f32.mrf.mxu0  ;;  %v3685_v6 = vpop.f32.mrf.mxu1 }
 0x113   : >> { %v4797_v11 = vadd.f32 %v837_v2, %v704_v4 }
 0x114   : >> { %v652_v14 = vpop.f32.mrf.mxu0  ;;  %v840_v15 = vpop.f32.mrf.mxu1 }
 0x115   : >> { %v705_v20 = vadd.f32 %v652_v14, %v4698_v56 }
 0x116   : >> { %v3656_v21 = vpop.f32.mrf.mxu0  ;;  %v3686_v23 = vpop.f32.mrf.mxu1 }
 0x117   : >> { %v4803_v51 = vadd.f32 %v840_v15, %v705_v20 }
 0x118   : >> { %v657_v25 = vpop.f32.mrf.mxu0  ;;  %v845_v49 = vpop.f32.mrf.mxu1  ;;  %3850 = vmatmul.mubr.msk.bf16.gmra.mxu0 %vm259_vm3, %v4628_v46  ;;  %3880 = vmatmul.mubr.msk.bf16.gmra.mxu1 %vm259_vm3, %v4800_v16 }
 0x119   : >> { %v706_v24 = vadd.f32 %v657_v25, %v4704_v61  ;;  %3853 = vmatprep.mubr.msk.bf16.mxu0 %vm4306_vm2, %v4304_v1  ;;  %3883 = vmatprep.mubr.msk.bf16.mxu1 %vm4306_vm2, %v4304_v1 }
 0x11a   : >> { %v3659_v56 = vpop.f32.mrf.mxu0  ;;  %v3689_v53 = vpop.f32.mrf.mxu1 }
 0x11b   : >> { %v4814_v54 = vadd.f32 %v845_v49, %v706_v24  ;;  %v4834_v49 = vld [vmem:[%s4375_s30 + $0x148] sm:$0xff]  }
 0x11c   : >> { %v660_v59 = vpop.f32.mrf.mxu0  ;;  %v848_v60 = vpop.f32.mrf.mxu1 }
 0x11d   : >> { %v707_v2 = vadd.f32 %v660_v59, %v4710_v3 }
 0x11e   : >> { %v3660_v4 = vpop.f32.mrf.mxu0  ;;  %v3690_v5 = vpop.f32.mrf.mxu1 }
 0x11f   : >> { %v4820_v61 = vadd.f32 %v848_v60, %v707_v2 }
 0x120   : >> { %v665_v6 = vpop.f32.mrf.mxu0  ;;  %v853_v14 = vpop.f32.mrf.mxu1  ;;  %3854 = vmatmul.mubr.msk.bf16.gmra.mxu0 %vm259_vm3, %v4639_v47  ;;  %3884 = vmatmul.mubr.msk.bf16.gmra.mxu1 %vm259_vm3, %v4817_v62 }
 0x121   : >> { %v708_v15 = vadd.f32 %v665_v6, %v4716_v10  ;;  %3857 = vmatprep.mubr.msk.bf16.mxu0 %vm4306_vm2, %v4304_v1  ;;  %3887 = vmatprep.mubr.msk.bf16.mxu1 %vm4306_vm2, %v4304_v1 }
 0x122   : >> { %v3663_v3 = vpop.f32.mrf.mxu0  ;;  %v3693_v20 = vpop.f32.mrf.mxu1 }
 0x123   : >> { %v4831_v21 = vadd.f32 %v853_v14, %v708_v15 }
 0x124   : >> { %v668_v23 = vpop.f32.mrf.mxu0  ;;  %v856_v25 = vpop.f32.mrf.mxu1 }
 0x125   : >> { %v709_v24 = vadd.f32 %v668_v23, %v4722_v17 }
 0x126   : >> { %v3664_v56 = vpop.f32.mrf.mxu0  ;;  %v3694_v53 = vpop.f32.mrf.mxu1 }
 0x127   : >> { %v4837_v59 = vadd.f32 %v856_v25, %v709_v24 }
 0x128   : >> { %v673_v10 = vpop.f32.mrf.mxu0  ;;  %v861_v60 = vpop.f32.mrf.mxu1  ;;  %3858 = vmatmul.mubr.msk.bf16.gmra.mxu0 %vm259_vm3, %v4650_v48  ;;  %3888 = vmatmul.mubr.msk.bf16.gmra.mxu1 %vm259_vm3, %v4834_v49 }
 0x129   : >> { %v710_v2 = vadd.f32 %v673_v10, %v4728_v22  ;;  %3893 = vmatprep.mubr.msk.bf16.mxu0 %vm4306_vm2, %v4304_v1  ;;  %3923 = vmatprep.mubr.msk.bf16.mxu1 %vm4306_vm2, %v4304_v1 }
 0x12a   : >> { %v3667_v17 = vpop.f32.mrf.mxu0  ;;  %v3697_v4 = vpop.f32.mrf.mxu1 }
 0x12b   : >> { %v4848_v5 = vadd.f32 %v861_v60, %v710_v2 }
 0x12c   : >> { %v676_v6 = vpop.f32.mrf.mxu0  ;;  %v864_v14 = vpop.f32.mrf.mxu1 }
 0x12d   : >> { %v711_v15 = vadd.f32 %v676_v6, %v4737_v52 }
 0x12e   : >> { %v3668_v3 = vpop.f32.mrf.mxu0  ;;  %v3698_v20 = vpop.f32.mrf.mxu1 }
 0x12f   : >> { %v4851_v23 = vadd.f32 %v864_v14, %v711_v15 }
 0x130   : >> { %v681_v25 = vpop.f32.mrf.mxu0  ;;  %v869_v22 = vpop.f32.mrf.mxu1  ;;  %3894 = vmatmul.mubr.msk.bf16.vlgmr.msra.gmra.mxu0 %vm259_vm3, %v4478_v28  ;;  %3924 = vmatmul.mubr.msk.bf16.vlgmr.msra.gmra.mxu1 %vm259_vm3, %v4475_v27 }
 0x131   : >> { %v712_v24 = vadd.f32 %v681_v25, %v4743_v57  ;;  %3952 = vmatpush3.bf16.msra.mxu0 %v4387_v12  ;;  %3982 = vmatpush3.bf16.msra.mxu1 %v4390_v13 }
 0x132   : >> { %v3671_v56 = vpop.f32.mrf.mxu0  ;;  %v3701_v52 = vpop.f32.mrf.mxu1  ;;  %3897 = vmatprep.mubr.msk.bf16.mxu0 %vm4306_vm2, %v4304_v1  ;;  %3927 = vmatprep.mubr.msk.bf16.mxu1 %vm4306_vm2, %v4304_v1 }
 0x133   : >> { %v4864_v53 = vadd.f32 %v869_v22, %v712_v24  ;;  %4011 = vmatprep.subr.bf16.mxu0 %v4304_v1  ;;  %4041 = vmatprep.subr.bf16.mxu1 %v4304_v1 }
 0x134   : >> { %v684_v27 = vpop.f32.mrf.mxu0  ;;  %v872_v28 = vpop.f32.mrf.mxu1 }
 0x135   : >> { %v713_v57 = vadd.f32 %v684_v27, %v4756_v0 }
 0x136   : >> { %v3672_v10 = vpop.f32.mrf.mxu0  ;;  %v3702_v60 = vpop.f32.mrf.mxu1 }
 0x137   : >> { %v4869_v2 = vadd.f32 %v872_v28, %v713_v57 }
 0x138   : >> { %v689_v17 = vpop.f32.mrf.mxu0  ;;  %v877_v4 = vpop.f32.mrf.mxu1  ;;  %3898 = vmatmul.mubr.msk.bf16.gmra.mxu0 %vm259_vm3, %v4499_v31  ;;  %3928 = vmatmul.mubr.msk.bf16.gmra.mxu1 %vm259_vm3, %v4496_v30 }
 0x139   : >> { %v714_v6 = vadd.f32 %v689_v17, %v4762_v9  ;;  %3901 = vmatprep.mubr.msk.bf16.mxu0 %vm4306_vm2, %v4304_v1  ;;  %3931 = vmatprep.mubr.msk.bf16.mxu1 %vm4306_vm2, %v4304_v1 }
 0x13a   : >> { %v3675_v0 = vpop.f32.mrf.mxu0  ;;  %v3705_v14 = vpop.f32.mrf.mxu1 }
 0x13b   : >> { %v4880_v15 = vadd.f32 %v877_v4, %v714_v6 }
 0x13c   : >> { %v692_v3 = vpop.f32.mrf.mxu0  ;;  %v880_v20 = vpop.f32.mrf.mxu1 }
 0x13d   : >> { %v715_v25 = vadd.f32 %v692_v3, %v4771_v19 }
 0x13e   : >> { %v3676_v31 = vpop.f32.mrf.mxu0  ;;  %v3706_v22 = vpop.f32.mrf.mxu1 }
 0x13f   : >> { %v4883_v24 = vadd.f32 %v880_v20, %v715_v25 }
 0x140   : >> { %v697_v30 = vpop.f32.mrf.mxu0  ;;  %v885_v9 = vpop.f32.mrf.mxu1  ;;  %3902 = vmatmul.mubr.msk.bf16.gmra.mxu0 %vm259_vm3, %v4513_v33  ;;  %3932 = vmatmul.mubr.msk.bf16.gmra.mxu1 %vm259_vm3, %v4510_v32 }
 0x141   : >> { %v716_v56 = vadd.f32 %v697_v30, %v4777_v26  ;;  %3905 = vmatprep.mubr.msk.bf16.mxu0 %vm4306_vm2, %v4304_v1  ;;  %3935 = vmatprep.mubr.msk.bf16.mxu1 %vm4306_vm2, %v4304_v1 }
 0x142   : >> { %v3679_v19 = vpop.f32.mrf.mxu0  ;;  %v3709_v52 = vpop.f32.mrf.mxu1 }
 0x143   : >> { %v4894_v27 = vadd.f32 %v885_v9, %v716_v56 }
 0x144   : >> { %v700_v28 = vpop.f32.mrf.mxu0  ;;  %v888_v57 = vpop.f32.mrf.mxu1 }
 0x145   : >> { %v717_v10 = vadd.f32 %v700_v28, %v4786_v58 }
 0x146   : >> { %v3680_v33 = vpop.f32.mrf.mxu0  ;;  %v3710_v60 = vpop.f32.mrf.mxu1 }
 0x147   : >> { %v4897_v17 = vadd.f32 %v888_v57, %v717_v10 }
 0x148   : >> { %v1025_v32 = vpop.f32.mrf.mxu0  ;;  %v4899_v26 = vpop.f32.mrf.mxu1  ;;  %3906 = vmatmul.mubr.msk.bf16.gmra.mxu0 %vm259_vm3, %v4527_v35  ;;  %3936 = vmatmul.mubr.msk.bf16.gmra.mxu1 %vm259_vm3, %v4524_v34 }
 0x149   : >> { %v4906_v4 = vadd.f32 %v1025_v32, %v4797_v11  ;;  %3909 = vmatprep.mubr.msk.bf16.mxu0 %vm4306_vm2, %v4304_v1  ;;  %3939 = vmatprep.mubr.msk.bf16.mxu1 %vm4306_vm2, %v4304_v1 }
 0x14a   : >> { %v3715_v58 = vpop.f32.mrf.mxu0  ;;  %v3745_v6 = vpop.f32.mrf.mxu1 }
 0x14c   : >> { %v1028_v0 = vpop.f32.mrf.mxu0  ;;  %v4912_v14 = vpop.f32.mrf.mxu1 }
 0x14d   : >> { %v4915_v3 = vadd.f32 %v1028_v0, %v4803_v51 }
 0x14e   : >> { %v3716_v35 = vpop.f32.mrf.mxu0  ;;  %v3746_v20 = vpop.f32.mrf.mxu1 }
 0x150   : >> { %v1033_v34 = vpop.f32.mrf.mxu0  ;;  %v4917_v25 = vpop.f32.mrf.mxu1  ;;  %3910 = vmatmul.mubr.msk.bf16.gmra.mxu0 %vm259_vm3, %v4541_v37  ;;  %3940 = vmatmul.mubr.msk.bf16.gmra.mxu1 %vm259_vm3, %v4538_v36 }
 0x151   : >> { %v4924_v11 = vadd.f32 %v1033_v34, %v4814_v54  ;;  %3913 = vmatprep.mubr.msk.bf16.mxu0 %vm4306_vm2, %v4304_v1  ;;  %3943 = vmatprep.mubr.msk.bf16.mxu1 %vm4306_vm2, %v4304_v1 }
 0x152   : >> { %v3719_v51 = vpop.f32.mrf.mxu0  ;;  %v3749_v31 = vpop.f32.mrf.mxu1 }
 0x154   : >> { %v1036_v22 = vpop.f32.mrf.mxu0  ;;  %v4930_v30 = vpop.f32.mrf.mxu1 }
 0x155   : >> { %v4933_v9 = vadd.f32 %v1036_v22, %v4820_v61 }
 0x156   : >> { %v3720_v37 = vpop.f32.mrf.mxu0  ;;  %v3750_v56 = vpop.f32.mrf.mxu1 }
 0x158   : >> { %v1041_v36 = vpop.f32.mrf.mxu0  ;;  %v4935_v19 = vpop.f32.mrf.mxu1  ;;  %3914 = vmatmul.mubr.msk.bf16.gmra.mxu0 %vm259_vm3, %v4555_v39  ;;  %3944 = vmatmul.mubr.msk.bf16.gmra.mxu1 %vm259_vm3, %v4552_v38 }
 0x159   : >> { %v4942_v54 = vadd.f32 %v1041_v36, %v4831_v21  ;;  %3917 = vmatprep.mubr.msk.bf16.mxu0 %vm4306_vm2, %v4304_v1  ;;  %3947 = vmatprep.mubr.msk.bf16.mxu1 %vm4306_vm2, %v4304_v1 }
 0x15a   : >> { %v3723_v61 = vpop.f32.mrf.mxu0  ;;  %v3753_v52 = vpop.f32.mrf.mxu1 }
 0x15c   : >> { %v1044_v28 = vpop.f32.mrf.mxu0  ;;  %v4948_v57 = vpop.f32.mrf.mxu1 }
 0x15d   : >> { %v4951_v10 = vadd.f32 %v1044_v28, %v4837_v59 }
 0x15e   : >> { %v3724_v39 = vpop.f32.mrf.mxu0  ;;  %v3754_v33 = vpop.f32.mrf.mxu1 }
 0x160   : >> { %v1049_v38 = vpop.f32.mrf.mxu0  ;;  %v4953_v60 = vpop.f32.mrf.mxu1  ;;  %3918 = vmatmul.mubr.msk.bf16.gmra.mxu0 %vm259_vm3, %v4569_v41  ;;  %3948 = vmatmul.mubr.msk.bf16.gmra.mxu1 %vm259_vm3, %v4566_v40 }
 0x161   : >> { %v4960_v21 = vadd.f32 %v1049_v38, %v4848_v5  ;;  %3953 = vmatprep.mubr.msk.bf16.mxu0 %vm4306_vm2, %v4304_v1  ;;  %3983 = vmatprep.mubr.msk.bf16.mxu1 %vm4306_vm2, %v4304_v1 }
 0x162   : >> { %v3727_v59 = vpop.f32.mrf.mxu0  ;;  %v3757_v32 = vpop.f32.mrf.mxu1 }
 0x164   : >> { %v1052_v58 = vpop.f32.mrf.mxu0  ;;  %v4966_v6 = vpop.f32.mrf.mxu1 }
 0x165   : >> { %v4969_v0 = vadd.f32 %v1052_v58, %v4851_v23 }
 0x166   : >> { %v3728_v41 = vpop.f32.mrf.mxu0  ;;  %v3758_v35 = vpop.f32.mrf.mxu1 }
 0x168   : >> { %v1057_v40 = vpop.f32.mrf.mxu0  ;;  %v4971_v20 = vpop.f32.mrf.mxu1  ;;  %3954 = vmatmul.mubr.msk.bf16.vlgmr.msra.gmra.mxu0 %vm259_vm3, %v4580_v42  ;;  %3984 = vmatmul.mubr.msk.bf16.vlgmr.msra.gmra.mxu1 %vm259_vm3, %v4735_v50 }
 0x169   : >> { %v4978_v5 = vadd.f32 %v1057_v40, %v4864_v53  ;;  %4012 = vmatpush3.bf16.msra.mxu0 %v4481_v29  ;;  %4042 = vmatpush3.bf16.msra.mxu1 %v4369_v7 }
 0x16a   : >> { %v3731_v23 = vpop.f32.mrf.mxu0  ;;  %v3761_v34 = vpop.f32.mrf.mxu1  ;;  %3957 = vmatprep.mubr.msk.bf16.mxu0 %vm4306_vm2, %v4304_v1  ;;  %3987 = vmatprep.mubr.msk.bf16.mxu1 %vm4306_vm2, %v4304_v1 }
 0x16b   : >> { %4071 = vmatprep.subr.bf16.mxu0 %v4304_v1  ;;  %4101 = vmatprep.subr.bf16.mxu1 %v4304_v1 }
 0x16c   : >> { %v1060_v51 = vpop.f32.mrf.mxu0  ;;  %v4988_v31 = vpop.f32.mrf.mxu1 }
 0x16d   : >> { %v4991_v53 = vadd.f32 %v1060_v51, %v4869_v2 }
 0x16e   : >> { %v3732_v22 = vpop.f32.mrf.mxu0  ;;  %v3762_v7 = vpop.f32.mrf.mxu1 }
 0x170   : >> { %v1065_v37 = vpop.f32.mrf.mxu0  ;;  %v4993_v56 = vpop.f32.mrf.mxu1  ;;  %3958 = vmatmul.mubr.msk.bf16.gmra.mxu0 %vm259_vm3, %v4595_v43  ;;  %3988 = vmatmul.mubr.msk.bf16.gmra.mxu1 %vm259_vm3, %v4754_v63 }
 0x171   : >> { %v5000_v36 = vadd.f32 %v1065_v37, %v4880_v15  ;;  %3961 = vmatprep.mubr.msk.bf16.mxu0 %vm4306_vm2, %v4304_v1  ;;  %3991 = vmatprep.mubr.msk.bf16.mxu1 %vm4306_vm2, %v4304_v1 }
 0x172   : >> { %v3735_v2 = vpop.f32.mrf.mxu0  ;;  %v3765_v61 = vpop.f32.mrf.mxu1 }
 0x174   : >> { %v1068_v52 = vpop.f32.mrf.mxu0  ;;  %v5006_v28 = vpop.f32.mrf.mxu1 }
 0x175   : >> { %v5009_v39 = vadd.f32 %v1068_v52, %v4883_v24 }
 0x176   : >> { %v3736_v33 = vpop.f32.mrf.mxu0  ;;  %v3766_v38 = vpop.f32.mrf.mxu1 }
 0x178   : >> { %v1073_v59 = vpop.f32.mrf.mxu0  ;;  %v5011_v32 = vpop.f32.mrf.mxu1  ;;  %3962 = vmatmul.mubr.msk.bf16.gmra.mxu0 %vm259_vm3, %v4606_v44  ;;  %3992 = vmatmul.mubr.msk.bf16.gmra.mxu1 %vm259_vm3, %v4769_v18 }
 0x179   : >> { %v5018_v15 = vadd.f32 %v1073_v59, %v4894_v27  ;;  %3965 = vmatprep.mubr.msk.bf16.mxu0 %vm4306_vm2, %v4304_v1  ;;  %3995 = vmatprep.mubr.msk.bf16.mxu1 %vm4306_vm2, %v4304_v1 }
 0x17a   : >> { %v3739_v24 = vpop.f32.mrf.mxu0  ;;  %v3769_v58 = vpop.f32.mrf.mxu1 }
 0x17c   : >> { %v1076_v41 = vpop.f32.mrf.mxu0  ;;  %v5024_v35 = vpop.f32.mrf.mxu1 }
 0x17d   : >> { %v5027_v40 = vadd.f32 %v1076_v41, %v4897_v17 }
 0x17e   : >> { %v3740_v23 = vpop.f32.mrf.mxu0  ;;  %v3770_v34 = vpop.f32.mrf.mxu1 }
 0x180   : >> { %v1252_v18 = vpop.f32.mrf.mxu0  ;;  %v1341_v51 = vpop.f32.mrf.mxu1  ;;  %3966 = vmatmul.mubr.msk.bf16.gmra.mxu0 %vm259_vm3, %v4617_v45  ;;  %3996 = vmatmul.mubr.msk.bf16.gmra.mxu1 %vm259_vm3, %v4784_v55 }
 0x181   : >> { %v1253_v27 = vadd.f32 %v1252_v18, %v4899_v26  ;;  %3969 = vmatprep.mubr.msk.bf16.mxu0 %vm4306_vm2, %v4304_v1  ;;  %3999 = vmatprep.mubr.msk.bf16.mxu1 %vm4306_vm2, %v4304_v1 }
 0x182   : >> { %v3775_v17 = vpop.f32.mrf.mxu0  ;;  %v3805_v22 = vpop.f32.mrf.mxu1 }
 0x183   : >> { %v5038_v7 = vadd.f32 %v1341_v51, %v1253_v27 }
 0x184   : >> { %v1255_v37 = vpop.f32.mrf.mxu0  ;;  %v1344_v2 = vpop.f32.mrf.mxu1 }
 0x185   : >> { %v1256_v61 = vadd.f32 %v1255_v37, %v4912_v14 }
 0x186   : >> { %v3776_v52 = vpop.f32.mrf.mxu0  ;;  %v3806_v33 = vpop.f32.mrf.mxu1 }
 0x187   : >> { %v5041_v38 = vadd.f32 %v1344_v2, %v1256_v61 }
 0x188   : >> { %v1260_v55 = vpop.f32.mrf.mxu0  ;;  %v1349_v26 = vpop.f32.mrf.mxu1  ;;  %3970 = vmatmul.mubr.msk.bf16.gmra.mxu0 %vm259_vm3, %v4628_v46  ;;  %4000 = vmatmul.mubr.msk.bf16.gmra.mxu1 %vm259_vm3, %v4800_v16 }
 0x189   : >> { %v1261_v59 = vadd.f32 %v1260_v55, %v4917_v25  ;;  %3973 = vmatprep.mubr.msk.bf16.mxu0 %vm4306_vm2, %v4304_v1  ;;  %4003 = vmatprep.mubr.msk.bf16.mxu1 %vm4306_vm2, %v4304_v1 }
 0x18a   : >> { %v3779_v14 = vpop.f32.mrf.mxu0  ;;  %v3809_v24 = vpop.f32.mrf.mxu1 }
 0x18b   : >> { %v5052_v58 = vadd.f32 %v1349_v26, %v1261_v59 }
 0x18c   : >> { %v1263_v41 = vpop.f32.mrf.mxu0  ;;  %v1352_v23 = vpop.f32.mrf.mxu1 }
 0x18d   : >> { %v1264_v34 = vadd.f32 %v1263_v41, %v4930_v30 }
 0x18e   : >> { %v3780_v18 = vpop.f32.mrf.mxu0  ;;  %v3810_v51 = vpop.f32.mrf.mxu1 }
 0x18f   : >> { %v5055_v27 = vadd.f32 %v1352_v23, %v1264_v34  ;;  %v5083_v23 = vld [vmem:[%s4375_s30 + $0x150] sm:$0xff]  }
 0x190   : >> { %v1268_v16 = vpop.f32.mrf.mxu0  ;;  %v1357_v25 = vpop.f32.mrf.mxu1  ;;  %3974 = vmatmul.mubr.msk.bf16.gmra.mxu0 %vm259_vm3, %v4639_v47  ;;  %4004 = vmatmul.mubr.msk.bf16.gmra.mxu1 %vm259_vm3, %v4817_v62 }
 0x191   : >> { %v1269_v17 = vadd.f32 %v1268_v16, %v4935_v19  ;;  %3977 = vmatprep.mubr.msk.bf16.mxu0 %vm4306_vm2, %v4304_v1  ;;  %4007 = vmatprep.mubr.msk.bf16.mxu1 %vm4306_vm2, %v4304_v1 }
 0x192   : >> { %v3783_v30 = vpop.f32.mrf.mxu0  ;;  %v3813_v22 = vpop.f32.mrf.mxu1 }
 0x193   : >> { %v5066_v37 = vadd.f32 %v1357_v25, %v1269_v17  ;;  %v5104_v30 = vld [vmem:[%s4375_s30 + $0x158] sm:$0xff]  }
 0x194   : >> { %v1271_v2 = vpop.f32.mrf.mxu0  ;;  %v1360_v61 = vpop.f32.mrf.mxu1 }
 0x195   : >> { %v1272_v52 = vadd.f32 %v1271_v2, %v4948_v57 }
 0x196   : >> { %v3784_v47 = vpop.f32.mrf.mxu0  ;;  %v3814_v33 = vpop.f32.mrf.mxu1 }
 0x197   : >> { %v5069_v62 = vadd.f32 %v1360_v61, %v1272_v52 }
 0x198   : >> { %v1276_v19 = vpop.f32.mrf.mxu0  ;;  %v1365_v55 = vpop.f32.mrf.mxu1  ;;  %3978 = vmatmul.mubr.msk.bf16.gmra.mxu0 %vm259_vm3, %v4650_v48  ;;  %4008 = vmatmul.mubr.msk.bf16.gmra.mxu1 %vm259_vm3, %v4834_v49 }
 0x199   : >> { %v1277_v26 = vadd.f32 %v1276_v19, %v4953_v60  ;;  %4013 = vmatprep.mubr.msk.bf16.mxu0 %vm4306_vm2, %v4304_v1  ;;  %4043 = vmatprep.mubr.msk.bf16.mxu1 %vm4306_vm2, %v4304_v1 }
 0x19a   : >> { %v3787_v57 = vpop.f32.mrf.mxu0  ;;  %v3817_v59 = vpop.f32.mrf.mxu1 }
 0x19b   : >> { %v5080_v14 = vadd.f32 %v1365_v55, %v1277_v26  ;;  %v5121_v57 = vld [vmem:[%s4375_s30 + $0x160] sm:$0xff]  }
 0x19c   : >> { %v1279_v24 = vpop.f32.mrf.mxu0  ;;  %v1368_v41 = vpop.f32.mrf.mxu1 }
 0x19d   : >> { %v1280_v48 = vadd.f32 %v1279_v24, %v4966_v6 }
 0x19e   : >> { %v3788_v34 = vpop.f32.mrf.mxu0  ;;  %v3818_v49 = vpop.f32.mrf.mxu1 }
 0x19f   : >> { %v5086_v18 = vadd.f32 %v1368_v41, %v1280_v48 }
 0x1a0   : >> { %v1284_v60 = vpop.f32.mrf.mxu0  ;;  %v1373_v51 = vpop.f32.mrf.mxu1  ;;  %4014 = vmatmul.mubr.msk.bf16.vlgmr.msra.gmra.mxu0 %vm259_vm3, %v5083_v23  ;;  %4044 = vmatmul.mubr.msk.bf16.vlgmr.msra.gmra.mxu1 %vm259_vm3, %v4580_v42 }
 0x1a1   : >> { %v1285_v16 = vadd.f32 %v1284_v60, %v4971_v20  ;;  %4072 = vmatpush3.bf16.msra.mxu0 %v4372_v8  ;;  %4102 = vmatpush3.bf16.msra.mxu1 %v4387_v12 }
 0x1a2   : >> { %v3791_v6 = vpop.f32.mrf.mxu0  ;;  %v3821_v25 = vpop.f32.mrf.mxu1  ;;  %4017 = vmatprep.mubr.msk.bf16.mxu0 %vm4306_vm2, %v4304_v1  ;;  %4047 = vmatprep.mubr.msk.bf16.mxu1 %vm4306_vm2, %v4304_v1 }
 0x1a3   : >> { %v5099_v17 = vadd.f32 %v1373_v51, %v1285_v16  ;;  %4131 = vmatprep.subr.bf16.mxu0 %v4304_v1  ;;  %4161 = vmatprep.subr.bf16.mxu1 %v4304_v1  ;;  %v5138_v6 = vld [vmem:[%s4375_s30 + $0x168] sm:$0xff]  }
 0x1a4   : >> { %v1287_v42 = vpop.f32.mrf.mxu0  ;;  %v1376_v20 = vpop.f32.mrf.mxu1 }
 0x1a5   : >> { %v1288_v8 = vadd.f32 %v1287_v42, %v4988_v31 }
 0x1a6   : >> { %v3792_v12 = vpop.f32.mrf.mxu0  ;;  %v3822_v22 = vpop.f32.mrf.mxu1 }
 0x1a7   : >> { %v5107_v2 = vadd.f32 %v1376_v20, %v1288_v8  ;;  %v5146_v20 = vld [vmem:[%s5700_s2] ss:$0 sm:$0xff] }
 0x1a8   : >> { %v1292_v61 = vpop.f32.mrf.mxu0  ;;  %v1381_v52 = vpop.f32.mrf.mxu1  ;;  %4018 = vmatmul.mubr.msk.bf16.gmra.mxu0 %vm259_vm3, %v5104_v30  ;;  %4048 = vmatmul.mubr.msk.bf16.gmra.mxu1 %vm259_vm3, %v4595_v43 }
 0x1a9   : >> { %v1293_v47 = vadd.f32 %v1292_v61, %v4993_v56  ;;  %4021 = vmatprep.mubr.msk.bf16.mxu0 %vm4306_vm2, %v4304_v1  ;;  %4051 = vmatprep.mubr.msk.bf16.mxu1 %vm4306_vm2, %v4304_v1 }
 0x1aa   : >> { %v3795_v31 = vpop.f32.mrf.mxu0  ;;  %v3825_v33 = vpop.f32.mrf.mxu1 }
 0x1ab   : >> { %v5118_v19 = vadd.f32 %v1381_v52, %v1293_v47  ;;  %v1101_v52 = vadd.f32 %v5146_v20, %v4906_v4 }
 0x1ac   : >> { %v1295_v55 = vpop.f32.mrf.mxu0  ;;  %v1384_v26 = vpop.f32.mrf.mxu1 }
 0x1ad   : >> { %v1296_v59 = vadd.f32 %v1295_v55, %v5006_v28  ;;  %v5160_v55 = vld [vmem:[%s4375_s30 + $0x170] sm:$0xff]  }
 0x1ae   : >> { %v3796_v43 = vpop.f32.mrf.mxu0  ;;  %v3826_v24 = vpop.f32.mrf.mxu1 }
 0x1af   : >> { %v5124_v56 = vadd.f32 %v1384_v26, %v1296_v59  ;;  %v1115_v43 = vmax.f32 %v1101_v52, 0.0  ;;  %v1102_v24 = vadd.f32 %v5146_v20, %v4915_v3 }
 0x1b0   : >> { %v1300_v41 = vpop.f32.mrf.mxu0  ;;  %v1389_v48 = vpop.f32.mrf.mxu1  ;;  %4022 = vmatmul.mubr.msk.bf16.gmra.mxu0 %vm259_vm3, %v5121_v57  ;;  %4052 = vmatmul.mubr.msk.bf16.gmra.mxu1 %vm259_vm3, %v4606_v44 }
 0x1b1   : >> { %v1301_v34 = vadd.f32 %v1300_v41, %v5011_v32  ;;  %4025 = vmatprep.mubr.msk.bf16.mxu0 %vm4306_vm2, %v4304_v1  ;;  %4055 = vmatprep.mubr.msk.bf16.mxu1 %vm4306_vm2, %v4304_v1 }
 0x1b2   : >> { %v3799_v28 = vpop.f32.mrf.mxu0  ;;  %v3829_v49 = vpop.f32.mrf.mxu1 }
 0x1b3   : >> { %v5135_v60 = vadd.f32 %v1389_v48, %v1301_v34 }
 0x1b4   : >> { %v1303_v51 = vpop.f32.mrf.mxu0  ;;  %v1392_v16 = vpop.f32.mrf.mxu1 }
 0x1b5   : >> { %v1304_v25 = vadd.f32 %v1303_v51, %v5024_v35 }
 0x1b6   : >> { %v3800_v42 = vpop.f32.mrf.mxu0  ;;  %v3830_v44 = vpop.f32.mrf.mxu1 }
 0x1b7   : >> { %v5141_v32 = vadd.f32 %v1392_v16, %v1304_v25  ;;  %v1116_v16 = vmax.f32 %v1102_v24, 0.0  ;;  %v1103_v25 = vadd.f32 %v5146_v20, %v4924_v11 }
 0x1b8   : >> { %v1444_v8 = vpop.f32.mrf.mxu0  ;;  %v1621_v12 = vpop.f32.mrf.mxu1  ;;  %4026 = vmatmul.mubr.msk.bf16.gmra.mxu0 %vm259_vm3, %v5138_v6  ;;  %4056 = vmatmul.mubr.msk.bf16.gmra.mxu1 %vm259_vm3, %v4617_v45 }
 0x1b9   : >> { %v1499_v35 = vadd.f32 %v1444_v8, %v5038_v7  ;;  %4029 = vmatprep.mubr.msk.bf16.mxu0 %vm4306_vm2, %v4304_v1  ;;  %4059 = vmatprep.mubr.msk.bf16.mxu1 %vm4306_vm2, %v4304_v1 }
 0x1ba   : >> { %v3835_v22 = vpop.f32.mrf.mxu0  ;;  %v3865_v61 = vpop.f32.mrf.mxu1 }
 0x1bb   : >> { %v1676_v47 = vadd.f32 %v1621_v12, %v1499_v35  ;;  %v5181_v12 = vld [vmem:[%s4375_s30 + $0x178] sm:$0xff]  }
 0x1bc   : >> { %v1447_v31 = vpop.f32.mrf.mxu0  ;;  %v1624_v33 = vpop.f32.mrf.mxu1 }
 0x1bd   : >> { %v1690_v45 = vadd.f32 %v5146_v20, %v1676_v47  ;;  %v1500_v7 = vadd.f32 %v1447_v31, %v5041_v38  ;;  %v1117_v47 = vmax.f32 %v1103_v25, 0.0  ;;  %v1104_v31 = vadd.f32 %v5146_v20, %v4933_v9 }
 0x1be   : >> { %v3836_v26 = vpop.f32.mrf.mxu0  ;;  %v3866_v59 = vpop.f32.mrf.mxu1 }
 0x1bf   : >> { %v1704_v41 = vmax.f32 %v1690_v45, 0.0  ;;  %v1677_v48 = vadd.f32 %v1624_v33, %v1500_v7  ;;  %v4273_v26 = vld [vmem:[%s4375_s30 + $0x108] sm:$0xff]  }
 0x1c0   : >> { %v1452_v34 = vpop.f32.mrf.mxu0  ;;  %v1629_v28 = vpop.f32.mrf.mxu1  ;;  %4030 = vmatmul.mubr.msk.bf16.gmra.mxu0 %vm259_vm3, %v5160_v55  ;;  %4060 = vmatmul.mubr.msk.bf16.gmra.mxu1 %vm259_vm3, %v4628_v46 }
 0x1c1   : >> { %v5170_v4 = vmax.f32 %v1115_v43, %v1704_v41  ;;  %v1691_v38 = vadd.f32 %v5146_v20, %v1677_v48  ;;  %v1501_v49 = vadd.f32 %v1452_v34, %v5052_v58  ;;  %4033 = vmatprep.mubr.msk.bf16.mxu0 %vm4306_vm2, %v4304_v1  ;;  %4063 = vmatprep.mubr.msk.bf16.mxu1 %vm4306_vm2, %v4304_v1  ;;  %v1118_v41 = vmax.f32 %v1104_v31, 0.0 }
 0x1c2   : >> { %v3839_v3 = vpop.f32.mrf.mxu0  ;;  %v3869_v51 = vpop.f32.mrf.mxu1  ;;  %v1105_v48 = vadd.f32 %v5146_v20, %v4942_v54 }
 0x1c3   : >> { %v1705_v42 = vmax.f32 %v1691_v38, 0.0  ;;  %v1678_v46 = vadd.f32 %v1629_v28, %v1501_v49  ;;  %v5204_v3 = vld [vmem:[%s4375_s30 + $0x180] sm:$0xff]  }
 0x1c4   : >> { %v1455_v44 = vpop.f32.mrf.mxu0  ;;  %v1632_v8 = vpop.f32.mrf.mxu1 }
 0x1c5   : >> { %v5183_v58 = vmax.f32 %v1116_v16, %v1705_v42  ;;  %v1692_v35 = vadd.f32 %v5146_v20, %v1678_v46  ;;  %v1502_v22 = vadd.f32 %v1455_v44, %v5055_v27  ;;  %v1119_v46 = vmax.f32 %v1105_v48, 0.0 }
 0x1c6   : >> { %v3840_v61 = vpop.f32.mrf.mxu0  ;;  %v3870_v52 = vpop.f32.mrf.mxu1  ;;  %v1106_v44 = vadd.f32 %v5146_v20, %v4951_v10 }
 0x1c7   : >> { %v1706_v11 = vmax.f32 %v1692_v35, 0.0  ;;  %v1679_v33 = vadd.f32 %v1632_v8, %v1502_v22  ;;  %v4274_v61 = vld [vmem:[%s4375_s30 + $0x110] sm:$0xff]  }
 0x1c8   : >> { %v1460_v45 = vpop.f32.mrf.mxu0  ;;  %v1637_v7 = vpop.f32.mrf.mxu1  ;;  %4034 = vmatmul.mubr.msk.bf16.gmra.mxu0 %vm259_vm3, %v5181_v12  ;;  %4064 = vmatmul.mubr.msk.bf16.gmra.mxu1 %vm259_vm3, %v4273_v26 }
 0x1c9   : >> { %v5193_v59 = vmax.f32 %v1117_v47, %v1706_v11  ;;  %v1693_v27 = vadd.f32 %v5146_v20, %v1679_v33  ;;  %v1503_v43 = vadd.f32 %v1460_v45, %v5066_v37  ;;  %4037 = vmatprep.mubr.msk.bf16.mxu0 %vm4306_vm2, %v4304_v1  ;;  %4067 = vmatprep.mubr.msk.bf16.mxu1 %vm4306_vm2, %v4304_v1  ;;  %v1120_v11 = vmax.f32 %v1106_v44, 0.0 }
 0x1ca   : >> { %v3843_v9 = vpop.f32.mrf.mxu0  ;;  %v3873_v24 = vpop.f32.mrf.mxu1  ;;  %v1107_v33 = vadd.f32 %v5146_v20, %v4960_v21 }
 0x1cb   : >> { %v1707_v34 = vmax.f32 %v1693_v27, 0.0  ;;  %v1680_v28 = vadd.f32 %v1637_v7, %v1503_v43 }
 0x1cc   : >> { %v1463_v38 = vpop.f32.mrf.mxu0  ;;  %v1640_v49 = vpop.f32.mrf.mxu1  ;;  %v1121_v48 = vmax.f32 %v1107_v33, 0.0  ;;  %v4276_v33 = vld [vmem:[%s4375_s30 + $0xb0] sm:$0xff]  }
 0x1cd   : >> { %v5206_v37 = vmax.f32 %v1118_v41, %v1707_v34  ;;  %v1694_v51 = vadd.f32 %v5146_v20, %v1680_v28  ;;  %v1504_v16 = vadd.f32 %v1463_v38, %v5069_v62  ;;  %v1108_v34 = vadd.f32 %v5146_v20, %v4969_v0 }
 0x1ce   : >> { %v3844_v25 = vpop.f32.mrf.mxu0  ;;  %v3874_v42 = vpop.f32.mrf.mxu1 }
 0x1cf   : >> { %v1708_v54 = vmax.f32 %v1694_v51, 0.0  ;;  %v1681_v8 = vadd.f32 %v1640_v49, %v1504_v16  ;;  %v4275_v51 = vld [vmem:[%s4375_s30 + $0xa8] sm:$0xff]  }
 0x1d0   : >> { %v1468_v35 = vpop.f32.mrf.mxu0  ;;  %v1645_v22 = vpop.f32.mrf.mxu1  ;;  %4038 = vmatmul.mubr.msk.bf16.gmra.mxu0 %vm259_vm3, %v5204_v3  ;;  %4068 = vmatmul.mubr.msk.bf16.gmra.mxu1 %vm259_vm3, %v4274_v61 }
 0x1d1   : >> { %v5216_v52 = vmax.f32 %v1119_v46, %v1708_v54  ;;  %v1695_v62 = vadd.f32 %v5146_v20, %v1681_v8  ;;  %v1505_v47 = vadd.f32 %v1468_v35, %v5080_v14  ;;  %4073 = vmatprep.mubr.msk.bf16.mxu0 %vm4306_vm2, %v4304_v1  ;;  %4103 = vmatprep.mubr.msk.bf16.mxu1 %vm4306_vm2, %v4304_v1  ;;  %v1122_v46 = vmax.f32 %v1108_v34, 0.0 }
 0x1d2   : >> { %v3847_v10 = vpop.f32.mrf.mxu0  ;;  %v3877_v31 = vpop.f32.mrf.mxu1 }
 0x1d3   : >> { %v1709_v45 = vmax.f32 %v1695_v62, 0.0  ;;  %v1682_v7 = vadd.f32 %v1645_v22, %v1505_v47  ;;  %v1110_v47 = vadd.f32 %v5146_v20, %v4991_v53 }
 0x1d4   : >> { %v1471_v26 = vpop.f32.mrf.mxu0  ;;  %v1648_v27 = vpop.f32.mrf.mxu1 }
 0x1d5   : >> { %v5226_v43 = vmax.f32 %v1120_v11, %v1709_v45  ;;  %v1696_v14 = vadd.f32 %v5146_v20, %v1682_v7  ;;  %v1506_v9 = vadd.f32 %v1471_v26, %v5086_v18 }
 0x1d6   : >> { %v3848_v24 = vpop.f32.mrf.mxu0  ;;  %v3878_v41 = vpop.f32.mrf.mxu1 }
 0x1d7   : >> { %v1710_v28 = vmax.f32 %v1696_v14, 0.0  ;;  %v1683_v38 = vadd.f32 %v1648_v27, %v1506_v9  ;;  %v1124_v27 = vmax.f32 %v1110_v47, 0.0  ;;  %v1111_v14 = vadd.f32 %v5146_v20, %v5000_v36 }
 0x1d8   : >> { %v1476_v21 = vpop.f32.mrf.mxu0  ;;  %v1653_v49 = vpop.f32.mrf.mxu1  ;;  %4074 = vmatmul.mubr.msk.bf16.vlgmr.msra.gmra.mxu0 %vm259_vm3, %v4275_v51  ;;  %4104 = vmatmul.mubr.msk.bf16.vlgmr.msra.gmra.mxu1 %vm259_vm3, %v4735_v50  ;;  %v1109_v50 = vadd.f32 %v5146_v20, %v4978_v5 }
 0x1d9   : >> { %v5236_v16 = vmax.f32 %v1121_v48, %v1710_v28  ;;  %v1697_v18 = vadd.f32 %v5146_v20, %v1683_v38  ;;  %v1507_v25 = vadd.f32 %v1476_v21, %v5099_v17  ;;  %4132 = vmatpush3.bf16.msra.mxu0 %v4390_v13  ;;  %4162 = vmatpush3.bf16.msra.mxu1 %v4481_v29  ;;  %v1125_v21 = vmax.f32 %v1111_v14, 0.0 }
 0x1da   : >> { %v3851_v0 = vpop.f32.mrf.mxu0  ;;  %v3881_v42 = vpop.f32.mrf.mxu1  ;;  %4077 = vmatprep.mubr.msk.bf16.mxu0 %vm4306_vm2, %v4304_v1  ;;  %4107 = vmatprep.mubr.msk.bf16.mxu1 %vm4306_vm2, %v4304_v1  ;;  %v1123_v62 = vmax.f32 %v1109_v50, 0.0 }
 0x1db   : >> { %v1711_v44 = vmax.f32 %v1697_v18, 0.0  ;;  %v1684_v54 = vadd.f32 %v1653_v49, %v1507_v25  ;;  %v1112_v49 = vadd.f32 %v5146_v20, %v5009_v39  ;;  %v4277_v0 = vld [vmem:[%s4375_s30 + $0xb8] sm:$0xff]   ;;  %v4278_v42 = vld [vmem:[%s4375_s30 + $0x128] sm:$0xff]  }
 0x1dc   : >> { %v1479_v17 = vpop.f32.mrf.mxu0  ;;  %v1656_v8 = vpop.f32.mrf.mxu1 }
 0x1dd   : >> { %v5248_v13 = vmax.f32 %v1122_v46, %v1711_v44  ;;  %v1698_v29 = vadd.f32 %v5146_v20, %v1684_v54  ;;  %v1508_v35 = vadd.f32 %v1479_v17, %v5107_v2  ;;  %v1126_v54 = vmax.f32 %v1112_v49, 0.0 }
 0x1de   : >> { %v3852_v22 = vpop.f32.mrf.mxu0  ;;  %v3882_v61 = vpop.f32.mrf.mxu1  ;;  %v1113_v17 = vadd.f32 %v5146_v20, %v5018_v15 }
 0x1df   : >> { %v1712_v10 = vmax.f32 %v1698_v29, 0.0  ;;  %v1685_v31 = vadd.f32 %v1656_v8, %v1508_v35 }
 0x1e0   : >> { %v1484_v5 = vpop.f32.mrf.mxu0  ;;  %v1661_v11 = vpop.f32.mrf.mxu1  ;;  %4078 = vmatmul.mubr.msk.bf16.gmra.mxu0 %vm259_vm3, %v4276_v33  ;;  %4108 = vmatmul.mubr.msk.bf16.gmra.mxu1 %vm259_vm3, %v4754_v63 }
 0x1e1   : >> { %v5258_v45 = vmax.f32 %v1123_v62, %v1712_v10  ;;  %v1699_v2 = vadd.f32 %v5146_v20, %v1685_v31  ;;  %v1509_v7 = vadd.f32 %v1484_v5, %v5118_v19  ;;  %4081 = vmatprep.mubr.msk.bf16.mxu0 %vm4306_vm2, %v4304_v1  ;;  %4111 = vmatprep.mubr.msk.bf16.mxu1 %vm4306_vm2, %v4304_v1  ;;  %v1127_v31 = vmax.f32 %v1113_v17, 0.0 }
 0x1e2   : >> { %v3855_v53 = vpop.f32.mrf.mxu0  ;;  %v3885_v26 = vpop.f32.mrf.mxu1  ;;  %v1114_v5 = vadd.f32 %v5146_v20, %v5027_v40 }
 0x1e3   : >> { %v1713_v63 = vmax.f32 %v1699_v2, 0.0  ;;  %v1686_v9 = vadd.f32 %v1661_v11, %v1509_v7  ;;  %v4279_v7 = vld [vmem:[%s4375_s30 + $0xc0] sm:$0xff]   ;;  %v4280_v53 = vld [vmem:[%s4375_s30 + $0x130] sm:$0xff]  }
 0x1e4   : >> { %v1487_v24 = vpop.f32.mrf.mxu0  ;;  %v1664_v41 = vpop.f32.mrf.mxu1 }
 0x1e5   : >> { %v5268_v48 = vmax.f32 %v1124_v27, %v1713_v63  ;;  %v1700_v19 = vadd.f32 %v5146_v20, %v1686_v9  ;;  %v1510_v34 = vadd.f32 %v1487_v24, %v5124_v56  ;;  %v1128_v63 = vmax.f32 %v1114_v5, 0.0 }
 0x1e6   : >> { %v3856_v28 = vpop.f32.mrf.mxu0  ;;  %v3886_v38 = vpop.f32.mrf.mxu1 }
 0x1e7   : >> { %v1714_v51 = vmax.f32 %v1700_v19, 0.0  ;;  %v1687_v36 = vadd.f32 %v1664_v41, %v1510_v34 }
 0x1e8   : >> { %v1492_v18 = vpop.f32.mrf.mxu0  ;;  %v1669_v25 = vpop.f32.mrf.mxu1  ;;  %4082 = vmatmul.mubr.msk.bf16.gmra.mxu0 %vm259_vm3, %v4277_v0  ;;  %4112 = vmatmul.mubr.msk.bf16.gmra.mxu1 %vm259_vm3, %v4278_v42 }
 0x1e9   : >> { %v5278_v46 = vmax.f32 %v1125_v21, %v1714_v51  ;;  %v1701_v56 = vadd.f32 %v5146_v20, %v1687_v36  ;;  %v1511_v50 = vadd.f32 %v1492_v18, %v5135_v60  ;;  %4085 = vmatprep.mubr.msk.bf16.mxu0 %vm4306_vm2, %v4304_v1  ;;  %4115 = vmatprep.mubr.msk.bf16.mxu1 %vm4306_vm2, %v4304_v1  ;;  %v4281_v51 = vld [vmem:[%s4375_s30 + $0xc8] sm:$0xff]   ;;  %v4282_v36 = vld [vmem:[%s4375_s30 + $0x138] sm:$0xff]  }
 0x1ea   : >> { %v3859_v39 = vpop.f32.mrf.mxu0  ;;  %v3889_v44 = vpop.f32.mrf.mxu1 }
 0x1eb   : >> { %v1715_v8 = vmax.f32 %v1701_v56, 0.0  ;;  %v1688_v29 = vadd.f32 %v1669_v25, %v1511_v50 }
 0x1ec   : >> { %v1495_v35 = vpop.f32.mrf.mxu0  ;;  %v1672_v22 = vpop.f32.mrf.mxu1 }
 0x1ed   : >> { %v5288_v61 = vmax.f32 %v1126_v54, %v1715_v8  ;;  %v1702_v60 = vadd.f32 %v5146_v20, %v1688_v29  ;;  %v1512_v62 = vadd.f32 %v1495_v35, %v5141_v32  ;;  %v4283_v8 = vld [vmem:[%s4375_s30 + $0xd0] sm:$0xff]   ;;  %v4284_v29 = vld [vmem:[%s4375_s30 + $0x140] sm:$0xff]  }
 0x1ee   : >> { %v3860_v47 = vpop.f32.mrf.mxu0  ;;  %v3890_v10 = vpop.f32.mrf.mxu1 }
 0x1ef   : >> { %v1716_v11 = vmax.f32 %v1702_v60, 0.0  ;;  %v1689_v15 = vadd.f32 %v1672_v22, %v1512_v62 }
 0x1f0   : >> { %v1766_v33 = vpop.f32.mrf.mxu0  ;;  %v1855_v2 = vpop.f32.mrf.mxu1  ;;  %4086 = vmatmul.mubr.msk.bf16.gmra.mxu0 %vm259_vm3, %v4279_v7  ;;  %4116 = vmatmul.mubr.msk.bf16.gmra.mxu1 %vm259_vm3, %v4280_v53 }
 0x1f1   : >> { %v5298_v26 = vmax.f32 %v1127_v31, %v1716_v11  ;;  %v1703_v32 = vadd.f32 %v5146_v20, %v1689_v15  ;;  %v5301_v27 = vadd.f32 %v1855_v2, %v1766_v33  ;;  %4089 = vmatprep.mubr.msk.bf16.mxu0 %vm4306_vm2, %v4304_v1  ;;  %4119 = vmatprep.mubr.msk.bf16.mxu1 %vm4306_vm2, %v4304_v1  ;;  %v4285_v33 = vld [vmem:[%s4375_s30 + $0xd8] sm:$0xff]   ;;  %v4286_v2 = vld [vmem:[%s4375_s30 + $0x148] sm:$0xff]  }
 0x1f2   : >> { %v3895_v40 = vpop.f32.mrf.mxu0  ;;  %v3925_v14 = vpop.f32.mrf.mxu1 }
 0x1f3   : >> { %v1717_v9 = vmax.f32 %v1703_v32, 0.0 }
 0x1f4   : >> { %v1769_v24 = vpop.f32.mrf.mxu0  ;;  %v1858_v41 = vpop.f32.mrf.mxu1 }
 0x1f5   : >> { %v5307_v19 = vmax.f32 %v1128_v63, %v1717_v9  ;;  %v5309_v34 = vadd.f32 %v1858_v41, %v1769_v24  ;;  %v4266_v63 = vld [vmem:[%s4375_s30 + $0x188] sm:$0xff]  }
 0x1f6   : >> { %v3896_v28 = vpop.f32.mrf.mxu0  ;;  %v3926_v38 = vpop.f32.mrf.mxu1 }
 0x1f8   : >> { %v1774_v21 = vpop.f32.mrf.mxu0  ;;  %v1863_v49 = vpop.f32.mrf.mxu1  ;;  %4090 = vmatmul.mubr.msk.bf16.gmra.mxu0 %vm259_vm3, %v4281_v51  ;;  %4120 = vmatmul.mubr.msk.bf16.gmra.mxu1 %vm259_vm3, %v4282_v36 }
 0x1f9   : >> { %v5315_v18 = vadd.f32 %v1863_v49, %v1774_v21  ;;  %4093 = vmatprep.mubr.msk.bf16.mxu0 %vm4306_vm2, %v4304_v1  ;;  %4123 = vmatprep.mubr.msk.bf16.mxu1 %vm4306_vm2, %v4304_v1 }
 0x1fa   : >> { %v3899_v25 = vpop.f32.mrf.mxu0  ;;  %v3929_v0 = vpop.f32.mrf.mxu1 }
 0x1fb   : >> { %v4267_v0 = vld [vmem:[%s4375_s30 + $0x190] sm:$0xff]  }
 0x1fc   : >> { %v1777_v42 = vpop.f32.mrf.mxu0  ;;  %v1866_v56 = vpop.f32.mrf.mxu1 }
 0x1fd   : >> { %v5321_v50 = vadd.f32 %v1866_v56, %v1777_v42 }
 0x1fe   : >> { %v3900_v39 = vpop.f32.mrf.mxu0  ;;  %v3930_v44 = vpop.f32.mrf.mxu1 }
 0x200   : >> { %v1782_v54 = vpop.f32.mrf.mxu0  ;;  %v1871_v17 = vpop.f32.mrf.mxu1  ;;  %4094 = vmatmul.mubr.msk.bf16.gmra.mxu0 %vm259_vm3, %v4283_v8  ;;  %4124 = vmatmul.mubr.msk.bf16.gmra.mxu1 %vm259_vm3, %v4284_v29 }
 0x201   : >> { %v5327_v35 = vadd.f32 %v1871_v17, %v1782_v54  ;;  %4097 = vmatprep.mubr.msk.bf16.mxu0 %vm4306_vm2, %v4304_v1  ;;  %4127 = vmatprep.mubr.msk.bf16.mxu1 %vm4306_vm2, %v4304_v1 }
 0x202   : >> { %v3903_v22 = vpop.f32.mrf.mxu0  ;;  %v3933_v60 = vpop.f32.mrf.mxu1 }
 0x203   : >> { %v4268_v60 = vld [vmem:[%s4375_s30 + $0x198] sm:$0xff]  }
 0x204   : >> { %v1785_v62 = vpop.f32.mrf.mxu0  ;;  %v1874_v47 = vpop.f32.mrf.mxu1 }
 0x205   : >> { %v5333_v10 = vadd.f32 %v1874_v47, %v1785_v62 }
 0x206   : >> { %v3904_v31 = vpop.f32.mrf.mxu0  ;;  %v3934_v5 = vpop.f32.mrf.mxu1 }
 0x208   : >> { %v1790_v11 = vpop.f32.mrf.mxu0  ;;  %v1879_v15 = vpop.f32.mrf.mxu1  ;;  %4098 = vmatmul.mubr.msk.bf16.gmra.mxu0 %vm259_vm3, %v4285_v33  ;;  %4128 = vmatmul.mubr.msk.bf16.gmra.mxu1 %vm259_vm3, %v4286_v2 }
 0x209   : >> { %v5339_v7 = vadd.f32 %v1879_v15, %v1790_v11  ;;  %4133 = vmatprep.mubr.msk.bf16.mxu0 %vm4306_vm2, %v4304_v1  ;;  %4163 = vmatprep.mubr.msk.bf16.mxu1 %vm4306_vm2, %v4304_v1 }
 0x20a   : >> { %v3907_v53 = vpop.f32.mrf.mxu0  ;;  %v3937_v32 = vpop.f32.mrf.mxu1 }
 0x20b   : >> { %v4269_v32 = vld [vmem:[%s4375_s30 + $0x1a0] sm:$0xff]  }
 0x20c   : >> { %v1793_v40 = vpop.f32.mrf.mxu0  ;;  %v1882_v14 = vpop.f32.mrf.mxu1 }
 0x20d   : >> { %v5346_v9 = vadd.f32 %v1882_v14, %v1793_v40 }
 0x20e   : >> { %v3908_v24 = vpop.f32.mrf.mxu0  ;;  %v3938_v41 = vpop.f32.mrf.mxu1 }
 0x210   : >> { %v1798_v28 = vpop.f32.mrf.mxu0  ;;  %v1887_v38 = vpop.f32.mrf.mxu1  ;;  %4134 = vmatmul.mubr.msk.bf16.vlgmr.msra.gmra.mxu0 %vm259_vm3, %v5083_v23  ;;  %4164 = vmatmul.mubr.msk.bf16.vlgmr.msra.gmra.mxu1 %vm259_vm3, %v4266_v63 }
 0x211   : >> { %v5351_v21 = vadd.f32 %v1887_v38, %v1798_v28  ;;  %4137 = vmatprep.mubr.msk.bf16.mxu0 %vm4306_vm2, %v4304_v1  ;;  %4167 = vmatprep.mubr.msk.bf16.mxu1 %vm4306_vm2, %v4304_v1 }
 0x212   : >> { %v3911_v49 = vpop.f32.mrf.mxu0  ;;  %v3941_v51 = vpop.f32.mrf.mxu1 }
 0x214   : >> { %v1801_v36 = vpop.f32.mrf.mxu0  ;;  %v1890_v25 = vpop.f32.mrf.mxu1 }
 0x215   : >> { %v5358_v42 = vadd.f32 %v1890_v25, %v1801_v36  ;;  %v4270_v25 = vld [vmem:[%s4375_s30 + $0x1a8] sm:$0xff]  }
 0x216   : >> { %v3912_v56 = vpop.f32.mrf.mxu0  ;;  %v3942_v23 = vpop.f32.mrf.mxu1 }
 0x218   : >> { %v1806_v39 = vpop.f32.mrf.mxu0  ;;  %v1895_v44 = vpop.f32.mrf.mxu1  ;;  %4138 = vmatmul.mubr.msk.bf16.gmra.mxu0 %vm259_vm3, %v5104_v30  ;;  %4168 = vmatmul.mubr.msk.bf16.gmra.mxu1 %vm259_vm3, %v4267_v0 }
 0x219   : >> { %v5363_v54 = vadd.f32 %v1895_v44, %v1806_v39  ;;  %4141 = vmatprep.mubr.msk.bf16.mxu0 %vm4306_vm2, %v4304_v1  ;;  %4171 = vmatprep.mubr.msk.bf16.mxu1 %vm4306_vm2, %v4304_v1 }
 0x21a   : >> { %v3915_v17 = vpop.f32.mrf.mxu0  ;;  %v3945_v8 = vpop.f32.mrf.mxu1 }
 0x21c   : >> { %v1809_v29 = vpop.f32.mrf.mxu0  ;;  %v1898_v22 = vpop.f32.mrf.mxu1 }
 0x21d   : >> { %v5370_v62 = vadd.f32 %v1898_v22, %v1809_v29 }
 0x21e   : >> { %v3916_v47 = vpop.f32.mrf.mxu0  ;;  %v3946_v30 = vpop.f32.mrf.mxu1 }
 0x220   : >> { %v1814_v31 = vpop.f32.mrf.mxu0  ;;  %v1903_v5 = vpop.f32.mrf.mxu1  ;;  %4142 = vmatmul.mubr.msk.bf16.gmra.mxu0 %vm259_vm3, %v5121_v57  ;;  %4172 = vmatmul.mubr.msk.bf16.gmra.mxu1 %vm259_vm3, %v4268_v60  ;;  %v4271_v60 = vld [vmem:[%s4375_s30 + $0x1b0] sm:$0xff]  }
 0x221   : >> { %v5375_v11 = vadd.f32 %v1903_v5, %v1814_v31  ;;  %4145 = vmatprep.mubr.msk.bf16.mxu0 %vm4306_vm2, %v4304_v1  ;;  %4175 = vmatprep.mubr.msk.bf16.mxu1 %vm4306_vm2, %v4304_v1 }
 0x222   : >> { %v3919_v15 = vpop.f32.mrf.mxu0  ;;  %v3949_v33 = vpop.f32.mrf.mxu1 }
 0x224   : >> { %v1817_v2 = vpop.f32.mrf.mxu0  ;;  %v1906_v53 = vpop.f32.mrf.mxu1 }
 0x225   : >> { %v5382_v40 = vadd.f32 %v1906_v53, %v1817_v2 }
 0x226   : >> { %v3920_v14 = vpop.f32.mrf.mxu0  ;;  %v3950_v57 = vpop.f32.mrf.mxu1 }
 0x227   : >> { %v4272_v14 = vld [vmem:[%s4375_s30 + $0x1b8] sm:$0xff]  }
 0x228   : >> { %v1944_v63 = vpop.f32.mrf.mxu0  ;;  %v2047_v24 = vpop.f32.mrf.mxu1  ;;  %4146 = vmatmul.mubr.msk.bf16.gmra.mxu0 %vm259_vm3, %v5138_v6  ;;  %4176 = vmatmul.mubr.msk.bf16.gmra.mxu1 %vm259_vm3, %v4269_v32 }
 0x229   : >> { %v1999_v41 = vadd.f32 %v1944_v63, %v5301_v27  ;;  %4149 = vmatprep.mubr.msk.bf16.mxu0 %vm4306_vm2, %v4304_v1  ;;  %4179 = vmatprep.mubr.msk.bf16.mxu1 %vm4306_vm2, %v4304_v1 }
 0x22a   : >> { %v3955_v28 = vpop.f32.mrf.mxu0  ;;  %v3985_v38 = vpop.f32.mrf.mxu1 }
 0x22b   : >> { %v5392_v49 = vadd.f32 %v2047_v24, %v1999_v41 }
 0x22c   : >> { %v1947_v51 = vpop.f32.mrf.mxu0  ;;  %v2050_v36 = vpop.f32.mrf.mxu1 }
 0x22d   : >> { %v2000_v0 = vadd.f32 %v1947_v51, %v5309_v34 }
 0x22e   : >> { %v3956_v6 = vpop.f32.mrf.mxu0  ;;  %v3986_v56 = vpop.f32.mrf.mxu1 }
 0x22f   : >> { %v5396_v23 = vadd.f32 %v2050_v36, %v2000_v0 }
 0x230   : >> { %v1952_v27 = vpop.f32.mrf.mxu0  ;;  %v2055_v39 = vpop.f32.mrf.mxu1  ;;  %4150 = vmatmul.mubr.msk.bf16.gmra.mxu0 %vm259_vm3, %v5160_v55  ;;  %4180 = vmatmul.mubr.msk.bf16.gmra.mxu1 %vm259_vm3, %v4270_v25 }
 0x231   : >> { %v2001_v44 = vadd.f32 %v1952_v27, %v5315_v18  ;;  %4153 = vmatprep.mubr.msk.bf16.mxu0 %vm4306_vm2, %v4304_v1  ;;  %4183 = vmatprep.mubr.msk.bf16.mxu1 %vm4306_vm2, %v4304_v1 }
 0x232   : >> { %v3959_v34 = vpop.f32.mrf.mxu0  ;;  %v3989_v17 = vpop.f32.mrf.mxu1 }
 0x233   : >> { %v5406_v8 = vadd.f32 %v2055_v39, %v2001_v44 }
 0x234   : >> { %v1955_v29 = vpop.f32.mrf.mxu0  ;;  %v2058_v22 = vpop.f32.mrf.mxu1 }
 0x235   : >> { %v2002_v47 = vadd.f32 %v1955_v29, %v5321_v50 }
 0x236   : >> { %v3960_v55 = vpop.f32.mrf.mxu0  ;;  %v3990_v30 = vpop.f32.mrf.mxu1 }
 0x237   : >> { %v5410_v31 = vadd.f32 %v2058_v22, %v2002_v47 }
 0x238   : >> { %v1960_v18 = vpop.f32.mrf.mxu0  ;;  %v2063_v5 = vpop.f32.mrf.mxu1  ;;  %4154 = vmatmul.mubr.msk.bf16.gmra.mxu0 %vm259_vm3, %v5181_v12  ;;  %4184 = vmatmul.mubr.msk.bf16.gmra.mxu1 %vm259_vm3, %v4271_v60 }
 0x239   : >> { %v2003_v15 = vadd.f32 %v1960_v18, %v5327_v35  ;;  %4157 = vmatprep.mubr.msk.bf16.mxu0 %vm4306_vm2, %v4304_v1  ;;  %4187 = vmatprep.mubr.msk.bf16.mxu1 %vm4306_vm2, %v4304_v1 }
 0x23a   : >> { %v3963_v50 = vpop.f32.mrf.mxu0  ;;  %v3993_v33 = vpop.f32.mrf.mxu1 }
 0x23b   : >> { %v5420_v2 = vadd.f32 %v2063_v5, %v2003_v15 }
 0x23c   : >> { %v1963_v53 = vpop.f32.mrf.mxu0  ;;  %v2066_v32 = vpop.f32.mrf.mxu1 }
 0x23d   : >> { %v2004_v57 = vadd.f32 %v1963_v53, %v5333_v10 }
 0x23e   : >> { %v3964_v12 = vpop.f32.mrf.mxu0  ;;  %v3994_v63 = vpop.f32.mrf.mxu1 }
 0x23f   : >> { %v5424_v24 = vadd.f32 %v2066_v32, %v2004_v57 }
 0x240   : >> { %v1968_v35 = vpop.f32.mrf.mxu0  ;;  %v2071_v41 = vpop.f32.mrf.mxu1  ;;  %4158 = vmatmul.mubr.msk.bf16.gmra.mxu0 %vm259_vm3, %v5204_v3  ;;  %4188 = vmatmul.mubr.msk.bf16.gmra.mxu1 %vm259_vm3, %v4272_v14 }
 0x241   : >> { %v2005_v1 = vadd.f32 %v1968_v35, %v5339_v7 }
 0x242   : >> { %v3967_v28 = vpop.f32.mrf.mxu0  ;;  %v3997_v38 = vpop.f32.mrf.mxu1 }
 0x243   : >> { %v5430_v51 = vadd.f32 %v2071_v41, %v2005_v1 }
 0x244   : >> { %v1971_v36 = vpop.f32.mrf.mxu0  ;;  %v2074_v25 = vpop.f32.mrf.mxu1 }
 0x245   : >> { %v2006_v10 = vadd.f32 %v1971_v36, %v5346_v9 }
 0x246   : >> { %v3968_v0 = vpop.f32.mrf.mxu0  ;;  %v3998_v6 = vpop.f32.mrf.mxu1 }
 0x247   : >> { %v5433_v56 = vadd.f32 %v2074_v25, %v2006_v10 }
 0x248   : >> { %v1976_v27 = vpop.f32.mrf.mxu0  ;;  %v2079_v39 = vpop.f32.mrf.mxu1 }
 0x249   : >> { %v2007_v3 = vadd.f32 %v1976_v27, %v5351_v21 }
 0x24a   : >> { %v3971_v44 = vpop.f32.mrf.mxu0  ;;  %v4001_v34 = vpop.f32.mrf.mxu1 }
 0x24b   : >> { %v5436_v17 = vadd.f32 %v2079_v39, %v2007_v3 }
 0x24c   : >> { %v1979_v7 = vpop.f32.mrf.mxu0  ;;  %v2082_v29 = vpop.f32.mrf.mxu1 }
 0x24d   : >> { %v2008_v22 = vadd.f32 %v1979_v7, %v5358_v42 }
 0x24e   : >> { %v3972_v60 = vpop.f32.mrf.mxu0  ;;  %v4002_v47 = vpop.f32.mrf.mxu1 }
 0x24f   : >> { %v5439_v55 = vadd.f32 %v2082_v29, %v2008_v22 }
 0x250   : >> { %v1984_v9 = vpop.f32.mrf.mxu0  ;;  %v2087_v30 = vpop.f32.mrf.mxu1 }
 0x251   : >> { %v2009_v18 = vadd.f32 %v1984_v9, %v5363_v54 }
 0x252   : >> { %v3975_v5 = vpop.f32.mrf.mxu0  ;;  %v4005_v15 = vpop.f32.mrf.mxu1 }
 0x253   : >> { %v5442_v50 = vadd.f32 %v2087_v30, %v2009_v18 }
 0x254   : >> { %v1987_v21 = vpop.f32.mrf.mxu0  ;;  %v2090_v33 = vpop.f32.mrf.mxu1 }
 0x255   : >> { %v2010_v53 = vadd.f32 %v1987_v21, %v5370_v62 }
 0x256   : >> { %v3976_v32 = vpop.f32.mrf.mxu0  ;;  %v4006_v14 = vpop.f32.mrf.mxu1 }
 0x257   : >> { %v5445_v57 = vadd.f32 %v2090_v33, %v2010_v53 }
 0x258   : >> { %v1992_v42 = vpop.f32.mrf.mxu0  ;;  %v2095_v12 = vpop.f32.mrf.mxu1 }
 0x259   : >> { %v2011_v63 = vadd.f32 %v1992_v42, %v5375_v11 }
 0x25a   : >> { %v3979_v35 = vpop.f32.mrf.mxu0  ;;  %v4009_v41 = vpop.f32.mrf.mxu1 }
 0x25b   : >> { %v5448_v1 = vadd.f32 %v2095_v12, %v2011_v63 }
 0x25c   : >> { %v1995_v54 = vpop.f32.mrf.mxu0  ;;  %v2098_v28 = vpop.f32.mrf.mxu1 }
 0x25d   : >> { %v2012_v38 = vadd.f32 %v1995_v54, %v5382_v40 }
 0x25e   : >> { %v3980_v36 = vpop.f32.mrf.mxu0  ;;  %v4010_v25 = vpop.f32.mrf.mxu1 }
 0x25f   : >> { %v5451_v10 = vadd.f32 %v2098_v28, %v2012_v38 }
 0x260   : >> { %v2224_v62 = vpop.f32.mrf.mxu0  ;;  %v5453_v0 = vpop.f32.mrf.mxu1 }
 0x261   : >> { %v2279_v6 = vadd.f32 %v2224_v62, %v5392_v49 }
 0x262   : >> { %v4015_v27 = vpop.f32.mrf.mxu0  ;;  %v4045_v39 = vpop.f32.mrf.mxu1 }
 0x263   : >> { %v2293_v11 = vadd.f32 %v5146_v20, %v2279_v6 }
 0x264   : >> { %v2227_v3 = vpop.f32.mrf.mxu0  ;;  %v5457_v44 = vpop.f32.mrf.mxu1 }
 0x265   : >> { %v2307_v34 = vmax.f32 %v2293_v11, 0.0  ;;  %v2280_v7 = vadd.f32 %v2227_v3, %v5396_v23 }
 0x266   : >> { %v4016_v40 = vpop.f32.mrf.mxu0  ;;  %v4046_v29 = vpop.f32.mrf.mxu1 }
 0x267   : >> { %v5461_v22 = vmax.f32 %v5170_v4, %v2307_v34  ;;  %v2294_v60 = vadd.f32 %v5146_v20, %v2280_v7 }
 0x268   : >> { %v2232_v47 = vpop.f32.mrf.mxu0  ;;  %v5464_v9 = vpop.f32.mrf.mxu1 }
 0x269   : >> { %v2308_v49 = vmax.f32 %v2294_v60, 0.0  ;;  %v2281_v30 = vadd.f32 %v2232_v47, %v5406_v8 }
 0x26a   : >> { %v4019_v18 = vpop.f32.mrf.mxu0  ;;  %v4049_v5 = vpop.f32.mrf.mxu1 }
 0x26b   : >> { %v5468_v15 = vmax.f32 %v5183_v58, %v2308_v49  ;;  %v2295_v23 = vadd.f32 %v5146_v20, %v2281_v30 }
 0x26c   : >> { %v2235_v21 = vpop.f32.mrf.mxu0  ;;  %v5471_v33 = vpop.f32.mrf.mxu1 }
 0x26d   : >> { %v2309_v4 = vmax.f32 %v2295_v23, 0.0  ;;  %v2282_v53 = vadd.f32 %v2235_v21, %v5410_v31 }
 0x26e   : >> { %v4020_v32 = vpop.f32.mrf.mxu0  ;;  %v4050_v14 = vpop.f32.mrf.mxu1 }
 0x26f   : >> { %v5475_v42 = vmax.f32 %v5193_v59, %v2309_v4  ;;  %v2296_v8 = vadd.f32 %v5146_v20, %v2282_v53 }
 0x270   : >> { %v2240_v12 = vpop.f32.mrf.mxu0  ;;  %v5478_v63 = vpop.f32.mrf.mxu1 }
 0x271   : >> { %v2310_v58 = vmax.f32 %v2296_v8, 0.0  ;;  %v2283_v35 = vadd.f32 %v2240_v12, %v5420_v2 }
 0x272   : >> { %v4023_v41 = vpop.f32.mrf.mxu0  ;;  %v4053_v54 = vpop.f32.mrf.mxu1 }
 0x273   : >> { %v5482_v28 = vmax.f32 %v5206_v37, %v2310_v58  ;;  %v2297_v31 = vadd.f32 %v5146_v20, %v2283_v35 }
 0x274   : >> { %v2243_v38 = vpop.f32.mrf.mxu0  ;;  %v5485_v36 = vpop.f32.mrf.mxu1 }
 0x275   : >> { %v2311_v59 = vmax.f32 %v2297_v31, 0.0  ;;  %v2284_v25 = vadd.f32 %v2243_v38, %v5424_v24 }
 0x276   : >> { %v4024_v62 = vpop.f32.mrf.mxu0  ;;  %v4054_v6 = vpop.f32.mrf.mxu1 }
 0x277   : >> { %v5489_v27 = vmax.f32 %v5216_v52, %v2311_v59  ;;  %v2298_v2 = vadd.f32 %v5146_v20, %v2284_v25 }
 0x278   : >> { %v2248_v39 = vpop.f32.mrf.mxu0  ;;  %v5492_v11 = vpop.f32.mrf.mxu1 }
 0x279   : >> { %v2312_v37 = vmax.f32 %v2298_v2, 0.0  ;;  %v2285_v3 = vadd.f32 %v2248_v39, %v5430_v51 }
 0x27a   : >> { %v4027_v34 = vpop.f32.mrf.mxu0  ;;  %v4057_v7 = vpop.f32.mrf.mxu1 }
 0x27b   : >> { %v5496_v40 = vmax.f32 %v5226_v43, %v2312_v37  ;;  %v2299_v24 = vadd.f32 %v5146_v20, %v2285_v3 }
 0x27c   : >> { %v2251_v29 = vpop.f32.mrf.mxu0  ;;  %v5499_v60 = vpop.f32.mrf.mxu1 }
 0x27d   : >> { %v2313_v52 = vmax.f32 %v2299_v24, 0.0  ;;  %v2286_v47 = vadd.f32 %v2251_v29, %v5433_v56 }
 0x27e   : >> { %v4028_v49 = vpop.f32.mrf.mxu0  ;;  %v4058_v30 = vpop.f32.mrf.mxu1 }
 0x27f   : >> { %v5503_v18 = vmax.f32 %v5236_v16, %v2313_v52  ;;  %v2300_v51 = vadd.f32 %v5146_v20, %v2286_v47 }
 0x280   : >> { %v2256_v5 = vpop.f32.mrf.mxu0  ;;  %v5506_v23 = vpop.f32.mrf.mxu1 }
 0x281   : >> { %v2314_v43 = vmax.f32 %v2300_v51, 0.0  ;;  %v2287_v21 = vadd.f32 %v2256_v5, %v5436_v17 }
 0x282   : >> { %v4031_v4 = vpop.f32.mrf.mxu0  ;;  %v4061_v53 = vpop.f32.mrf.mxu1 }
 0x283   : >> { %v5510_v32 = vmax.f32 %v5248_v13, %v2314_v43  ;;  %v2301_v56 = vadd.f32 %v5146_v20, %v2287_v21 }
 0x284   : >> { %v2259_v14 = vpop.f32.mrf.mxu0  ;;  %v5513_v8 = vpop.f32.mrf.mxu1 }
 0x285   : >> { %v2315_v16 = vmax.f32 %v2301_v56, 0.0  ;;  %v2288_v12 = vadd.f32 %v2259_v14, %v5439_v55 }
 0x286   : >> { %v4032_v58 = vpop.f32.mrf.mxu0  ;;  %v4062_v35 = vpop.f32.mrf.mxu1 }
 0x287   : >> { %v5517_v41 = vmax.f32 %v5258_v45, %v2315_v16  ;;  %v2302_v17 = vadd.f32 %v5146_v20, %v2288_v12 }
 0x288   : >> { %v2264_v54 = vpop.f32.mrf.mxu0  ;;  %v5520_v31 = vpop.f32.mrf.mxu1 }
 0x289   : >> { %v2316_v13 = vmax.f32 %v2302_v17, 0.0  ;;  %v2289_v38 = vadd.f32 %v2264_v54, %v5442_v50 }
 0x28a   : >> { %v4035_v59 = vpop.f32.mrf.mxu0  ;;  %v4065_v25 = vpop.f32.mrf.mxu1 }
 0x28b   : >> { %v5524_v62 = vmax.f32 %v5268_v48, %v2316_v13  ;;  %v2303_v55 = vadd.f32 %v5146_v20, %v2289_v38 }
 0x28c   : >> { %v2267_v6 = vpop.f32.mrf.mxu0  ;;  %v5527_v2 = vpop.f32.mrf.mxu1 }
 0x28d   : >> { %v2317_v45 = vmax.f32 %v2303_v55, 0.0  ;;  %v2290_v39 = vadd.f32 %v2267_v6, %v5445_v57 }
 0x28e   : >> { %v4036_v37 = vpop.f32.mrf.mxu0  ;;  %v4066_v3 = vpop.f32.mrf.mxu1 }
 0x28f   : >> { %v5531_v34 = vmax.f32 %v5278_v46, %v2317_v45  ;;  %v2304_v50 = vadd.f32 %v5146_v20, %v2290_v39 }
 0x290   : >> { %v2272_v7 = vpop.f32.mrf.mxu0  ;;  %v5534_v24 = vpop.f32.mrf.mxu1 }
 0x291   : >> { %5702 = vst [vmem:[#allocation3_spill] sm:$0xff] %v5531_v34  ;;  %v2318_v48 = vmax.f32 %v2304_v50, 0.0  ;;  %v2291_v29 = vadd.f32 %v2272_v7, %v5448_v1 }
 0x292   : >> { %v4039_v52 = vpop.f32.mrf.mxu0  ;;  %v4069_v47 = vpop.f32.mrf.mxu1 }
 0x293   : >> { %v5538_v49 = vmax.f32 %v5288_v61, %v2318_v48  ;;  %v2305_v57 = vadd.f32 %v5146_v20, %v2291_v29 }
 0x294   : >> { %v2275_v30 = vpop.f32.mrf.mxu0  ;;  %v5541_v51 = vpop.f32.mrf.mxu1 }
 0x295   : >> { %5703 = vst [vmem:[#allocation4_spill] sm:$0xff] %v5538_v49  ;;  %5704 = vst [vmem:[#allocation5_spill] sm:$0xff] %v5541_v51  ;;  %v2319_v46 = vmax.f32 %v2305_v57, 0.0  ;;  %v2292_v5 = vadd.f32 %v2275_v30, %v5451_v10 }
 0x296   : >> { %v4040_v43 = vpop.f32.mrf.mxu0  ;;  %v4070_v21 = vpop.f32.mrf.mxu1 }
 0x297   : >> { %v5545_v4 = vmax.f32 %v5298_v26, %v2319_v46  ;;  %v2306_v1 = vadd.f32 %v5146_v20, %v2292_v5 }
 0x298   : >> { %v2458_v53 = vpop.f32.mrf.mxu0  ;;  %v2547_v56 = vpop.f32.mrf.mxu1 }
 0x299   : >> { %5705 = vst [vmem:[#allocation6_spill] sm:$0xff] %v5545_v4  ;;  %v2320_v14 = vmax.f32 %v2306_v1, 0.0 }
 0x29a   : >> { %v4075_v61 = vpop.f32.mrf.mxu0  ;;  %v4105_v16 = vpop.f32.mrf.mxu1 }
 0x29b   : >> { %v5549_v12 = vmax.f32 %v5307_v19, %v2320_v14 }
 0x29c   : >> { %v2461_v58 = vpop.f32.mrf.mxu0  ;;  %v2550_v35 = vpop.f32.mrf.mxu1 }
 0x29d   : >> { %5706 = vst [vmem:[#allocation7_spill] sm:$0xff] %v5549_v12  ;;  %v2462_v12 = vadd.f32 %v2461_v58, %v5457_v44 }
 0x29e   : >> { %v4076_v17 = vpop.f32.mrf.mxu0  ;;  %v4106_v54 = vpop.f32.mrf.mxu1 }
 0x29f   : >> { %v2603_v51 = vadd.f32 %v2550_v35, %v2462_v12 }
 0x2a0   : >> { %v2466_v10 = vpop.f32.mrf.mxu0  ;;  %v5551_v13 = vpop.f32.mrf.mxu1 }
 0x2a2   : >> { %v4079_v38 = vpop.f32.mrf.mxu0  ;;  %v4109_v26 = vpop.f32.mrf.mxu1 }
 0x2a4   : >> { %v5553_v59 = vpop.f32.mrf.mxu0  ;;  %v5555_v20 = vpop.f32.mrf.mxu1 }
 0x2a6   : >> { %v4080_v25 = vpop.f32.mrf.mxu0  ;;  %v4110_v55 = vpop.f32.mrf.mxu1 }
 0x2a8   : >> { %v5557_v6 = vpop.f32.mrf.mxu0  ;;  %v5559_v45 = vpop.f32.mrf.mxu1 }
 0x2aa   : >> { %v4083_v19 = vpop.f32.mrf.mxu0  ;;  %v4113_v39 = vpop.f32.mrf.mxu1 }
 0x2ac   : >> { %v5561_v37 = vpop.f32.mrf.mxu0  ;;  %v5563_v3 = vpop.f32.mrf.mxu1 }
 0x2ae   : >> { %v4084_v50 = vpop.f32.mrf.mxu0  ;;  %v4114_v7 = vpop.f32.mrf.mxu1 }
 0x2b0   : >> { %v5565_v48 = vpop.f32.mrf.mxu0  ;;  %v5567_v29 = vpop.f32.mrf.mxu1 }
 0x2b2   : >> { %v4087_v52 = vpop.f32.mrf.mxu0  ;;  %v4117_v47 = vpop.f32.mrf.mxu1 }
 0x2b4   : >> { %v5569_v57 = vpop.f32.mrf.mxu0  ;;  %v5571_v30 = vpop.f32.mrf.mxu1 }
 0x2b6   : >> { %v4088_v46 = vpop.f32.mrf.mxu0  ;;  %v4118_v5 = vpop.f32.mrf.mxu1 }
 0x2b8   : >> { %v5573_v43 = vpop.f32.mrf.mxu0  ;;  %v5575_v21 = vpop.f32.mrf.mxu1 }
 0x2ba   : >> { %v4091_v1 = vpop.f32.mrf.mxu0  ;;  %v4121_v14 = vpop.f32.mrf.mxu1 }
 0x2bb   : >> { %v2459_v1 = vadd.f32 %v2458_v53, %v5453_v0  ;;  %v5603_v53 = vld [vmem:[%s5700_s2] ss:$0 sm:$0xff] }
 0x2bc   : >> { %v5577_v61 = vpop.f32.mrf.mxu0  ;;  %v5579_v16 = vpop.f32.mrf.mxu1 }
 0x2be   : >> { %v4092_v17 = vpop.f32.mrf.mxu0  ;;  %v4122_v54 = vpop.f32.mrf.mxu1 }
 0x2c0   : >> { %v5581_v38 = vpop.f32.mrf.mxu0  ;;  %v5583_v26 = vpop.f32.mrf.mxu1 }
 0x2c2   : >> { %v4095_v25 = vpop.f32.mrf.mxu0  ;;  %v4125_v55 = vpop.f32.mrf.mxu1 }
 0x2c3   : >> { %v2602_v55 = vadd.f32 %v2547_v56, %v2459_v1 }
 0x2c4   : >> { %v5585_v19 = vpop.f32.mrf.mxu0  ;;  %v5587_v39 = vpop.f32.mrf.mxu1 }
 0x2c6   : >> { %v4096_v50 = vpop.f32.mrf.mxu0  ;;  %v4126_v7 = vpop.f32.mrf.mxu1 }
 0x2c8   : >> { %v5589_v52 = vpop.f32.mrf.mxu0  ;;  %v5591_v47 = vpop.f32.mrf.mxu1 }
 0x2c9   : >> { %5707 = vst [vmem:[#allocation8_spill] sm:$0xff] %v5591_v47 }
 0x2ca   : >> { %v4099_v46 = vpop.f32.mrf.mxu0  ;;  %v4129_v5 = vpop.f32.mrf.mxu1 }
 0x2cb   : >> { %v2467_v46 = vadd.f32 %v2466_v10, %v5464_v9 }
 0x2cc   : >> { %v5594_v14 = vpop.f32.mrf.mxu0  ;;  %v5596_v17 = vpop.f32.mrf.mxu1 }
 0x2ce   : >> { %v4100_v54 = vpop.f32.mrf.mxu0  ;;  %v4130_v25 = vpop.f32.mrf.mxu1 }
 0x2d0   : >> { %v2650_v4 = vpop.f32.mrf.mxu0  ;;  %v2827_v50 = vpop.f32.mrf.mxu1 }
 0x2d1   : >> { %v2705_v7 = vadd.f32 %v2650_v4, %v2602_v55  ;;  %v2604_v4 = vadd.f32 %v5551_v13, %v2467_v46  ;;  %v2475_v13 = vadd.f32 %v5557_v6, %v5478_v63 }
 0x2d2   : >> { %v4135_v49 = vpop.f32.mrf.mxu0  ;;  %v4165_v34 = vpop.f32.mrf.mxu1 }
 0x2d3   : >> { %v2882_v5 = vadd.f32 %v2827_v50, %v2705_v7  ;;  %v2470_v34 = vadd.f32 %v5553_v59, %v5471_v33 }
 0x2d4   : >> { %v2653_v47 = vpop.f32.mrf.mxu0  ;;  %v2830_v0 = vpop.f32.mrf.mxu1 }
 0x2d5   : >> { %v2896_v56 = vadd.f32 %v5603_v53, %v2882_v5  ;;  %v2706_v1 = vadd.f32 %v2653_v47, %v2603_v51  ;;  %v2605_v51 = vadd.f32 %v5555_v20, %v2470_v34  ;;  %v2478_v20 = vadd.f32 %v5561_v37, %v5485_v36 }
 0x2d6   : >> { %v4136_v44 = vpop.f32.mrf.mxu0  ;;  %v4166_v58 = vpop.f32.mrf.mxu1 }
 0x2d7   : >> { %v2910_v49 = vmax.f32 %v2896_v56, 0.0  ;;  %v2883_v9 = vadd.f32 %v2830_v0, %v2706_v1  ;;  %v2606_v1 = vadd.f32 %v5559_v45, %v2475_v13  ;;  %v2483_v45 = vadd.f32 %v5565_v48, %v5492_v11 }
 0x2d8   : >> { %v2658_v12 = vpop.f32.mrf.mxu0  ;;  %v2835_v35 = vpop.f32.mrf.mxu1 }
 0x2d9   : >> { %v2924_v10 = vmax.f32 %v5461_v22, %v2910_v49  ;;  %v2897_v54 = vadd.f32 %v5603_v53, %v2883_v9  ;;  %v2707_v25 = vadd.f32 %v2658_v12, %v2604_v4  ;;  %v2607_v12 = vadd.f32 %v5563_v3, %v2478_v20 }
 0x2da   : >> { %v4139_v55 = vpop.f32.mrf.mxu0  ;;  %v4169_v50 = vpop.f32.mrf.mxu1  ;;  %v2486_v3 = vadd.f32 %v5569_v57, %v5499_v60  ;;  %v2494_v20 = vadd.f32 %v5577_v61, %v5513_v8 }
 0x2db   : >> { %2939 = vst.msk [vmem:[#allocation2] sm:$0xff] %vm2938_vm4, %v2924_v10  ;;  %v2911_v33 = vmax.f32 %v2897_v54, 0.0  ;;  %v2884_v59 = vadd.f32 %v2835_v35, %v2707_v25 }
 0x2dc   : >> { %v2661_v47 = vpop.f32.mrf.mxu0  ;;  %v2838_v7 = vpop.f32.mrf.mxu1 }
 0x2dd   : >> { %v2925_v46 = vmax.f32 %v5468_v15, %v2911_v33  ;;  %v2898_v22 = vadd.f32 %v5603_v53, %v2884_v59  ;;  %v2708_v5 = vadd.f32 %v2661_v47, %v2605_v51  ;;  %v2608_v51 = vadd.f32 %v5567_v29, %v2483_v45 }
 0x2de   : >> { %v4140_v0 = vpop.f32.mrf.mxu0  ;;  %v4170_v56 = vpop.f32.mrf.mxu1  ;;  %v2491_v29 = vadd.f32 %v5573_v43, %v5506_v23 }
 0x2df   : >> { %2940 = vst.msk [vmem:[#allocation2 + $0x8] sm:$0xff] %vm2938_vm4, %v2925_v46  ;;  %v2912_v63 = vmax.f32 %v2898_v22, 0.0  ;;  %v2885_v6 = vadd.f32 %v2838_v7, %v2708_v5  ;;  %v2609_v22 = vadd.f32 %v5571_v30, %v2486_v3 }
 0x2e0   : >> { %v2666_v44 = vpop.f32.mrf.mxu0  ;;  %v2843_v58 = vpop.f32.mrf.mxu1  ;;  %v2610_v23 = vadd.f32 %v5575_v21, %v2491_v29 }
 0x2e1   : >> { %v2926_v4 = vmax.f32 %v5475_v42, %v2912_v63  ;;  %v2899_v15 = vadd.f32 %v5603_v53, %v2885_v6  ;;  %v2709_v34 = vadd.f32 %v2666_v44, %v2606_v1 }
 0x2e2   : >> { %v4143_v49 = vpop.f32.mrf.mxu0  ;;  %v4173_v9 = vpop.f32.mrf.mxu1 }
 0x2e3   : >> { %2941 = vst.msk [vmem:[#allocation2 + $0x10] sm:$0xff] %vm2938_vm4, %v2926_v4  ;;  %v2913_v36 = vmax.f32 %v2899_v15, 0.0  ;;  %v2886_v37 = vadd.f32 %v2843_v58, %v2709_v34 }
 0x2e4   : >> { %v2669_v35 = vpop.f32.mrf.mxu0  ;;  %v2846_v10 = vpop.f32.mrf.mxu1 }
 0x2e5   : >> { %v2927_v54 = vmax.f32 %v5482_v28, %v2913_v36  ;;  %v2900_v42 = vadd.f32 %v5603_v53, %v2886_v37  ;;  %v2710_v25 = vadd.f32 %v2669_v35, %v2607_v12  ;;  %v2611_v12 = vadd.f32 %v5579_v16, %v2494_v20 }
 0x2e6   : >> { %v4144_v55 = vpop.f32.mrf.mxu0  ;;  %v4174_v50 = vpop.f32.mrf.mxu1  ;;  %v2499_v37 = vadd.f32 %v5581_v38, %v5520_v31  ;;  %v2502_v31 = vadd.f32 %v5585_v19, %v5527_v2 }
 0x2e7   : >> { %2942 = vst.msk [vmem:[#allocation2 + $0x18] sm:$0xff] %vm2938_vm4, %v2927_v54  ;;  %v2914_v11 = vmax.f32 %v2900_v42, 0.0  ;;  %v2887_v48 = vadd.f32 %v2846_v10, %v2710_v25 }
 0x2e8   : >> { %v2674_v13 = vpop.f32.mrf.mxu0  ;;  %v2851_v33 = vpop.f32.mrf.mxu1  ;;  %v2612_v3 = vadd.f32 %v5583_v26, %v2499_v37  ;;  %v2613_v26 = vadd.f32 %v5587_v39, %v2502_v31 }
 0x2e9   : >> { %v2928_v59 = vmax.f32 %v5489_v27, %v2914_v11  ;;  %v2901_v28 = vadd.f32 %v5603_v53, %v2887_v48  ;;  %v2711_v47 = vadd.f32 %v2674_v13, %v2608_v51 }
 0x2ea   : >> { %v4147_v7 = vpop.f32.mrf.mxu0  ;;  %v4177_v46 = vpop.f32.mrf.mxu1 }
 0x2eb   : >> { %2943 = vst.msk [vmem:[#allocation2 + $0x20] sm:$0xff] %vm2938_vm4, %v2928_v59  ;;  %v2915_v60 = vmax.f32 %v2901_v28, 0.0  ;;  %v2888_v57 = vadd.f32 %v2851_v33, %v2711_v47  ;;  %v2507_v28 = vadd.f32 %v5589_v52, %v5534_v24 }
 0x2ec   : >> { %v2677_v5 = vpop.f32.mrf.mxu0  ;;  %v2854_v0 = vpop.f32.mrf.mxu1 }
 0x2ed   : >> { %v2929_v56 = vmax.f32 %v5496_v40, %v2915_v60  ;;  %v2902_v27 = vadd.f32 %v5603_v53, %v2888_v57  ;;  %v2712_v1 = vadd.f32 %v2677_v5, %v2609_v22  ;;  %v5708_v57 = vld [vmem:[#allocation8_spill] sm:$0xff] }
 0x2ee   : >> { %v2953_v63 = vld [vmem:[#allocation2] ss:$4 sm:$0xff]  ;;  %v2961_v30 = vld [vmem:[#allocation2 + $0x1] ss:$4 sm:$0xff]  ;;  %v4148_v6 = vpop.f32.mrf.mxu0  ;;  %v4178_v44 = vpop.f32.mrf.mxu1  ;;  %v2973_v40 = vld [vmem:[#allocation2 + $0x2] ss:$4 sm:$0xff]  ;;  %v2614_v5 = vadd.f32 %v5708_v57, %v2507_v28 }
 0x2ef   : >> { %v2968_v43 = vmax.f32 %v2953_v63, %v2961_v30  ;;  %2944 = vst.msk [vmem:[#allocation2 + $0x28] sm:$0xff] %vm2938_vm4, %v2929_v56  ;;  %v2916_v58 = vmax.f32 %v2902_v27, 0.0  ;;  %v2889_v4 = vadd.f32 %v2854_v0, %v2712_v1  ;;  %v2985_v45 = vld [vmem:[#allocation2 + $0x3] ss:$4 sm:$0xff] }
 0x2f0   : >> { %v2682_v15 = vpop.f32.mrf.mxu0  ;;  %v2859_v34 = vpop.f32.mrf.mxu1  ;;  %v5709_v27 = vld [vmem:[#allocation5_spill] sm:$0xff] }
 0x2f1   : >> { %v2980_v49 = vmax.f32 %v2968_v43, %v2973_v40  ;;  %v2930_v9 = vmax.f32 %v5503_v18, %v2916_v58  ;;  %v2903_v8 = vadd.f32 %v5603_v53, %v2889_v4  ;;  %v2713_v61 = vadd.f32 %v2682_v15, %v2610_v23  ;;  %v5710_v23 = vld [vmem:[#allocation3_spill] sm:$0xff] }
 0x2f2   : >> { %v4151_v21 = vpop.f32.mrf.mxu0  ;;  %v4181_v36 = vpop.f32.mrf.mxu1  ;;  %v2510_v39 = vadd.f32 %v5594_v14, %v5709_v27 }
 0x2f3   : >> { %v2992_v35 = vmax.f32 %v2980_v49, %v2985_v45  ;;  %2945 = vst.msk [vmem:[#allocation2 + $0x30] sm:$0xff] %vm2938_vm4, %v2930_v9  ;;  %v2917_v10 = vmax.f32 %v2903_v8, 0.0  ;;  %v2890_v54 = vadd.f32 %v2859_v34, %v2713_v61  ;;  %v5711_v45 = vld [vmem:[#allocation4_spill] sm:$0xff] }
 0x2f4   : >> { %v2685_v18 = vpop.f32.mrf.mxu0  ;;  %v2862_v42 = vpop.f32.mrf.mxu1  ;;  %v2615_v14 = vadd.f32 %v5596_v17, %v2510_v39 }
 0x2f5   : >> { %2998 = vst.msk [vmem:[%s5650_s14] sm:$0xff] %vm2938_vm4, %v2992_v35  ;;  %v2931_v16 = vmax.f32 %v5510_v32, %v2917_v10  ;;  %v2904_v25 = vadd.f32 %v5603_v53, %v2890_v54  ;;  %v2714_v55 = vadd.f32 %v2685_v18, %v2611_v12  ;;  %v5712_v18 = vld [vmem:[#allocation6_spill] sm:$0xff] }
 0x2f6   : >> { %v4152_v50 = vpop.f32.mrf.mxu0  ;;  %v4182_v51 = vpop.f32.mrf.mxu1 }
 0x2f7   : >> { %2946 = vst.msk [vmem:[#allocation2 + $0x38] sm:$0xff] %vm2938_vm4, %v2931_v16  ;;  %v2918_v38 = vmax.f32 %v2904_v25, 0.0  ;;  %v2891_v11 = vadd.f32 %v2862_v42, %v2714_v55  ;;  %v5713_v55 = vld [vmem:[#allocation7_spill] sm:$0xff] }
 0x2f8   : >> { %v2690_v48 = vpop.f32.mrf.mxu0  ;;  %v2867_v13 = vpop.f32.mrf.mxu1 }
 0x2f9   : >> { %v2932_v33 = vmax.f32 %v5517_v41, %v2918_v38  ;;  %v2905_v32 = vadd.f32 %v5603_v53, %v2891_v11  ;;  %v2715_v59 = vadd.f32 %v2690_v48, %v2612_v3 }
 0x2fa   : >> { %v4155_v47 = vpop.f32.mrf.mxu0  ;;  %v4185_v7 = vpop.f32.mrf.mxu1 }
 0x2fb   : >> { %2947 = vst.msk [vmem:[#allocation2 + $0x40] sm:$0xff] %vm2938_vm4, %v2932_v33  ;;  %v2919_v2 = vmax.f32 %v2905_v32, 0.0  ;;  %v2892_v19 = vadd.f32 %v2867_v13, %v2715_v59 }
 0x2fc   : >> { %v2693_v46 = vpop.f32.mrf.mxu0  ;;  %v2870_v22 = vpop.f32.mrf.mxu1 }
 0x2fd   : >> { %v2933_v29 = vmax.f32 %v5524_v62, %v2919_v2  ;;  %v2906_v41 = vadd.f32 %v5603_v53, %v2892_v19  ;;  %v2716_v60 = vadd.f32 %v2693_v46, %v2613_v26 }
 0x2fe   : >> { %v2955_v0 = vld [vmem:[#allocation2 + $0x20] ss:$4 sm:$0xff]  ;;  %v2963_v56 = vld [vmem:[#allocation2 + $0x21] ss:$4 sm:$0xff]  ;;  %v4156_v24 = vpop.f32.mrf.mxu0  ;;  %v4186_v52 = vpop.f32.mrf.mxu1  ;;  %v2975_v30 = vld [vmem:[#allocation2 + $0x22] ss:$4 sm:$0xff] }
 0x2ff   : >> { %v2969_v1 = vmax.f32 %v2955_v0, %v2963_v56  ;;  %2948 = vst.msk [vmem:[#allocation2 + $0x48] sm:$0xff] %vm2938_vm4, %v2933_v29  ;;  %v2920_v20 = vmax.f32 %v2906_v41, 0.0  ;;  %v2893_v63 = vadd.f32 %v2870_v22, %v2716_v60  ;;  %v2987_v40 = vld [vmem:[#allocation2 + $0x23] ss:$4 sm:$0xff] }
 0x300   : >> { %v2698_v6 = vpop.f32.mrf.mxu0  ;;  %v2875_v62 = vpop.f32.mrf.mxu1 }
 0x301   : >> { %v2981_v44 = vmax.f32 %v2969_v1, %v2975_v30  ;;  %v2934_v43 = vmax.f32 %v5710_v23, %v2920_v20  ;;  %v2907_v58 = vadd.f32 %v5603_v53, %v2893_v63  ;;  %v2717_v4 = vadd.f32 %v2698_v6, %v2614_v5 }
 0x302   : >> { %v4159_v15 = vpop.f32.mrf.mxu0  ;;  %v4189_v34 = vpop.f32.mrf.mxu1 }
 0x303   : >> { %v2993_v49 = vmax.f32 %v2981_v44, %v2987_v40  ;;  %2949 = vst.msk [vmem:[#allocation2 + $0x50] sm:$0xff] %vm2938_vm4, %v2934_v43  ;;  %v2921_v9 = vmax.f32 %v2907_v58, 0.0  ;;  %v2894_v8 = vadd.f32 %v2875_v62, %v2717_v4 }
 0x304   : >> { %v2701_v61 = vpop.f32.mrf.mxu0  ;;  %v2878_v12 = vpop.f32.mrf.mxu1 }
 0x305   : >> { %2999 = vst.msk [vmem:[%s5650_s14 + $0x8] sm:$0xff] %vm2938_vm4, %v2993_v49  ;;  %v2935_v21 = vmax.f32 %v5711_v45, %v2921_v9  ;;  %v2908_v36 = vadd.f32 %v5603_v53, %v2894_v8  ;;  %v2718_v37 = vadd.f32 %v2701_v61, %v2615_v14 }
 0x306   : >> { %v4160_v35 = vpop.f32.mrf.mxu0  ;;  %v4190_v10 = vpop.f32.mrf.mxu1 }
 0x307   : >> { %2950 = vst.msk [vmem:[#allocation2 + $0x58] sm:$0xff] %vm2938_vm4, %v2935_v21  ;;  %v2922_v17 = vmax.f32 %v2908_v36, 0.0  ;;  %v2895_v54 = vadd.f32 %v2878_v12, %v2718_v37 }
 0x309   : >> { %v2936_v42 = vmax.f32 %v5712_v18, %v2922_v17  ;;  %v2909_v16 = vadd.f32 %v5603_v53, %v2895_v54 }
 0x30b   : >> { %2951 = vst.msk [vmem:[#allocation2 + $0x60] sm:$0xff] %vm2938_vm4, %v2936_v42  ;;  %v2923_v25 = vmax.f32 %v2909_v16, 0.0 }
 0x30d   : >> { %v2937_v50 = vmax.f32 %v5713_v55, %v2923_v25 }
 0x30e   : >> { %v2957_v51 = vld [vmem:[#allocation2 + $0x40] ss:$4 sm:$0xff]  ;;  %v2965_v3 = vld [vmem:[#allocation2 + $0x41] ss:$4 sm:$0xff]  ;;  %v2977_v38 = vld [vmem:[#allocation2 + $0x42] ss:$4 sm:$0xff] }
 0x30f   : >> { %v2970_v31 = vmax.f32 %v2957_v51, %v2965_v3  ;;  %2952 = vst.msk [vmem:[#allocation2 + $0x68] sm:$0xff] %vm2938_vm4, %v2937_v50  ;;  %v2989_v48 = vld [vmem:[#allocation2 + $0x43] ss:$4 sm:$0xff] }
 0x311   : >> { %v2982_v11 = vmax.f32 %v2970_v31, %v2977_v38 }
 0x313   : >> { %v2994_v13 = vmax.f32 %v2982_v11, %v2989_v48 }
 0x315   : >> { %3000 = vst.msk [vmem:[%s5650_s14 + $0x10] sm:$0xff] %vm2938_vm4, %v2994_v13 }
 0x316   : >> { %v2959_v33 = vld [vmem:[#allocation2 + $0x60] ss:$4 sm:$0xf]  ;;  %v2967_v32 = vld [vmem:[#allocation2 + $0x61] ss:$4 sm:$0xf] }
 0x317   : >> { %v2971_v53 = vmax.f32 %v2959_v33, %v2967_v32  ;;  %v2979_v59 = vld [vmem:[#allocation2 + $0x62] ss:$4 sm:$0xf]  ;;  %v2991_v47 = vld [vmem:[#allocation2 + $0x63] ss:$4 sm:$0xf] }
 0x319   : >> { %v2983_v28 = vmax.f32 %v2971_v53, %v2979_v59  ;;  %176 = sbr.rel (!%p174_p4) target bundleno = 16 (0x10), region = 97 }
 0x31b   : >> { %v2995_v7 = vmax.f32 %v2983_v28, %v2991_v47 }
 0x31d   : >> { %3002 = vst.msk [vmem:[%s5650_s14 + $0x18] sm:$0xf] %vm3001_vm5, %v2995_v7 }
 0x31e PF: > { %s13_s12 = sadd.s32 1, %s4298_s12  }
 0x31f   : > { %p10_p5 = scmp.ge.s32.totalorder %s13_s12, 4  }
 0x321   :  { %12 = sbr.rel (!%p10_p5) target bundleno = 1 (0x1), region = 108 }

// kernel: cnn_net_forward.5
= control target key start
LH: loop header
LB: loop body
LE: loop exit
PB: predicated region body
PF: predicated region fallthrough
CT: control target
= control target key end

     0   :  { %v199_v27 = vlaneseq  ;;  %v1366_v35 = vmov 1966171168   ;;  %vm1368_vm0 = vmmov 0   ;;  %s1669_s0 = inlined_call_operand.vmem [shape: bf16[2,1344], index: 0, kind: input, shape index: {}]   ;;  %s1670_s1 = inlined_call_operand.vmem [shape: bf16[1344,40], index: 1, kind: input, shape index: {}]   ;;  %s1671_s2 = inlined_call_operand.vmem [shape: f32[1,40], index: 2, kind: input, shape index: {}]   ;;  %s1672_s3 = inlined_call_operand.hbm [shape: f32[2,40], index: 3, kind: output, shape index: {}]  }
   0x1   :  { %v1259_v0 = vld [vmem:[%s1670_s1 + $0x78] sm:$0xff]   ;;  %v1263_v4 = vld [vmem:[%s1670_s1 + $0x70] sm:$0xff]   ;;  %v1267_v8 = vld [vmem:[%s1670_s1 + $0x68] sm:$0xff]   ;;  %v197_v36 = vunpack.c.l.s4 %v1366_v35 }
   0x2   :  { %v1260_v1 = vld [vmem:[%s1670_s1 + $0x38] sm:$0xff]   ;;  %1128 = vmatprep.subr.bf16.mxu0 %v1259_v0  ;;  %v1264_v5 = vld [vmem:[%s1670_s1 + $0x30] sm:$0xff]   ;;  %v1268_v9 = vld [vmem:[%s1670_s1 + $0x28] sm:$0xff]   ;;  %v200_v32 = vshrl.u32 %v199_v27, 7 }
   0x3   :  { %v1261_v2 = vld [vmem:[%s1670_s1 + $0xf8] sm:$0xff]   ;;  %1129 = vmatpush3.bf16.msra.mxu0 %v1260_v1  ;;  %v1265_v6 = vld [vmem:[%s1670_s1 + $0xf0] sm:$0xff]   ;;  %v1269_v10 = vld [vmem:[%s1670_s1 + $0xe8] sm:$0xff]   ;;  %v198_v39 = vunpack.c.0.s8 %v197_v36 }
   0x4   :  { %v1262_v3 = vld [vmem:[%s1670_s1 + $0xb8] sm:$0xff]   ;;  %1150 = vmatprep.subr.bf16.mxu1 %v1261_v2  ;;  %1130 = vmatprep.subr.bf16.mxu0 %v1263_v4  ;;  %v1266_v7 = vld [vmem:[%s1670_s1 + $0xb0] sm:$0xff]   ;;  %v1270_v11 = vld [vmem:[%s1670_s1 + $0xa8] sm:$0xff]  }
   0x5   :  { %1151 = vmatpush3.bf16.msra.mxu1 %v1262_v3  ;;  %v1271_v12 = vld [vmem:[%s1670_s1 + $0x60] sm:$0xff]   ;;  %v1275_v16 = vld [vmem:[%s1670_s1 + $0x58] sm:$0xff]   ;;  %v1279_v20 = vld [vmem:[%s1670_s1 + $0x50] sm:$0xff]   ;;  %v1495_v41 = vsub.s32 %v198_v39, %v200_v32 }
   0x6   :  { %1152 = vmatprep.subr.bf16.mxu1 %v1265_v6  ;;  %v1272_v13 = vld [vmem:[%s1670_s1 + $0x20] sm:$0xff]   ;;  %v1276_v17 = vld [vmem:[%s1670_s1 + $0x18] sm:$0xff]   ;;  %v1280_v21 = vld [vmem:[%s1670_s1 + $0x10] sm:$0xff]  }
   0x7   :  { %1131 = vmatpush3.bf16.msra.mxu0 %v1264_v5  ;;  %v1273_v14 = vld [vmem:[%s1670_s1 + $0xe0] sm:$0xff]   ;;  %v1277_v18 = vld [vmem:[%s1670_s1 + $0xd8] sm:$0xff]   ;;  %v1281_v22 = vld [vmem:[%s1670_s1 + $0xd0] sm:$0xff]  }
   0x8   :  { %1132 = vmatprep.subr.bf16.mxu0 %v1267_v8  ;;  %v1274_v15 = vld [vmem:[%s1670_s1 + $0xa0] sm:$0xff]   ;;  %v1278_v19 = vld [vmem:[%s1670_s1 + $0x98] sm:$0xff]   ;;  %v1282_v23 = vld [vmem:[%s1670_s1 + $0x90] sm:$0xff]  }
   0x9   :  { %1153 = vmatpush3.bf16.msra.mxu1 %v1266_v7  ;;  %v1283_v24 = vld [vmem:[%s1670_s1 + $0x48] sm:$0xff]   ;;  %v1287_v29 = vld [vmem:[%s1670_s1 + $0x40] sm:$0xff]   ;;  %v1292_v37 = vld [vmem:[%s1670_s1 + $0x178] sm:$0xff]  }
   0xa   :  { %1154 = vmatprep.subr.bf16.mxu1 %v1269_v10  ;;  %v1284_v25 = vld [vmem:[%s1670_s1 + $0x8] sm:$0xff]   ;;  %v1288_v30 = vld [vmem:[%s1670_s1] sm:$0xff]   ;;  %v1294_v40 = vld [vmem:[%s1670_s1 + $0x1f8] sm:$0xff]  }
   0xb   :  { %1133 = vmatpush3.bf16.msra.mxu0 %v1268_v9  ;;  %v1285_v26 = vld [vmem:[%s1670_s1 + $0xc8] sm:$0xff]   ;;  %v1289_v31 = vld [vmem:[%s1670_s1 + $0xc0] sm:$0xff]   ;;  %v1293_v48 = vld [vmem:[%s1670_s1 + $0x138] sm:$0xff]  }
   0xc   :  { %1134 = vmatprep.subr.bf16.mxu0 %v1271_v12  ;;  %v1286_v28 = vld [vmem:[%s1670_s1 + $0x88] sm:$0xff]   ;;  %v16_v33 = vld [vmem:[%s1669_s0] sm:$0xff]  ;;  %v1296_v51 = vld [vmem:[%s1670_s1 + $0x170] sm:$0xff]  }
   0xd   :  { %1155 = vmatpush3.bf16.msra.mxu1 %v1270_v11  ;;  %v1291_v34 = vld [vmem:[%s1670_s1 + $0x80] sm:$0xff]   ;;  %v195_v38 = vcombine.high %v16_v33, %v16_v33  ;;  %v202_v42 = vrot.slane %v16_v33, %v1495_v41  ;;  %v1295_v53 = vld [vmem:[%s1670_s1 + $0x1b8] sm:$0xff]   ;;  %v1298_v54 = vld [vmem:[%s1670_s1 + $0x1f0] sm:$0xff]  }
   0xe   :  { %1156 = vmatprep.subr.bf16.mxu1 %v1273_v14  ;;  %v1297_v56 = vld [vmem:[%s1670_s1 + $0x130] sm:$0xff]   ;;  %v1300_v57 = vld [vmem:[%s1670_s1 + $0x168] sm:$0xff]   ;;  %v1304_v61 = vld [vmem:[%s1670_s1 + $0x160] sm:$0xff]  }
   0xf   :  { %1135 = vmatpush3.bf16.msra.mxu0 %v1272_v13  ;;  %v1499_v43 = vrot.slane %v195_v38, %v1495_v41  ;;  %v210_v44 = vcombine.high %v202_v42, %v202_v42  ;;  %v218_v45 = vrot.slane %v202_v42, %v1495_v41  ;;  %v1299_v58 = vld [vmem:[%s1670_s1 + $0x1b0] sm:$0xff]   ;;  %v1302_v59 = vld [vmem:[%s1670_s1 + $0x1e8] sm:$0xff]   ;;  %v1306_v63 = vld [vmem:[%s1670_s1 + $0x1e0] sm:$0xff]  }
  0x10   :  { %1136 = vmatprep.subr.bf16.mxu0 %v1275_v16  ;;  %v1301_v60 = vld [vmem:[%s1670_s1 + $0x128] sm:$0xff]   ;;  %v1305_v0 = vld [vmem:[%s1670_s1 + $0x120] sm:$0xff]   ;;  %v1308_v1 = vld [vmem:[%s1670_s1 + $0x158] sm:$0xff]  }
  0x11   :  { %1157 = vmatpush3.bf16.msra.mxu1 %v1274_v15  ;;  %v211_v46 = vcombine.high %v1499_v43, %v1499_v43  ;;  %v232_v47 = vrot.slane %v210_v44, %v1495_v41  ;;  %v240_v50 = vcombine.high %v218_v45, %v218_v45  ;;  %v1303_v62 = vld [vmem:[%s1670_s1 + $0x1a8] sm:$0xff]   ;;  %v1307_v2 = vld [vmem:[%s1670_s1 + $0x1a0] sm:$0xff]   ;;  %v1310_v3 = vld [vmem:[%s1670_s1 + $0x1d8] sm:$0xff]  }
  0x12   :  { %1158 = vmatprep.subr.bf16.mxu1 %v1277_v18  ;;  %v1309_v4 = vld [vmem:[%s1670_s1 + $0x118] sm:$0xff]   ;;  %v1312_v5 = vld [vmem:[%s1670_s1 + $0x150] sm:$0xff]   ;;  %v1316_v9 = vld [vmem:[%s1670_s1 + $0x148] sm:$0xff]  }
  0x13   :  { %1137 = vmatpush3.bf16.msra.mxu0 %v1276_v17  ;;  %v239_v49 = vrot.slane %v211_v46, %v1495_v41  ;;  %817 = vmatprep.mubr.bf16.mxu0 %v232_v47  ;;  %v242_v52 = vcombine.high %v232_v47, %v232_v47  ;;  %v1311_v6 = vld [vmem:[%s1670_s1 + $0x198] sm:$0xff]   ;;  %v1314_v7 = vld [vmem:[%s1670_s1 + $0x1d0] sm:$0xff]   ;;  %v1318_v11 = vld [vmem:[%s1670_s1 + $0x1c8] sm:$0xff]   ;;  %v225_v17 = vrot.slane %v1499_v43, %v1495_v41 }
  0x14   :  { %1138 = vmatprep.subr.bf16.mxu0 %v1279_v20  ;;  %v1313_v8 = vld [vmem:[%s1670_s1 + $0x110] sm:$0xff]   ;;  %v1317_v12 = vld [vmem:[%s1670_s1 + $0x108] sm:$0xff]   ;;  %v1320_v13 = vld [vmem:[%s1670_s1 + $0x140] sm:$0xff]  }
  0x15   :  { %1159 = vmatpush3.bf16.msra.mxu1 %v1278_v19  ;;  %v243_v55 = vcombine.high %v239_v49, %v239_v49  ;;  %857 = vmatprep.mubr.bf16.mxu1 %v242_v52  ;;  %v1315_v10 = vld [vmem:[%s1670_s1 + $0x190] sm:$0xff]   ;;  %v1319_v14 = vld [vmem:[%s1670_s1 + $0x188] sm:$0xff]   ;;  %v1322_v15 = vld [vmem:[%s1670_s1 + $0x1c0] sm:$0xff]  }
  0x16   :  { %1160 = vmatprep.subr.bf16.mxu1 %v1281_v22  ;;  %v1321_v16 = vld [vmem:[%s1670_s1 + $0x100] sm:$0xff]   ;;  %v1324_v18 = vld [vmem:[%s1670_s1 + $0x278] sm:$0xff]   ;;  %v1326_v22 = vld [vmem:[%s1670_s1 + $0x270] sm:$0xff]  }
  0x17   :  { %1139 = vmatpush3.bf16.msra.mxu0 %v1280_v21  ;;  %v1323_v19 = vld [vmem:[%s1670_s1 + $0x180] sm:$0xff]   ;;  %v1325_v20 = vld [vmem:[%s1670_s1 + $0x238] sm:$0xff]   ;;  %v241_v21 = vcombine.high %v225_v17, %v225_v17  ;;  %v1335_v27 = vld [vmem:[%s1670_s1 + $0x290] sm:$0xff]  }
  0x18   :  { %1140 = vmatprep.subr.bf16.mxu0 %v1283_v24  ;;  %v1367_v24 = vmov 0.0  }
  0x19   :  { %1161 = vmatpush3.bf16.msra.mxu1 %v1282_v23  ;;  %v1332_v23 = vld [vmem:[%s1670_s1 + $0x298] sm:$0xff]  }
  0x1a   :  { %1162 = vmatprep.subr.bf16.mxu1 %v1285_v26  ;;  %v1328_v26 = vld [vmem:[%s1670_s1 + $0x268] sm:$0xff]  }
  0x1b   :  { %1141 = vmatpush3.bf16.msra.mxu0 %v1284_v25  ;;  %v1327_v25 = vld [vmem:[%s1670_s1 + $0x230] sm:$0xff]  }
  0x1c   :  { %1142 = vmatprep.subr.bf16.mxu0 %v1287_v29  ;;  %v1330_v29 = vld [vmem:[%s1670_s1 + $0x260] sm:$0xff]  }
  0x1d   :  { %1163 = vmatpush3.bf16.msra.mxu1 %v1286_v28  ;;  %v1329_v28 = vld [vmem:[%s1670_s1 + $0x228] sm:$0xff]  }
  0x1e   :  { %1164 = vmatprep.subr.bf16.mxu1 %v1289_v31  ;;  %v1042_v31 = vld.sshfl [vmem:[%s1669_s0 + $0x8] sm:$0x13 pattern:$0x75316420] }
  0x1f   :  { %1143 = vmatpush3.bf16.msra.mxu0 %v1288_v30  ;;  %v1338_v30 = vld [vmem:[%s1670_s1 + $0x288] sm:$0xff]   ;;  %v251_v32 = vcombine.high %v1042_v31, %v1042_v31 }
  0x20   :  { %1172 = vmatprep.subr.bf16.mxu0 %v1292_v37 }
  0x21   :  { %1165 = vmatpush3.bf16.msra.mxu1 %v1291_v34 }
  0x22   :  { %1194 = vmatprep.subr.bf16.mxu1 %v1294_v40  ;;  %818 = vmatmul.mubr.bf16.vlgmr.msra.gmra.mxu0 %v218_v45 }
  0x23   :  { %1173 = vmatpush3.bf16.msra.mxu0 %v1293_v48  ;;  %897 = vmatprep.mubr.bf16.mxu0 %v239_v49 }
  0x24   :  { %858 = vmatmul.mubr.bf16.vlgmr.msra.gmra.mxu1 %v240_v50  ;;  %1174 = vmatprep.subr.bf16.mxu0 %v1296_v51 }
  0x25   :  { %1195 = vmatpush3.bf16.msra.mxu1 %v1295_v53  ;;  %937 = vmatprep.mubr.bf16.mxu1 %v243_v55 }
  0x26   :  { %1196 = vmatprep.subr.bf16.mxu1 %v1298_v54 }
  0x27   :  { %1175 = vmatpush3.bf16.msra.mxu0 %v1297_v56 }
  0x28   :  { %1176 = vmatprep.subr.bf16.mxu0 %v1300_v57 }
  0x29   :  { %1197 = vmatpush3.bf16.msra.mxu1 %v1299_v58 }
  0x2a   :  { %1198 = vmatprep.subr.bf16.mxu1 %v1302_v59 }
  0x2b   :  { %1177 = vmatpush3.bf16.msra.mxu0 %v1301_v60 }
  0x2c   :  { %1178 = vmatprep.subr.bf16.mxu0 %v1304_v61 }
  0x2d   :  { %1199 = vmatpush3.bf16.msra.mxu1 %v1303_v62 }
  0x2e   :  { %1200 = vmatprep.subr.bf16.mxu1 %v1306_v63 }
  0x2f   :  { %1179 = vmatpush3.bf16.msra.mxu0 %v1305_v0 }
  0x30   :  { %1180 = vmatprep.subr.bf16.mxu0 %v1308_v1 }
  0x31   :  { %1201 = vmatpush3.bf16.msra.mxu1 %v1307_v2 }
  0x32   :  { %1202 = vmatprep.subr.bf16.mxu1 %v1310_v3 }
  0x33   :  { %1181 = vmatpush3.bf16.msra.mxu0 %v1309_v4 }
  0x34   :  { %1182 = vmatprep.subr.bf16.mxu0 %v1312_v5 }
  0x35   :  { %1203 = vmatpush3.bf16.msra.mxu1 %v1311_v6 }
  0x36   :  { %1204 = vmatprep.subr.bf16.mxu1 %v1314_v7 }
  0x37   :  { %1183 = vmatpush3.bf16.msra.mxu0 %v1313_v8 }
  0x38   :  { %1184 = vmatprep.subr.bf16.mxu0 %v1316_v9 }
  0x39   :  { %1205 = vmatpush3.bf16.msra.mxu1 %v1315_v10 }
  0x3a   :  { %1206 = vmatprep.subr.bf16.mxu1 %v1318_v11 }
  0x3b   :  { %1185 = vmatpush3.bf16.msra.mxu0 %v1317_v12 }
  0x3c   :  { %1186 = vmatprep.subr.bf16.mxu0 %v1320_v13 }
  0x3d   :  { %1207 = vmatpush3.bf16.msra.mxu1 %v1319_v14 }
  0x3e   :  { %1208 = vmatprep.subr.bf16.mxu1 %v1322_v15 }
  0x3f   :  { %1187 = vmatpush3.bf16.msra.mxu0 %v1321_v16 }
  0x40   :  { %1216 = vmatprep.subr.bf16.mxu0 %v1324_v18 }
  0x41   :  { %1209 = vmatpush3.bf16.msra.mxu1 %v1323_v19 }
  0x42   :  { %898 = vmatmul.mubr.bf16.vlgmr.msra.gmra.mxu0 %v225_v17  ;;  %1243 = vmatprep.subr.bf16.mxu1 %v1367_v24 }
  0x43   :  { %1217 = vmatpush3.bf16.msra.mxu0 %v1325_v20 }
  0x44   :  { %938 = vmatmul.mubr.bf16.vlgmr.msra.gmra.mxu1 %v241_v21  ;;  %1218 = vmatprep.subr.bf16.mxu0 %v1326_v22 }
  0x45   :  { %1244 = vmatpush3.bf16.msra.mxu1 %v1332_v23  ;;  %1251 = vmatprep.mubr.msk.bf16.mxu1 %vm1368_vm0, %v1367_v24 }
  0x46   :  { %1245 = vmatprep.subr.bf16.mxu1 %v1367_v24 }
  0x47   :  { %1219 = vmatpush3.bf16.msra.mxu0 %v1327_v25 }
  0x48   :  { %1220 = vmatprep.subr.bf16.mxu0 %v1328_v26 }
  0x49   :  { %1246 = vmatpush3.bf16.msra.mxu1 %v1335_v27 }
  0x4a   :  { %1247 = vmatprep.subr.bf16.mxu1 %v1367_v24 }
  0x4b   :  { %8 = vsyncpa [#allocation3], 0  ;;  %1221 = vmatpush3.bf16.msra.mxu0 %v1329_v28  ;;  %v1331_v33 = vld [vmem:[%s1670_s1 + $0x220] sm:$0xff]   ;;  %v1333_v34 = vld [vmem:[%s1670_s1 + $0x258] sm:$0xff]   ;;  %v258_v35 = vrot.slane %v1042_v31, %v1495_v41  ;;  %v265_v36 = vrot.slane %v251_v32, %v1495_v41  ;;  %vm781_vm1 = vcmask 523264   ;;  %s1369_s22 = smov [#allocation2]  }
  0x4c   :  { %1222 = vmatprep.subr.bf16.mxu0 %v1330_v29  ;;  %v1341_v37 = vld [vmem:[%s1670_s1 + $0x280] sm:$0xff]   ;;  %v1334_v38 = vld [vmem:[%s1670_s1 + $0x218] sm:$0xff]   ;;  %v1336_v39 = vld [vmem:[%s1670_s1 + $0x250] sm:$0xff]   ;;  %s1033_s23 = sshll.u32 %s1369_s22, 4  ;;  %vm1025_vm2 = vcmask 320512   ;;  %s1034_s23 = int_to_ptr.vmem [resolvable:$true] %s1033_s23 }
  0x4d   :  { %1248 = vmatpush3.bf16.msra.mxu1 %v1338_v30  ;;  %977 = vmatprep.mubr.bf16.mxu0 %v265_v36  ;;  %v266_v40 = vcombine.high %v258_v35, %v258_v35  ;;  %v1337_v41 = vld [vmem:[%s1670_s1 + $0x210] sm:$0xff]   ;;  %v1339_v42 = vld [vmem:[%s1670_s1 + $0x248] sm:$0xff]   ;;  %v1342_v44 = vld [vmem:[%s1670_s1 + $0x240] sm:$0xff]   ;;  %p1349_p1 = scmp.lt.s32.totalorder %s1034_s23, %s1034_s23 }
  0x4e   :  { %1249 = vmatprep.subr.bf16.mxu1 %v1367_v24  ;;  %v1340_v43 = vld [vmem:[%s1670_s1 + $0x208] sm:$0xff]   ;;  %v1343_v45 = vld [vmem:[%s1670_s1 + $0x200] sm:$0xff]  }
  0x4f   :  { %1223 = vmatpush3.bf16.msra.mxu0 %v1331_v33  ;;  %v1041_v1 = vld [vmem:[%s1671_s2] ss:$0 sm:$0xff]  ;;  %s1344_s2 = scalar_lea.vmem %s1034_s23, 32 }
  0x50   :  { %1224 = vmatprep.subr.bf16.mxu0 %v1333_v34  ;;  %p1345_p0 = scmp.ne.s32.totalorder %s1034_s23, %s1344_s2  ;;  %p1350_p2 = scmp.lt.s32.totalorder %s1344_s2, %s1344_s2 }
  0x51   :  { %1250 = vmatpush3.bf16.msra.mxu1 %v1341_v37 }
  0x52   :  { %p1351_p3 = por %p1350_p2, %p1349_p1 }
  0x53   :  { %1225 = vmatpush3.bf16.msra.mxu0 %v1334_v38 }
  0x54   :  { %1226 = vmatprep.subr.bf16.mxu0 %v1336_v39  ;;  %1252 = vmatmul.mubr.msk.bf16.vlgmr.msra.gmra.mxu1 %vm781_vm1, %v266_v40  ;;  %p1352_p4 = pnand %p1351_p3, %p1345_p0 }
  0x57   :  { %1227 = vmatpush3.bf16.msra.mxu0 %v1337_v41 }
  0x58   :  { %1228 = vmatprep.subr.bf16.mxu0 %v1339_v42 }
  0x5b   :  { %1229 = vmatpush3.bf16.msra.mxu0 %v1340_v43 }
  0x5c   :  { %1230 = vmatprep.subr.bf16.mxu0 %v1342_v44 }
  0x5f   :  { %1231 = vmatpush3.bf16.msra.mxu0 %v1343_v45 }
  0x62   :  { %978 = vmatmul.mubr.bf16.vlgmr.msra.gmra.mxu0 %v258_v35 }
  0xe2   :  { %v1144_v46 = vpop.f32.mrf.mxu0 }
  0xe4   :  { %v1145_v47 = vpop.f32.mrf.mxu0  ;;  %v1166_v48 = vpop.f32.mrf.mxu1 }
  0xe5   :  { %v1146_v0 = vadd.f32 %v1145_v47, %v1144_v46 }
  0xe6   :  { %v1147_v49 = vpop.f32.mrf.mxu0  ;;  %v1167_v50 = vpop.f32.mrf.mxu1 }
  0xe7   :  { %v820_v4 = vadd.f32 %v1146_v0, %v1041_v1  ;;  %v1168_v5 = vadd.f32 %v1167_v50, %v1166_v48 }
  0xe8   :  { %v1148_v51 = vpop.f32.mrf.mxu0  ;;  %v1169_v52 = vpop.f32.mrf.mxu1 }
  0xe9   :  { %v860_v7 = vadd.f32 %v1168_v5, %v820_v4 }
  0xea   :  { %v1170_v53 = vpop.f32.mrf.mxu1 }
 0x102   :  { %v1188_v54 = vpop.f32.mrf.mxu0 }
 0x104   :  { %v1189_v55 = vpop.f32.mrf.mxu0  ;;  %v1210_v56 = vpop.f32.mrf.mxu1 }
 0x105   :  { %v1190_v6 = vadd.f32 %v1189_v55, %v1188_v54 }
 0x106   :  { %v1191_v57 = vpop.f32.mrf.mxu0  ;;  %v1211_v58 = vpop.f32.mrf.mxu1 }
 0x107   :  { %v900_v8 = vadd.f32 %v1190_v6, %v860_v7  ;;  %v1212_v9 = vadd.f32 %v1211_v58, %v1210_v56 }
 0x108   :  { %v1192_v59 = vpop.f32.mrf.mxu0  ;;  %v1213_v60 = vpop.f32.mrf.mxu1 }
 0x109   :  { %v940_v12 = vadd.f32 %v1212_v9, %v900_v8 }
 0x10a   :  { %v1214_v61 = vpop.f32.mrf.mxu1 }
 0x114   :  { %v1019_v62 = vpop.f32.mrf.mxu1 }
 0x116   :  { %v1253_v63 = vpop.f32.mrf.mxu1 }
 0x118   :  { %v1022_v2 = vpop.f32.mrf.mxu1 }
 0x11a   :  { %v1254_v3 = vpop.f32.mrf.mxu1 }
 0x122   :  { %v1232_v10 = vpop.f32.mrf.mxu0 }
 0x124   :  { %v1233_v11 = vpop.f32.mrf.mxu0 }
 0x125   :  { %v1234_v13 = vadd.f32 %v1233_v11, %v1232_v10 }
 0x126   :  { %v1235_v14 = vpop.f32.mrf.mxu0 }
 0x127   :  { %v980_v15 = vadd.f32 %v1234_v13, %v940_v12 }
 0x128   :  { %v1236_v16 = vpop.f32.mrf.mxu0 }
 0x129   :  { %v1020_v17 = vadd.f32 %v1019_v62, %v980_v15 }
 0x12b   :  { %1026 = vst.msk [vmem:[#allocation2] sm:$0x3] %vm1025_vm2, %v1020_v17 }
 0x12c   :  { %1355 = shalt.err (!%p1352_p4)
}
 0x12d   :  { %1036 = dma.vmem_to_hbm [thread:$0]  %s1034_s23, 32, %s1672_s3, [#allocation3]  }
 0x12e   :  { %1364 = dma.done.wait [#allocation3], 32  }
 0x12f   :  { %1365 = vsyncadd [#allocation3], 4294967264 }
 0x130   :  { %1040 = vsyncpa [#allocation3], 1 }

</bundles_post_ra>
